<compile_context>
chip_gen: v6e
topology: v6e:2x2x1
jax: 0.10.0
libtpu: 0.0.40
codegen_flags: <defaults>
</compile_context>

<pallas_src>
import functools

import jax
import jax.numpy as jnp
from jax import lax
from jax.experimental import pallas as pl
from jax.experimental.pallas import tpu as pltpu

RECON_KERNEL_SIZE = 21  # module-level constant, as in the PyTorch file

_LANE = 128
_SUBLANE = 8
_VMEM_LIMIT_BYTES = 48 * 1024 * 1024   # < v7x 64 MiB/TC; well under v5e/v6e 128 MiB
_GEMM_TILE_PIXELS = 1024               # pixels (lanes) per conv-GEMM tile
_APPLY_TILE_H = 8                      # output rows per apply tile
_APPLY_TILE_W = 256                    # output cols per apply tile (mult. of 128)


def _round_up(x, m):
    return ((x + m - 1) // m) * m


# ---------------------------------------------------------------------------
# Pallas kernel 1: channel-major conv-as-GEMM:  (Cout, K) @ (K, pixel_tile)
#   - weights/bias blocks are VMEM-resident (constant index_map)
#   - pixel axis gridded & pipelined, pixels on the lane dim (dense stores)
#   - last layer also emits the per-pixel max over its 441 output channels so
#     the softmax stage never re-reads the logits for a max pass.
# ---------------------------------------------------------------------------
def _gemm_bias_relu_kernel(p_ref, w_ref, b_ref, o_ref):
    acc = jnp.dot(w_ref[...], p_ref[0], preferred_element_type=jnp.float32)
    acc = acc + b_ref[...]
    o_ref[0] = jnp.maximum(acc, 0.0).astype(o_ref.dtype)


def _gemm_bias_max_kernel(p_ref, w_ref, b_ref, o_ref, mx_ref):
    acc = jnp.dot(w_ref[...], p_ref[0], preferred_element_type=jnp.float32)
    acc = acc + b_ref[...]
    o_ref[0] = acc.astype(o_ref.dtype)
    # fused per-pixel max over the 441 taps (sublane reduce, XLU)
    mx_ref[0] = jnp.max(acc, axis=0, keepdims=True)


def _conv_gemm_nchw(patches, wt, bias, *, with_max):
    """patches: (N, K, P) channel-major im2col; wt: (Cout, K); bias: (Cout, 1)."""
    N, K, P = patches.shape
    Cout = wt.shape[0]
    tm = P if P <= _GEMM_TILE_PIXELS else _GEMM_TILE_PIXELS
    grid = (N, pl.cdiv(P, tm))
    in_specs = [
        pl.BlockSpec((1, K, tm), lambda n, i: (n, 0, i)),   # pixel tile (pipelined)
        pl.BlockSpec((Cout, K), lambda n, i: (0, 0)),       # weights, VMEM-resident
        pl.BlockSpec((Cout, 1), lambda n, i: (0, 0)),       # bias, VMEM-resident
    ]
    cparams = pltpu.CompilerParams(
        dimension_semantics=("parallel", "parallel"),
        vmem_limit_bytes=_VMEM_LIMIT_BYTES)

    if with_max:
        return pl.pallas_call(
            _gemm_bias_max_kernel,
            out_shape=(jax.ShapeDtypeStruct((N, Cout, P), jnp.float32),
                       jax.ShapeDtypeStruct((N, 1, P), jnp.float32)),
            grid=grid,
            in_specs=in_specs,
            out_specs=(pl.BlockSpec((1, Cout, tm), lambda n, i: (n, 0, i)),
                       pl.BlockSpec((1, 1, tm), lambda n, i: (n, 0, i))),
            compiler_params=cparams,
        )(patches, wt, bias)

    return pl.pallas_call(
        _gemm_bias_relu_kernel,
        out_shape=jax.ShapeDtypeStruct((N, Cout, P), jnp.float32),
        grid=grid,
        in_specs=in_specs,
        out_specs=pl.BlockSpec((1, Cout, tm), lambda n, i: (n, 0, i)),
        compiler_params=cparams,
    )(patches, wt, bias)


def _im2col_nchw(a, kh, kw):
    """Channel-major im2col: (N, C, H, W) -> (N, kh*kw*C, Ho*Wo), k=(ky,kx,c)."""
    # TODO(synk): fuse the whole conv stack into one Pallas kernel over halo'd
    # row bands (all layer weights fit in VMEM) to remove this 9x im2col HBM pass.
    N, C, H, W = a.shape
    ho, wo = H - kh + 1, W - kw + 1
    cols = jnp.concatenate(
        [a[:, :, ky:ky + ho, kx:kx + wo] for ky in range(kh) for kx in range(kw)],
        axis=1)                                            # (N, kh*kw*C, ho, wo)
    return cols.reshape(N, kh * kw * C, ho * wo), ho, wo


def conv2d_valid_nchw(a, w, b, *, with_max=False):
    """Valid conv in NCHW. w is HWIO (kh, kw, cin, cout)."""
    N = a.shape[0]
    kh, kw, cin, cout = w.shape
    patches, ho, wo = _im2col_nchw(a, kh, kw)
    wt = jnp.transpose(w, (3, 0, 1, 2)).reshape(cout, kh * kw * cin)  # (Cout, K)
    bias = b.reshape(cout, 1)
    out = _conv_gemm_nchw(patches, wt, bias, with_max=with_max)
    if with_max:
        logits, mx = out
        return logits.reshape(N, cout, ho, wo), mx.reshape(N, 1, ho, wo)
    return out.reshape(N, cout, ho, wo)


# ---------------------------------------------------------------------------
# Pallas kernel 2: softmax over the 441 predicted taps + weighted reduction of
# the 21x21 reflect-padded RGB neighborhoods.  Tiled over (image, W-tile,
# H-tile); the RGB comes in as a per-column-tile slab with a 20-pixel halo so
# all window reads use static lane offsets and stay in bounds.
# ---------------------------------------------------------------------------
def _softmax_apply_kernel(lg_ref, mx_ref, rgb_ref, o_ref, *, tile_h, tile_w, ksize, nch):
    # lg_ref:  (1, ksize*ksize, tile_h, tile_w)    kernel logits for this tile
    # mx_ref:  (1, 1, tile_h, tile_w)              per-pixel tap max (from the GEMM)
    # rgb_ref: (1, 1, nch, Hp_t, tile_w + 2r)      halo'd padded-RGB column slab
    # o_ref:   (1, nch, tile_h, tile_w)
    i = pl.program_id(2)
    row0 = i * tile_h
    m = mx_ref[0, 0]                                       # (tile_h, tile_w)

    def ky_body(ky, carry):
        acc, s = carry
        for kx in range(ksize):                            # static unroll over tap cols
            e = jnp.exp(lg_ref[0, ky * ksize + kx] - m)    # (tile_h, tile_w)
            # TODO(synk): replace these 21 lane-unaligned window loads with one
            # (nch, tile_h, tile_w+20) slab load per ky plus pltpu.roll-derived
            # windows to move the shifts off the vld slot onto the XLU.
            win = rgb_ref[0, 0, :, pl.ds(row0 + ky, tile_h), kx:kx + tile_w]  # (nch, th, tw)
            acc = acc + e[None, :, :] * win
            s = s + e
        return acc, s

    acc, s = lax.fori_loop(
        0, ksize, ky_body,
        (jnp.zeros((nch, tile_h, tile_w), jnp.float32),
         jnp.zeros((tile_h, tile_w), jnp.float32)))

    inv = pl.reciprocal(s, approx=False)   # exact; the divide is not on the critical slot
    o_ref[0] = (acc * inv[None, :, :]).astype(o_ref.dtype)


def apply_kernel(logits, maxes, rgb_pad, *, ksize=RECON_KERNEL_SIZE):
    """logits: (N, k*k, Ho, Wo); maxes: (N, 1, Ho, Wo);
       rgb_pad: (N, 3, Ho+2r, Wo+2r) reflect-padded RGB."""
    N, K2, Ho, Wo = logits.shape
    C = rgb_pad.shape[1]
    r = ksize // 2
    assert K2 == ksize * ksize

    tile_h = Ho if Ho < _APPLY_TILE_H else _APPLY_TILE_H
    tile_w = Wo if Wo < _APPLY_TILE_W else _APPLY_TILE_W
    nh = pl.cdiv(Ho, tile_h)
    nw = pl.cdiv(Wo, tile_w)
    Ho_t, Wo_t = nh * tile_h, nw * tile_w
    Hp_t = Ho_t + 2 * r
    slab_w = tile_w + 2 * r

    # Zero-pad the (cheap, 3-channel) padded RGB out to the tiled extents, then
    # pre-cut per-column-tile slabs with a 2r halo.  The duplicated halo columns
    # cost ~20/tile_w extra bytes and let the kernel address the halo with plain
    # leading-dim block indices; every in-kernel read is in bounds, and only a
    # small slab (not a whole image) is resident in VMEM at a time.
    xp = jnp.pad(rgb_pad, ((0, 0), (0, 0),
                           (0, Ho_t - Ho), (0, Wo_t - Wo)))
    rgb_slabs = jnp.stack(
        [lax.slice_in_dim(xp, j * tile_w, j * tile_w + slab_w, axis=3) for j in range(nw)],
        axis=1)                                            # (N, nw, C, Hp_t, slab_w)

    kern = functools.partial(_softmax_apply_kernel,
                             tile_h=tile_h, tile_w=tile_w, ksize=ksize, nch=C)
    out = pl.pallas_call(
        kern,
        out_shape=jax.ShapeDtypeStruct((N, C, Ho, Wo), jnp.float32),
        grid=(N, nw, nh),                                  # row tiles innermost: slab is reused
        in_specs=[
            pl.BlockSpec((1, K2, tile_h, tile_w), lambda n, j, i: (n, 0, i, j)),
            pl.BlockSpec((1, 1, tile_h, tile_w), lambda n, j, i: (n, 0, i, j)),
            pl.BlockSpec((1, 1, C, Hp_t, slab_w), lambda n, j, i: (n, j, 0, 0, 0)),
        ],
        out_specs=pl.BlockSpec((1, C, tile_h, tile_w), lambda n, j, i: (n, 0, i, j)),
        compiler_params=pltpu.CompilerParams(
            dimension_semantics=("parallel", "parallel", "parallel"),
            vmem_limit_bytes=_VMEM_LIMIT_BYTES),
    )(logits, maxes, rgb_slabs)
    return out


# ---------------------------------------------------------------------------
# KPCN forward (matches the PyTorch module semantics; output is NCHW)
# ---------------------------------------------------------------------------
def kpcn_forward(x_nchw, params):
    x = x_nchw.astype(jnp.float32)
    a = x
    for w, b in params[:-1]:
        a = conv2d_valid_nchw(a, w, b)                      # Conv + ReLU
    w, b = params[-1]
    logits, maxes = conv2d_valid_nchw(a, w, b, with_max=True)  # 441-ch kernel + tap max
    N, _, Ho, Wo = logits.shape

    # crop_like + reflect padding of the RGB channels (NCHW, matching F.pad)
    dx = x.shape[2] - Ho
    dy = x.shape[3] - Wo
    xc = x[:, :3, dx // 2: dx // 2 + Ho, dy // 2: dy // 2 + Wo]
    r = RECON_KERNEL_SIZE // 2
    xp = jnp.pad(xc, ((0, 0), (0, 0), (r, r), (r, r)), mode="reflect")

    return apply_kernel(logits, maxes, xp)                  # (N, 3, Ho, Wo)


# ---------------------------------------------------------------------------
# Deterministic parameter init (xavier_uniform weights, PyTorch-style biases)
# ---------------------------------------------------------------------------
def init_kpcn_params(key, n_layers, input_channels, hidden_channels, kernel_size):
    dims = [input_channels] + [hidden_channels] * (n_layers - 1) + [RECON_KERNEL_SIZE ** 2]
    params = []
    for i in range(n_layers):
        cin, cout = dims[i], dims[i + 1]
        key, kw, kb = jax.random.split(key, 3)
        fan_in = cin * kernel_size * kernel_size
        fan_out = cout * kernel_size * kernel_size
        bound = (6.0 / (fan_in + fan_out)) ** 0.5
        w = jax.random.uniform(kw, (kernel_size, kernel_size, cin, cout),
                               jnp.float32, -bound, bound)
        bb = 1.0 / (fan_in ** 0.5)
        b = jax.random.uniform(kb, (cout,), jnp.float32, -bb, bb)
        params.append((w, b))
    return params


# ---------------------------------------------------------------------------
# Pure-JAX reference (mirrors the PyTorch forward) for a correctness check
# ---------------------------------------------------------------------------
def kpcn_reference(x_nchw, params):
    a = x_nchw
    n_convs = len(params)
    for i, (w, b) in enumerate(params):
        w_oihw = jnp.transpose(w, (3, 2, 0, 1))
        a = lax.conv_general_dilated(a, w_oihw, (1, 1), "VALID",
                                     dimension_numbers=("NCHW", "OIHW", "NCHW"),
                                     precision=lax.Precision.HIGHEST)
        a = a + b.reshape(1, -1, 1, 1)
        if i < n_convs - 1:
            a = jnp.maximum(a, 0.0)
    N, _, Ho, Wo = a.shape
    sm = jax.nn.softmax(a, axis=1)
    dx = x_nchw.shape[2] - Ho
    dy = x_nchw.shape[3] - Wo
    xc = x_nchw[:, :3, dx // 2: dx // 2 + Ho, dy // 2: dy // 2 + Wo]
    r = RECON_KERNEL_SIZE // 2
    xp = jnp.pad(xc, ((0, 0), (0, 0), (r, r), (r, r)), mode="reflect")
    out = jnp.zeros((N, 3, Ho, Wo), jnp.float32)
    for ky in range(RECON_KERNEL_SIZE):
        for kx in range(RECON_KERNEL_SIZE):
            kk = ky * RECON_KERNEL_SIZE + kx
            out = out + sm[:, kk:kk + 1] * xp[:, :, ky:ky + Ho, kx:kx + Wo]
    return out


if __name__ == "__main__":
    key = jax.random.PRNGKey(0)
    k_par, k_x = jax.random.split(key)

    n_layers, input_channels, hidden_channels, kernel_size = 3, 5, 8, 3
    params = init_kpcn_params(k_par, n_layers, input_channels, hidden_channels, kernel_size)

    # H=W=18 -> after three 3x3 valid convs the per-pixel kernels are 12x12
    # (>= 11 so the 10-pixel reflect pad of apply_kernel is valid, as in PyTorch).
    x = jax.random.normal(k_x, (2, input_channels, 18, 18), jnp.float32)

    fwd = jax.jit(lambda xx: kpcn_forward(xx, params))
    out = jax.block_until_ready(fwd(x))

    assert out.shape == (2, 3, 12, 12), out.shape
    assert out.dtype == jnp.float32
    assert bool(jnp.all(jnp.isfinite(out)))

    ref = jax.block_until_ready(jax.jit(lambda xx: kpcn_reference(xx, params))(x))
    max_err = float(jnp.max(jnp.abs(out - ref)))
    if max_err > 5e-2:
        raise AssertionError(f"Pallas KPCN mismatch vs reference, max abs err = {max_err}")

    print("KERNEL_OK")
</pallas_src>

<mosaic_0001>
module attributes {stable_mosaic.version = 11 : i64} {
  func.func @_gemm_bias_relu_kernel(%arg0: i32, %arg1: i32, %arg2: memref<1x45x256xf32, #tpu.memory_space<vmem>>, %arg3: memref<8x45xf32, #tpu.memory_space<vmem>>, %arg4: memref<8x1xf32, #tpu.memory_space<vmem>>, %arg5: memref<1x8x256xf32, #tpu.memory_space<vmem>>) attributes {dimension_semantics = [#tpu.dimension_semantics<parallel>, #tpu.dimension_semantics<parallel>], iteration_bounds = array<i64: 2, 1>, scalar_prefetch = 0 : i64, scratch_operands = 0 : i64, tpu.core_type = #tpu.core_type<tc>, window_params = [{transform_indices = @transform_0, window_bounds = array<i64: 1, 45, 256>}, {pipeline_mode = #tpu.pipeline_mode<synchronous>, transform_indices = @transform_1, window_bounds = array<i64: 8, 45>}, {pipeline_mode = #tpu.pipeline_mode<synchronous>, transform_indices = @transform_2, window_bounds = array<i64: 8, 1>}, {transform_indices = @transform_3, window_bounds = array<i64: 1, 8, 256>}]} {
    %c0 = arith.constant 0 : index
    %c0_0 = arith.constant 0 : index
    %0 = vector.load %arg3[%c0, %c0_0] : memref<8x45xf32, #tpu.memory_space<vmem>>, vector<8x45xf32>
    %c0_1 = arith.constant 0 : index
    %c0_2 = arith.constant 0 : index
    %c0_3 = arith.constant 0 : index
    %1 = vector.load %arg2[%c0_1, %c0_2, %c0_3] : memref<1x45x256xf32, #tpu.memory_space<vmem>>, vector<1x45x256xf32>
    %2 = vector.shape_cast %1 : vector<1x45x256xf32> to vector<45x256xf32>
    %cst = arith.constant dense<0.000000e+00> : vector<8x256xf32>
    %3 = tpu.matmul %0, %2, %cst {dimension_numbers = #tpu.dot_dimension_numbers<[1], [0], [0], [1], [0, 0, 1, 1], [], []>} : vector<8x45xf32>, vector<45x256xf32>, vector<8x256xf32> -> vector<8x256xf32>
    %c0_4 = arith.constant 0 : index
    %c0_5 = arith.constant 0 : index
    %4 = vector.load %arg4[%c0_4, %c0_5] : memref<8x1xf32, #tpu.memory_space<vmem>>, vector<8x1xf32>
    %5 = vector.broadcast %4 : vector<8x1xf32> to vector<8x256xf32>
    %6 = arith.addf %3, %5 : vector<8x256xf32>
    %cst_6 = arith.constant 0.000000e+00 : f32
    %7 = vector.broadcast %cst_6 : f32 to vector<8x256xf32>
    %8 = arith.maximumf %6, %7 : vector<8x256xf32>
    %c0_7 = arith.constant 0 : index
    %c0_8 = arith.constant 0 : index
    %c0_9 = arith.constant 0 : index
    %9 = vector.load %arg5[%c0_7, %c0_8, %c0_9] : memref<1x8x256xf32, #tpu.memory_space<vmem>>, vector<1x8x256xf32>
    %10 = vector.shape_cast %9 : vector<1x8x256xf32> to vector<8x256xf32>
    %11 = vector.shape_cast %8 : vector<8x256xf32> to vector<1x8x256xf32>
    tpu.vector_store %arg5[%c0_7, %c0_8, %c0_9], %11 {strides = array<i32>} : memref<1x8x256xf32, #tpu.memory_space<vmem>>, vector<1x8x256xf32>,
    return
  }
  func.func @transform_0(%arg0: i32, %arg1: i32) -> (i32, i32, i32) {
    %c0_i32 = arith.constant 0 : i32
    %c0_i32_0 = arith.constant 0 : i32
    return %arg0, %c0_i32, %arg1 : i32, i32, i32
  }
  func.func @transform_1(%arg0: i32, %arg1: i32) -> (i32, i32) {
    %c0_i32 = arith.constant 0 : i32
    %c0_i32_0 = arith.constant 0 : i32
    %c0_i32_1 = arith.constant 0 : i32
    return %c0_i32, %c0_i32_0 : i32, i32
  }
  func.func @transform_2(%arg0: i32, %arg1: i32) -> (i32, i32) {
    %c0_i32 = arith.constant 0 : i32
    %c0_i32_0 = arith.constant 0 : i32
    %c0_i32_1 = arith.constant 0 : i32
    return %c0_i32, %c0_i32_0 : i32, i32
  }
  func.func @transform_3(%arg0: i32, %arg1: i32) -> (i32, i32, i32) {
    %c0_i32 = arith.constant 0 : i32
    %c0_i32_0 = arith.constant 0 : i32
    return %arg0, %c0_i32, %arg1 : i32, i32, i32
  }
}

module attributes {stable_mosaic.version = 11 : i64} {
  func.func @_gemm_bias_relu_kernel(%arg0: i32, %arg1: i32, %arg2: memref<1x72x196xf32, #tpu.memory_space<vmem>>, %arg3: memref<8x72xf32, #tpu.memory_space<vmem>>, %arg4: memref<8x1xf32, #tpu.memory_space<vmem>>, %arg5: memref<1x8x196xf32, #tpu.memory_space<vmem>>) attributes {dimension_semantics = [#tpu.dimension_semantics<parallel>, #tpu.dimension_semantics<parallel>], iteration_bounds = array<i64: 2, 1>, scalar_prefetch = 0 : i64, scratch_operands = 0 : i64, tpu.core_type = #tpu.core_type<tc>, window_params = [{transform_indices = @transform_0, window_bounds = array<i64: 1, 72, 196>}, {pipeline_mode = #tpu.pipeline_mode<synchronous>, transform_indices = @transform_1, window_bounds = array<i64: 8, 72>}, {pipeline_mode = #tpu.pipeline_mode<synchronous>, transform_indices = @transform_2, window_bounds = array<i64: 8, 1>}, {transform_indices = @transform_3, window_bounds = array<i64: 1, 8, 196>}]} {
    %c0 = arith.constant 0 : index
    %c0_0 = arith.constant 0 : index
    %0 = vector.load %arg3[%c0, %c0_0] : memref<8x72xf32, #tpu.memory_space<vmem>>, vector<8x72xf32>
    %c0_1 = arith.constant 0 : index
    %c0_2 = arith.constant 0 : index
    %c0_3 = arith.constant 0 : index
    %1 = vector.load %arg2[%c0_1, %c0_2, %c0_3] : memref<1x72x196xf32, #tpu.memory_space<vmem>>, vector<1x72x196xf32>
    %2 = vector.shape_cast %1 : vector<1x72x196xf32> to vector<72x196xf32>
    %cst = arith.constant dense<0.000000e+00> : vector<8x196xf32>
    %3 = tpu.matmul %0, %2, %cst {dimension_numbers = #tpu.dot_dimension_numbers<[1], [0], [0], [1], [0, 0, 1, 1], [], []>} : vector<8x72xf32>, vector<72x196xf32>, vector<8x196xf32> -> vector<8x196xf32>
    %c0_4 = arith.constant 0 : index
    %c0_5 = arith.constant 0 : index
    %4 = vector.load %arg4[%c0_4, %c0_5] : memref<8x1xf32, #tpu.memory_space<vmem>>, vector<8x1xf32>
    %5 = vector.broadcast %4 : vector<8x1xf32> to vector<8x196xf32>
    %6 = arith.addf %3, %5 : vector<8x196xf32>
    %cst_6 = arith.constant 0.000000e+00 : f32
    %7 = vector.broadcast %cst_6 : f32 to vector<8x196xf32>
    %8 = arith.maximumf %6, %7 : vector<8x196xf32>
    %c0_7 = arith.constant 0 : index
    %c0_8 = arith.constant 0 : index
    %c0_9 = arith.constant 0 : index
    %9 = vector.load %arg5[%c0_7, %c0_8, %c0_9] : memref<1x8x196xf32, #tpu.memory_space<vmem>>, vector<1x8x196xf32>
    %10 = vector.shape_cast %9 : vector<1x8x196xf32> to vector<8x196xf32>
    %11 = vector.shape_cast %8 : vector<8x196xf32> to vector<1x8x196xf32>
    tpu.vector_store %arg5[%c0_7, %c0_8, %c0_9], %11 {strides = array<i32>} : memref<1x8x196xf32, #tpu.memory_space<vmem>>, vector<1x8x196xf32>,
    return
  }
  func.func @transform_0(%arg0: i32, %arg1: i32) -> (i32, i32, i32) {
    %c0_i32 = arith.constant 0 : i32
    %c0_i32_0 = arith.constant 0 : i32
    return %arg0, %c0_i32, %arg1 : i32, i32, i32
  }
  func.func @transform_1(%arg0: i32, %arg1: i32) -> (i32, i32) {
    %c0_i32 = arith.constant 0 : i32
    %c0_i32_0 = arith.constant 0 : i32
    %c0_i32_1 = arith.constant 0 : i32
    return %c0_i32, %c0_i32_0 : i32, i32
  }
  func.func @transform_2(%arg0: i32, %arg1: i32) -> (i32, i32) {
    %c0_i32 = arith.constant 0 : i32
    %c0_i32_0 = arith.constant 0 : i32
    %c0_i32_1 = arith.constant 0 : i32
    return %c0_i32, %c0_i32_0 : i32, i32
  }
  func.func @transform_3(%arg0: i32, %arg1: i32) -> (i32, i32, i32) {
    %c0_i32 = arith.constant 0 : i32
    %c0_i32_0 = arith.constant 0 : i32
    return %arg0, %c0_i32, %arg1 : i32, i32, i32
  }
}

module attributes {stable_mosaic.version = 11 : i64} {
  func.func @_gemm_bias_max_kernel(%arg0: i32, %arg1: i32, %arg2: memref<1x72x144xf32, #tpu.memory_space<vmem>>, %arg3: memref<441x72xf32, #tpu.memory_space<vmem>>, %arg4: memref<441x1xf32, #tpu.memory_space<vmem>>, %arg5: memref<1x441x144xf32, #tpu.memory_space<vmem>>, %arg6: memref<1x1x144xf32, #tpu.memory_space<vmem>>) attributes {dimension_semantics = [#tpu.dimension_semantics<parallel>, #tpu.dimension_semantics<parallel>], iteration_bounds = array<i64: 2, 1>, scalar_prefetch = 0 : i64, scratch_operands = 0 : i64, tpu.core_type = #tpu.core_type<tc>, window_params = [{transform_indices = @transform_0, window_bounds = array<i64: 1, 72, 144>}, {pipeline_mode = #tpu.pipeline_mode<synchronous>, transform_indices = @transform_1, window_bounds = array<i64: 441, 72>}, {pipeline_mode = #tpu.pipeline_mode<synchronous>, transform_indices = @transform_2, window_bounds = array<i64: 441, 1>}, {transform_indices = @transform_3, window_bounds = array<i64: 1, 441, 144>}, {transform_indices = @transform_4, window_bounds = array<i64: 1, 1, 144>}]} {
    %c0 = arith.constant 0 : index
    %c0_0 = arith.constant 0 : index
    %0 = vector.load %arg3[%c0, %c0_0] : memref<441x72xf32, #tpu.memory_space<vmem>>, vector<441x72xf32>
    %c0_1 = arith.constant 0 : index
    %c0_2 = arith.constant 0 : index
    %c0_3 = arith.constant 0 : index
    %1 = vector.load %arg2[%c0_1, %c0_2, %c0_3] : memref<1x72x144xf32, #tpu.memory_space<vmem>>, vector<1x72x144xf32>
    %2 = vector.shape_cast %1 : vector<1x72x144xf32> to vector<72x144xf32>
    %cst = arith.constant dense<0.000000e+00> : vector<441x144xf32>
    %3 = tpu.matmul %0, %2, %cst {dimension_numbers = #tpu.dot_dimension_numbers<[1], [0], [0], [1], [0, 0, 1, 1], [], []>} : vector<441x72xf32>, vector<72x144xf32>, vector<441x144xf32> -> vector<441x144xf32>
    %c0_4 = arith.constant 0 : index
    %c0_5 = arith.constant 0 : index
    %4 = vector.load %arg4[%c0_4, %c0_5] : memref<441x1xf32, #tpu.memory_space<vmem>>, vector<441x1xf32>
    %5 = vector.broadcast %4 : vector<441x1xf32> to vector<441x144xf32>
    %6 = arith.addf %3, %5 : vector<441x144xf32>
    %c0_6 = arith.constant 0 : index
    %c0_7 = arith.constant 0 : index
    %c0_8 = arith.constant 0 : index
    %7 = vector.load %arg5[%c0_6, %c0_7, %c0_8] : memref<1x441x144xf32, #tpu.memory_space<vmem>>, vector<1x441x144xf32>
    %8 = vector.shape_cast %7 : vector<1x441x144xf32> to vector<441x144xf32>
    %9 = vector.shape_cast %6 : vector<441x144xf32> to vector<1x441x144xf32>
    tpu.vector_store %arg5[%c0_6, %c0_7, %c0_8], %9 {strides = array<i32>} : memref<1x441x144xf32, #tpu.memory_space<vmem>>, vector<1x441x144xf32>,
    %cst_9 = arith.constant dense<0xFF800000> : vector<144xf32>
    %10 = vector.multi_reduction <maximumf>, %6, %cst_9 [0] : vector<441x144xf32> to vector<144xf32>
    %11 = vector.shape_cast %10 : vector<144xf32> to vector<1x144xf32>
    %c0_10 = arith.constant 0 : index
    %c0_11 = arith.constant 0 : index
    %c0_12 = arith.constant 0 : index
    %12 = vector.load %arg6[%c0_10, %c0_11, %c0_12] : memref<1x1x144xf32, #tpu.memory_space<vmem>>, vector<1x1x144xf32>
    %13 = vector.shape_cast %12 : vector<1x1x144xf32> to vector<1x144xf32>
    %14 = vector.shape_cast %11 : vector<1x144xf32> to vector<1x1x144xf32>
    tpu.vector_store %arg6[%c0_10, %c0_11, %c0_12], %14 {strides = array<i32>} : memref<1x1x144xf32, #tpu.memory_space<vmem>>, vector<1x1x144xf32>,
    return
  }
  func.func @transform_0(%arg0: i32, %arg1: i32) -> (i32, i32, i32) {
    %c0_i32 = arith.constant 0 : i32
    %c0_i32_0 = arith.constant 0 : i32
    return %arg0, %c0_i32, %arg1 : i32, i32, i32
  }
  func.func @transform_1(%arg0: i32, %arg1: i32) -> (i32, i32) {
    %c0_i32 = arith.constant 0 : i32
    %c0_i32_0 = arith.constant 0 : i32
    %c0_i32_1 = arith.constant 0 : i32
    return %c0_i32, %c0_i32_0 : i32, i32
  }
  func.func @transform_2(%arg0: i32, %arg1: i32) -> (i32, i32) {
    %c0_i32 = arith.constant 0 : i32
    %c0_i32_0 = arith.constant 0 : i32
    %c0_i32_1 = arith.constant 0 : i32
    return %c0_i32, %c0_i32_0 : i32, i32
  }
  func.func @transform_3(%arg0: i32, %arg1: i32) -> (i32, i32, i32) {
    %c0_i32 = arith.constant 0 : i32
    %c0_i32_0 = arith.constant 0 : i32
    return %arg0, %c0_i32, %arg1 : i32, i32, i32
  }
  func.func @transform_4(%arg0: i32, %arg1: i32) -> (i32, i32, i32) {
    %c0_i32 = arith.constant 0 : i32
    %c0_i32_0 = arith.constant 0 : i32
    return %arg0, %c0_i32, %arg1 : i32, i32, i32
  }
}

module attributes {stable_mosaic.version = 11 : i64} {
  func.func @_softmax_apply_kernel(%arg0: i32, %arg1: i32, %arg2: i32, %arg3: memref<1x441x8x12xf32, #tpu.memory_space<vmem>>, %arg4: memref<1x1x8x12xf32, #tpu.memory_space<vmem>>, %arg5: memref<1x1x3x36x32xf32, #tpu.memory_space<vmem>>, %arg6: memref<1x3x8x12xf32, #tpu.memory_space<vmem>>) attributes {dimension_semantics = [#tpu.dimension_semantics<parallel>, #tpu.dimension_semantics<parallel>, #tpu.dimension_semantics<parallel>], iteration_bounds = array<i64: 2, 1, 2>, scalar_prefetch = 0 : i64, scratch_operands = 0 : i64, tpu.core_type = #tpu.core_type<tc>, window_params = [{transform_indices = @transform_0, window_bounds = array<i64: 1, 441, 8, 12>}, {transform_indices = @transform_1, window_bounds = array<i64: 1, 1, 8, 12>}, {transform_indices = @transform_2, window_bounds = array<i64: 1, 1, 3, 36, 32>}, {transform_indices = @transform_3, window_bounds = array<i64: 1, 3, 8, 12>}]} {
    %c8_i32 = arith.constant 8 : i32
    %0 = arith.muli %arg2, %c8_i32 : i32
    %c0 = arith.constant 0 : index
    %c0_0 = arith.constant 0 : index
    %c0_1 = arith.constant 0 : index
    %c0_2 = arith.constant 0 : index
    %1 = vector.load %arg4[%c0, %c0_0, %c0_1, %c0_2] : memref<1x1x8x12xf32, #tpu.memory_space<vmem>>, vector<1x1x8x12xf32>
    %2 = vector.shape_cast %1 : vector<1x1x8x12xf32> to vector<8x12xf32>
    %cst = arith.constant 0.000000e+00 : f32
    %3 = vector.broadcast %cst : f32 to vector<3x8x12xf32>
    %cst_3 = arith.constant 0.000000e+00 : f32
    %4 = vector.broadcast %cst_3 : f32 to vector<8x12xf32>
    %c0_i32 = arith.constant 0 : i32
    %c21_i32 = arith.constant 21 : i32
    %5 = arith.addi %c0_i32, %c21_i32 : i32
    %c1_i32 = arith.constant 1 : i32
    %6:2 = scf.for %arg7 = %c0_i32 to %5 step %c1_i32 iter_args(%arg8 = %3, %arg9 = %4) -> (vector<3x8x12xf32>, vector<8x12xf32>)  : i32 {
      %c21_i32_9 = arith.constant 21 : i32
      %14 = arith.muli %arg7, %c21_i32_9 : i32
      %c0_i32_10 = arith.constant 0 : i32
      %15 = arith.addi %14, %c0_i32_10 : i32
      %c0_11 = arith.constant 0 : index
      %16 = arith.index_cast %15 : i32 to index
      %c0_12 = arith.constant 0 : index
      %c0_13 = arith.constant 0 : index
      %17 = vector.load %arg3[%c0_11, %16, %c0_12, %c0_13] : memref<1x441x8x12xf32, #tpu.memory_space<vmem>>, vector<1x1x8x12xf32>
      %18 = vector.shape_cast %17 : vector<1x1x8x12xf32> to vector<8x12xf32>
      %19 = arith.subf %18, %2 : vector<8x12xf32>
      %20 = math.exp %19 : vector<8x12xf32>
      %21 = arith.addi %0, %arg7 : i32
      %c0_14 = arith.constant 0 : index
      %c0_15 = arith.constant 0 : index
      %c0_16 = arith.constant 0 : index
      %22 = arith.index_cast %21 : i32 to index
      %c0_17 = arith.constant 0 : index
      %23 = vector.load %arg5[%c0_14, %c0_15, %c0_16, %22, %c0_17] : memref<1x1x3x36x32xf32, #tpu.memory_space<vmem>>, vector<1x1x3x8x12xf32>
      %24 = vector.shape_cast %23 : vector<1x1x3x8x12xf32> to vector<3x8x12xf32>
      %25 = vector.shape_cast %20 : vector<8x12xf32> to vector<1x8x12xf32>
      %26 = vector.broadcast %25 : vector<1x8x12xf32> to vector<3x8x12xf32>
      %27 = arith.mulf %26, %24 : vector<3x8x12xf32>
      %28 = arith.addf %arg8, %27 : vector<3x8x12xf32>
      %29 = arith.addf %arg9, %20 : vector<8x12xf32>
      %c21_i32_18 = arith.constant 21 : i32
      %30 = arith.muli %arg7, %c21_i32_18 : i32
      %c1_i32_19 = arith.constant 1 : i32
      %31 = arith.addi %30, %c1_i32_19 : i32
      %c0_20 = arith.constant 0 : index
      %32 = arith.index_cast %31 : i32 to index
      %c0_21 = arith.constant 0 : index
      %c0_22 = arith.constant 0 : index
      %33 = vector.load %arg3[%c0_20, %32, %c0_21, %c0_22] : memref<1x441x8x12xf32, #tpu.memory_space<vmem>>, vector<1x1x8x12xf32>
      %34 = vector.shape_cast %33 : vector<1x1x8x12xf32> to vector<8x12xf32>
      %35 = arith.subf %34, %2 : vector<8x12xf32>
      %36 = math.exp %35 : vector<8x12xf32>
      %37 = arith.addi %0, %arg7 : i32
      %c0_23 = arith.constant 0 : index
      %c0_24 = arith.constant 0 : index
      %c0_25 = arith.constant 0 : index
      %38 = arith.index_cast %37 : i32 to index
      %c1 = arith.constant 1 : index
      %39 = vector.load %arg5[%c0_23, %c0_24, %c0_25, %38, %c1] : memref<1x1x3x36x32xf32, #tpu.memory_space<vmem>>, vector<1x1x3x8x12xf32>
      %40 = vector.shape_cast %39 : vector<1x1x3x8x12xf32> to vector<3x8x12xf32>
      %41 = vector.shape_cast %36 : vector<8x12xf32> to vector<1x8x12xf32>
      %42 = vector.broadcast %41 : vector<1x8x12xf32> to vector<3x8x12xf32>
      %43 = arith.mulf %42, %40 : vector<3x8x12xf32>
      %44 = arith.addf %28, %43 : vector<3x8x12xf32>
      %45 = arith.addf %29, %36 : vector<8x12xf32>
      %c21_i32_26 = arith.constant 21 : i32
      %46 = arith.muli %arg7, %c21_i32_26 : i32
      %c2_i32 = arith.constant 2 : i32
      %47 = arith.addi %46, %c2_i32 : i32
      %c0_27 = arith.constant 0 : index
      %48 = arith.index_cast %47 : i32 to index
      %c0_28 = arith.constant 0 : index
      %c0_29 = arith.constant 0 : index
      %49 = vector.load %arg3[%c0_27, %48, %c0_28, %c0_29] : memref<1x441x8x12xf32, #tpu.memory_space<vmem>>, vector<1x1x8x12xf32>
      %50 = vector.shape_cast %49 : vector<1x1x8x12xf32> to vector<8x12xf32>
      %51 = arith.subf %50, %2 : vector<8x12xf32>
      %52 = math.exp %51 : vector<8x12xf32>
      %53 = arith.addi %0, %arg7 : i32
      %c0_30 = arith.constant 0 : index
      %c0_31 = arith.constant 0 : index
      %c0_32 = arith.constant 0 : index
      %54 = arith.index_cast %53 : i32 to index
      %c2 = arith.constant 2 : index
      %55 = vector.load %arg5[%c0_30, %c0_31, %c0_32, %54, %c2] : memref<1x1x3x36x32xf32, #tpu.memory_space<vmem>>, vector<1x1x3x8x12xf32>
      %56 = vector.shape_cast %55 : vector<1x1x3x8x12xf32> to vector<3x8x12xf32>
      %57 = vector.shape_cast %52 : vector<8x12xf32> to vector<1x8x12xf32>
      %58 = vector.broadcast %57 : vector<1x8x12xf32> to vector<3x8x12xf32>
      %59 = arith.mulf %58, %56 : vector<3x8x12xf32>
      %60 = arith.addf %44, %59 : vector<3x8x12xf32>
      %61 = arith.addf %45, %52 : vector<8x12xf32>
      %c21_i32_33 = arith.constant 21 : i32
      %62 = arith.muli %arg7, %c21_i32_33 : i32
      %c3_i32 = arith.constant 3 : i32
      %63 = arith.addi %62, %c3_i32 : i32
      %c0_34 = arith.constant 0 : index
      %64 = arith.index_cast %63 : i32 to index
      %c0_35 = arith.constant 0 : index
      %c0_36 = arith.constant 0 : index
      %65 = vector.load %arg3[%c0_34, %64, %c0_35, %c0_36] : memref<1x441x8x12xf32, #tpu.memory_space<vmem>>, vector<1x1x8x12xf32>
      %66 = vector.shape_cast %65 : vector<1x1x8x12xf32> to vector<8x12xf32>
      %67 = arith.subf %66, %2 : vector<8x12xf32>
      %68 = math.exp %67 : vector<8x12xf32>
      %69 = arith.addi %0, %arg7 : i32
      %c0_37 = arith.constant 0 : index
      %c0_38 = arith.constant 0 : index
      %c0_39 = arith.constant 0 : index
      %70 = arith.index_cast %69 : i32 to index
      %c3 = arith.constant 3 : index
      %71 = vector.load %arg5[%c0_37, %c0_38, %c0_39, %70, %c3] : memref<1x1x3x36x32xf32, #tpu.memory_space<vmem>>, vector<1x1x3x8x12xf32>
      %72 = vector.shape_cast %71 : vector<1x1x3x8x12xf32> to vector<3x8x12xf32>
      %73 = vector.shape_cast %68 : vector<8x12xf32> to vector<1x8x12xf32>
      %74 = vector.broadcast %73 : vector<1x8x12xf32> to vector<3x8x12xf32>
      %75 = arith.mulf %74, %72 : vector<3x8x12xf32>
      %76 = arith.addf %60, %75 : vector<3x8x12xf32>
      %77 = arith.addf %61, %68 : vector<8x12xf32>
      %c21_i32_40 = arith.constant 21 : i32
      %78 = arith.muli %arg7, %c21_i32_40 : i32
      %c4_i32 = arith.constant 4 : i32
      %79 = arith.addi %78, %c4_i32 : i32
      %c0_41 = arith.constant 0 : index
      %80 = arith.index_cast %79 : i32 to index
      %c0_42 = arith.constant 0 : index
      %c0_43 = arith.constant 0 : index
      %81 = vector.load %arg3[%c0_41, %80, %c0_42, %c0_43] : memref<1x441x8x12xf32, #tpu.memory_space<vmem>>, vector<1x1x8x12xf32>
      %82 = vector.shape_cast %81 : vector<1x1x8x12xf32> to vector<8x12xf32>
      %83 = arith.subf %82, %2 : vector<8x12xf32>
      %84 = math.exp %83 : vector<8x12xf32>
      %85 = arith.addi %0, %arg7 : i32
      %c0_44 = arith.constant 0 : index
      %c0_45 = arith.constant 0 : index
      %c0_46 = arith.constant 0 : index
      %86 = arith.index_cast %85 : i32 to index
      %c4 = arith.constant 4 : index
      %87 = vector.load %arg5[%c0_44, %c0_45, %c0_46, %86, %c4] : memref<1x1x3x36x32xf32, #tpu.memory_space<vmem>>, vector<1x1x3x8x12xf32>
      %88 = vector.shape_cast %87 : vector<1x1x3x8x12xf32> to vector<3x8x12xf32>
      %89 = vector.shape_cast %84 : vector<8x12xf32> to vector<1x8x12xf32>
      %90 = vector.broadcast %89 : vector<1x8x12xf32> to vector<3x8x12xf32>
      %91 = arith.mulf %90, %88 : vector<3x8x12xf32>
      %92 = arith.addf %76, %91 : vector<3x8x12xf32>
      %93 = arith.addf %77, %84 : vector<8x12xf32>
      %c21_i32_47 = arith.constant 21 : i32
      %94 = arith.muli %arg7, %c21_i32_47 : i32
      %c5_i32 = arith.constant 5 : i32
      %95 = arith.addi %94, %c5_i32 : i32
      %c0_48 = arith.constant 0 : index
      %96 = arith.index_cast %95 : i32 to index
      %c0_49 = arith.constant 0 : index
      %c0_50 = arith.constant 0 : index
      %97 = vector.load %arg3[%c0_48, %96, %c0_49, %c0_50] : memref<1x441x8x12xf32, #tpu.memory_space<vmem>>, vector<1x1x8x12xf32>
      %98 = vector.shape_cast %97 : vector<1x1x8x12xf32> to vector<8x12xf32>
      %99 = arith.subf %98, %2 : vector<8x12xf32>
      %100 = math.exp %99 : vector<8x12xf32>
      %101 = arith.addi %0, %arg7 : i32
      %c0_51 = arith.constant 0 : index
      %c0_52 = arith.constant 0 : index
      %c0_53 = arith.constant 0 : index
      %102 = arith.index_cast %101 : i32 to index
      %c5 = arith.constant 5 : index
      %103 = vector.load %arg5[%c0_51, %c0_52, %c0_53, %102, %c5] : memref<1x1x3x36x32xf32, #tpu.memory_space<vmem>>, vector<1x1x3x8x12xf32>
      %104 = vector.shape_cast %103 : vector<1x1x3x8x12xf32> to vector<3x8x12xf32>
      %105 = vector.shape_cast %100 : vector<8x12xf32> to vector<1x8x12xf32>
      %106 = vector.broadcast %105 : vector<1x8x12xf32> to vector<3x8x12xf32>
      %107 = arith.mulf %106, %104 : vector<3x8x12xf32>
      %108 = arith.addf %92, %107 : vector<3x8x12xf32>
      %109 = arith.addf %93, %100 : vector<8x12xf32>
      %c21_i32_54 = arith.constant 21 : i32
      %110 = arith.muli %arg7, %c21_i32_54 : i32
      %c6_i32 = arith.constant 6 : i32
      %111 = arith.addi %110, %c6_i32 : i32
      %c0_55 = arith.constant 0 : index
      %112 = arith.index_cast %111 : i32 to index
      %c0_56 = arith.constant 0 : index
      %c0_57 = arith.constant 0 : index
      %113 = vector.load %arg3[%c0_55, %112, %c0_56, %c0_57] : memref<1x441x8x12xf32, #tpu.memory_space<vmem>>, vector<1x1x8x12xf32>
      %114 = vector.shape_cast %113 : vector<1x1x8x12xf32> to vector<8x12xf32>
      %115 = arith.subf %114, %2 : vector<8x12xf32>
      %116 = math.exp %115 : vector<8x12xf32>
      %117 = arith.addi %0, %arg7 : i32
      %c0_58 = arith.constant 0 : index
      %c0_59 = arith.constant 0 : index
      %c0_60 = arith.constant 0 : index
      %118 = arith.index_cast %117 : i32 to index
      %c6 = arith.constant 6 : index
      %119 = vector.load %arg5[%c0_58, %c0_59, %c0_60, %118, %c6] : memref<1x1x3x36x32xf32, #tpu.memory_space<vmem>>, vector<1x1x3x8x12xf32>
      %120 = vector.shape_cast %119 : vector<1x1x3x8x12xf32> to vector<3x8x12xf32>
      %121 = vector.shape_cast %116 : vector<8x12xf32> to vector<1x8x12xf32>
      %122 = vector.broadcast %121 : vector<1x8x12xf32> to vector<3x8x12xf32>
      %123 = arith.mulf %122, %120 : vector<3x8x12xf32>
      %124 = arith.addf %108, %123 : vector<3x8x12xf32>
      %125 = arith.addf %109, %116 : vector<8x12xf32>
      %c21_i32_61 = arith.constant 21 : i32
      %126 = arith.muli %arg7, %c21_i32_61 : i32
      %c7_i32 = arith.constant 7 : i32
      %127 = arith.addi %126, %c7_i32 : i32
      %c0_62 = arith.constant 0 : index
      %128 = arith.index_cast %127 : i32 to index
      %c0_63 = arith.constant 0 : index
      %c0_64 = arith.constant 0 : index
      %129 = vector.load %arg3[%c0_62, %128, %c0_63, %c0_64] : memref<1x441x8x12xf32, #tpu.memory_space<vmem>>, vector<1x1x8x12xf32>
      %130 = vector.shape_cast %129 : vector<1x1x8x12xf32> to vector<8x12xf32>
      %131 = arith.subf %130, %2 : vector<8x12xf32>
      %132 = math.exp %131 : vector<8x12xf32>
      %133 = arith.addi %0, %arg7 : i32
      %c0_65 = arith.constant 0 : index
      %c0_66 = arith.constant 0 : index
      %c0_67 = arith.constant 0 : index
      %134 = arith.index_cast %133 : i32 to index
      %c7 = arith.constant 7 : index
      %135 = vector.load %arg5[%c0_65, %c0_66, %c0_67, %134, %c7] : memref<1x1x3x36x32xf32, #tpu.memory_space<vmem>>, vector<1x1x3x8x12xf32>
      %136 = vector.shape_cast %135 : vector<1x1x3x8x12xf32> to vector<3x8x12xf32>
      %137 = vector.shape_cast %132 : vector<8x12xf32> to vector<1x8x12xf32>
      %138 = vector.broadcast %137 : vector<1x8x12xf32> to vector<3x8x12xf32>
      %139 = arith.mulf %138, %136 : vector<3x8x12xf32>
      %140 = arith.addf %124, %139 : vector<3x8x12xf32>
      %141 = arith.addf %125, %132 : vector<8x12xf32>
      %c21_i32_68 = arith.constant 21 : i32
      %142 = arith.muli %arg7, %c21_i32_68 : i32
      %c8_i32_69 = arith.constant 8 : i32
      %143 = arith.addi %142, %c8_i32_69 : i32
      %c0_70 = arith.constant 0 : index
      %144 = arith.index_cast %143 : i32 to index
      %c0_71 = arith.constant 0 : index
      %c0_72 = arith.constant 0 : index
      %145 = vector.load %arg3[%c0_70, %144, %c0_71, %c0_72] : memref<1x441x8x12xf32, #tpu.memory_space<vmem>>, vector<1x1x8x12xf32>
      %146 = vector.shape_cast %145 : vector<1x1x8x12xf32> to vector<8x12xf32>
      %147 = arith.subf %146, %2 : vector<8x12xf32>
      %148 = math.exp %147 : vector<8x12xf32>
      %149 = arith.addi %0, %arg7 : i32
      %c0_73 = arith.constant 0 : index
      %c0_74 = arith.constant 0 : index
      %c0_75 = arith.constant 0 : index
      %150 = arith.index_cast %149 : i32 to index
      %c8 = arith.constant 8 : index
      %151 = vector.load %arg5[%c0_73, %c0_74, %c0_75, %150, %c8] : memref<1x1x3x36x32xf32, #tpu.memory_space<vmem>>, vector<1x1x3x8x12xf32>
      %152 = vector.shape_cast %151 : vector<1x1x3x8x12xf32> to vector<3x8x12xf32>
      %153 = vector.shape_cast %148 : vector<8x12xf32> to vector<1x8x12xf32>
      %154 = vector.broadcast %153 : vector<1x8x12xf32> to vector<3x8x12xf32>
      %155 = arith.mulf %154, %152 : vector<3x8x12xf32>
      %156 = arith.addf %140, %155 : vector<3x8x12xf32>
      %157 = arith.addf %141, %148 : vector<8x12xf32>
      %c21_i32_76 = arith.constant 21 : i32
      %158 = arith.muli %arg7, %c21_i32_76 : i32
      %c9_i32 = arith.constant 9 : i32
      %159 = arith.addi %158, %c9_i32 : i32
      %c0_77 = arith.constant 0 : index
      %160 = arith.index_cast %159 : i32 to index
      %c0_78 = arith.constant 0 : index
      %c0_79 = arith.constant 0 : index
      %161 = vector.load %arg3[%c0_77, %160, %c0_78, %c0_79] : memref<1x441x8x12xf32, #tpu.memory_space<vmem>>, vector<1x1x8x12xf32>
      %162 = vector.shape_cast %161 : vector<1x1x8x12xf32> to vector<8x12xf32>
      %163 = arith.subf %162, %2 : vector<8x12xf32>
      %164 = math.exp %163 : vector<8x12xf32>
      %165 = arith.addi %0, %arg7 : i32
      %c0_80 = arith.constant 0 : index
      %c0_81 = arith.constant 0 : index
      %c0_82 = arith.constant 0 : index
      %166 = arith.index_cast %165 : i32 to index
      %c9 = arith.constant 9 : index
      %167 = vector.load %arg5[%c0_80, %c0_81, %c0_82, %166, %c9] : memref<1x1x3x36x32xf32, #tpu.memory_space<vmem>>, vector<1x1x3x8x12xf32>
      %168 = vector.shape_cast %167 : vector<1x1x3x8x12xf32> to vector<3x8x12xf32>
      %169 = vector.shape_cast %164 : vector<8x12xf32> to vector<1x8x12xf32>
      %170 = vector.broadcast %169 : vector<1x8x12xf32> to vector<3x8x12xf32>
      %171 = arith.mulf %170, %168 : vector<3x8x12xf32>
      %172 = arith.addf %156, %171 : vector<3x8x12xf32>
      %173 = arith.addf %157, %164 : vector<8x12xf32>
      %c21_i32_83 = arith.constant 21 : i32
      %174 = arith.muli %arg7, %c21_i32_83 : i32
      %c10_i32 = arith.constant 10 : i32
      %175 = arith.addi %174, %c10_i32 : i32
      %c0_84 = arith.constant 0 : index
      %176 = arith.index_cast %175 : i32 to index
      %c0_85 = arith.constant 0 : index
      %c0_86 = arith.constant 0 : index
      %177 = vector.load %arg3[%c0_84, %176, %c0_85, %c0_86] : memref<1x441x8x12xf32, #tpu.memory_space<vmem>>, vector<1x1x8x12xf32>
      %178 = vector.shape_cast %177 : vector<1x1x8x12xf32> to vector<8x12xf32>
      %179 = arith.subf %178, %2 : vector<8x12xf32>
      %180 = math.exp %179 : vector<8x12xf32>
      %181 = arith.addi %0, %arg7 : i32
      %c0_87 = arith.constant 0 : index
      %c0_88 = arith.constant 0 : index
      %c0_89 = arith.constant 0 : index
      %182 = arith.index_cast %181 : i32 to index
      %c10 = arith.constant 10 : index
      %183 = vector.load %arg5[%c0_87, %c0_88, %c0_89, %182, %c10] : memref<1x1x3x36x32xf32, #tpu.memory_space<vmem>>, vector<1x1x3x8x12xf32>
      %184 = vector.shape_cast %183 : vector<1x1x3x8x12xf32> to vector<3x8x12xf32>
      %185 = vector.shape_cast %180 : vector<8x12xf32> to vector<1x8x12xf32>
      %186 = vector.broadcast %185 : vector<1x8x12xf32> to vector<3x8x12xf32>
      %187 = arith.mulf %186, %184 : vector<3x8x12xf32>
      %188 = arith.addf %172, %187 : vector<3x8x12xf32>
      %189 = arith.addf %173, %180 : vector<8x12xf32>
      %c21_i32_90 = arith.constant 21 : i32
      %190 = arith.muli %arg7, %c21_i32_90 : i32
      %c11_i32 = arith.constant 11 : i32
      %191 = arith.addi %190, %c11_i32 : i32
      %c0_91 = arith.constant 0 : index
      %192 = arith.index_cast %191 : i32 to index
      %c0_92 = arith.constant 0 : index
      %c0_93 = arith.constant 0 : index
      %193 = vector.load %arg3[%c0_91, %192, %c0_92, %c0_93] : memref<1x441x8x12xf32, #tpu.memory_space<vmem>>, vector<1x1x8x12xf32>
      %194 = vector.shape_cast %193 : vector<1x1x8x12xf32> to vector<8x12xf32>
      %195 = arith.subf %194, %2 : vector<8x12xf32>
      %196 = math.exp %195 : vector<8x12xf32>
      %197 = arith.addi %0, %arg7 : i32
      %c0_94 = arith.constant 0 : index
      %c0_95 = arith.constant 0 : index
      %c0_96 = arith.constant 0 : index
      %198 = arith.index_cast %197 : i32 to index
      %c11 = arith.constant 11 : index
      %199 = vector.load %arg5[%c0_94, %c0_95, %c0_96, %198, %c11] : memref<1x1x3x36x32xf32, #tpu.memory_space<vmem>>, vector<1x1x3x8x12xf32>
      %200 = vector.shape_cast %199 : vector<1x1x3x8x12xf32> to vector<3x8x12xf32>
      %201 = vector.shape_cast %196 : vector<8x12xf32> to vector<1x8x12xf32>
      %202 = vector.broadcast %201 : vector<1x8x12xf32> to vector<3x8x12xf32>
      %203 = arith.mulf %202, %200 : vector<3x8x12xf32>
      %204 = arith.addf %188, %203 : vector<3x8x12xf32>
      %205 = arith.addf %189, %196 : vector<8x12xf32>
      %c21_i32_97 = arith.constant 21 : i32
      %206 = arith.muli %arg7, %c21_i32_97 : i32
      %c12_i32 = arith.constant 12 : i32
      %207 = arith.addi %206, %c12_i32 : i32
      %c0_98 = arith.constant 0 : index
      %208 = arith.index_cast %207 : i32 to index
      %c0_99 = arith.constant 0 : index
      %c0_100 = arith.constant 0 : index
      %209 = vector.load %arg3[%c0_98, %208, %c0_99, %c0_100] : memref<1x441x8x12xf32, #tpu.memory_space<vmem>>, vector<1x1x8x12xf32>
      %210 = vector.shape_cast %209 : vector<1x1x8x12xf32> to vector<8x12xf32>
      %211 = arith.subf %210, %2 : vector<8x12xf32>
      %212 = math.exp %211 : vector<8x12xf32>
      %213 = arith.addi %0, %arg7 : i32
      %c0_101 = arith.constant 0 : index
      %c0_102 = arith.constant 0 : index
      %c0_103 = arith.constant 0 : index
      %214 = arith.index_cast %213 : i32 to index
      %c12 = arith.constant 12 : index
      %215 = vector.load %arg5[%c0_101, %c0_102, %c0_103, %214, %c12] : memref<1x1x3x36x32xf32, #tpu.memory_space<vmem>>, vector<1x1x3x8x12xf32>
      %216 = vector.shape_cast %215 : vector<1x1x3x8x12xf32> to vector<3x8x12xf32>
      %217 = vector.shape_cast %212 : vector<8x12xf32> to vector<1x8x12xf32>
      %218 = vector.broadcast %217 : vector<1x8x12xf32> to vector<3x8x12xf32>
      %219 = arith.mulf %218, %216 : vector<3x8x12xf32>
      %220 = arith.addf %204, %219 : vector<3x8x12xf32>
      %221 = arith.addf %205, %212 : vector<8x12xf32>
      %c21_i32_104 = arith.constant 21 : i32
      %222 = arith.muli %arg7, %c21_i32_104 : i32
      %c13_i32 = arith.constant 13 : i32
      %223 = arith.addi %222, %c13_i32 : i32
      %c0_105 = arith.constant 0 : index
      %224 = arith.index_cast %223 : i32 to index
      %c0_106 = arith.constant 0 : index
      %c0_107 = arith.constant 0 : index
      %225 = vector.load %arg3[%c0_105, %224, %c0_106, %c0_107] : memref<1x441x8x12xf32, #tpu.memory_space<vmem>>, vector<1x1x8x12xf32>
      %226 = vector.shape_cast %225 : vector<1x1x8x12xf32> to vector<8x12xf32>
      %227 = arith.subf %226, %2 : vector<8x12xf32>
      %228 = math.exp %227 : vector<8x12xf32>
      %229 = arith.addi %0, %arg7 : i32
      %c0_108 = arith.constant 0 : index
      %c0_109 = arith.constant 0 : index
      %c0_110 = arith.constant 0 : index
      %230 = arith.index_cast %229 : i32 to index
      %c13 = arith.constant 13 : index
      %231 = vector.load %arg5[%c0_108, %c0_109, %c0_110, %230, %c13] : memref<1x1x3x36x32xf32, #tpu.memory_space<vmem>>, vector<1x1x3x8x12xf32>
      %232 = vector.shape_cast %231 : vector<1x1x3x8x12xf32> to vector<3x8x12xf32>
      %233 = vector.shape_cast %228 : vector<8x12xf32> to vector<1x8x12xf32>
      %234 = vector.broadcast %233 : vector<1x8x12xf32> to vector<3x8x12xf32>
      %235 = arith.mulf %234, %232 : vector<3x8x12xf32>
      %236 = arith.addf %220, %235 : vector<3x8x12xf32>
      %237 = arith.addf %221, %228 : vector<8x12xf32>
      %c21_i32_111 = arith.constant 21 : i32
      %238 = arith.muli %arg7, %c21_i32_111 : i32
      %c14_i32 = arith.constant 14 : i32
      %239 = arith.addi %238, %c14_i32 : i32
      %c0_112 = arith.constant 0 : index
      %240 = arith.index_cast %239 : i32 to index
      %c0_113 = arith.constant 0 : index
      %c0_114 = arith.constant 0 : index
      %241 = vector.load %arg3[%c0_112, %240, %c0_113, %c0_114] : memref<1x441x8x12xf32, #tpu.memory_space<vmem>>, vector<1x1x8x12xf32>
      %242 = vector.shape_cast %241 : vector<1x1x8x12xf32> to vector<8x12xf32>
      %243 = arith.subf %242, %2 : vector<8x12xf32>
      %244 = math.exp %243 : vector<8x12xf32>
      %245 = arith.addi %0, %arg7 : i32
      %c0_115 = arith.constant 0 : index
      %c0_116 = arith.constant 0 : index
      %c0_117 = arith.constant 0 : index
      %246 = arith.index_cast %245 : i32 to index
      %c14 = arith.constant 14 : index
      %247 = vector.load %arg5[%c0_115, %c0_116, %c0_117, %246, %c14] : memref<1x1x3x36x32xf32, #tpu.memory_space<vmem>>, vector<1x1x3x8x12xf32>
      %248 = vector.shape_cast %247 : vector<1x1x3x8x12xf32> to vector<3x8x12xf32>
      %249 = vector.shape_cast %244 : vector<8x12xf32> to vector<1x8x12xf32>
      %250 = vector.broadcast %249 : vector<1x8x12xf32> to vector<3x8x12xf32>
      %251 = arith.mulf %250, %248 : vector<3x8x12xf32>
      %252 = arith.addf %236, %251 : vector<3x8x12xf32>
      %253 = arith.addf %237, %244 : vector<8x12xf32>
      %c21_i32_118 = arith.constant 21 : i32
      %254 = arith.muli %arg7, %c21_i32_118 : i32
      %c15_i32 = arith.constant 15 : i32
      %255 = arith.addi %254, %c15_i32 : i32
      %c0_119 = arith.constant 0 : index
      %256 = arith.index_cast %255 : i32 to index
      %c0_120 = arith.constant 0 : index
      %c0_121 = arith.constant 0 : index
      %257 = vector.load %arg3[%c0_119, %256, %c0_120, %c0_121] : memref<1x441x8x12xf32, #tpu.memory_space<vmem>>, vector<1x1x8x12xf32>
      %258 = vector.shape_cast %257 : vector<1x1x8x12xf32> to vector<8x12xf32>
      %259 = arith.subf %258, %2 : vector<8x12xf32>
      %260 = math.exp %259 : vector<8x12xf32>
      %261 = arith.addi %0, %arg7 : i32
      %c0_122 = arith.constant 0 : index
      %c0_123 = arith.constant 0 : index
      %c0_124 = arith.constant 0 : index
      %262 = arith.index_cast %261 : i32 to index
      %c15 = arith.constant 15 : index
      %263 = vector.load %arg5[%c0_122, %c0_123, %c0_124, %262, %c15] : memref<1x1x3x36x32xf32, #tpu.memory_space<vmem>>, vector<1x1x3x8x12xf32>
      %264 = vector.shape_cast %263 : vector<1x1x3x8x12xf32> to vector<3x8x12xf32>
      %265 = vector.shape_cast %260 : vector<8x12xf32> to vector<1x8x12xf32>
      %266 = vector.broadcast %265 : vector<1x8x12xf32> to vector<3x8x12xf32>
      %267 = arith.mulf %266, %264 : vector<3x8x12xf32>
      %268 = arith.addf %252, %267 : vector<3x8x12xf32>
      %269 = arith.addf %253, %260 : vector<8x12xf32>
      %c21_i32_125 = arith.constant 21 : i32
      %270 = arith.muli %arg7, %c21_i32_125 : i32
      %c16_i32 = arith.constant 16 : i32
      %271 = arith.addi %270, %c16_i32 : i32
      %c0_126 = arith.constant 0 : index
      %272 = arith.index_cast %271 : i32 to index
      %c0_127 = arith.constant 0 : index
      %c0_128 = arith.constant 0 : index
      %273 = vector.load %arg3[%c0_126, %272, %c0_127, %c0_128] : memref<1x441x8x12xf32, #tpu.memory_space<vmem>>, vector<1x1x8x12xf32>
      %274 = vector.shape_cast %273 : vector<1x1x8x12xf32> to vector<8x12xf32>
      %275 = arith.subf %274, %2 : vector<8x12xf32>
      %276 = math.exp %275 : vector<8x12xf32>
      %277 = arith.addi %0, %arg7 : i32
      %c0_129 = arith.constant 0 : index
      %c0_130 = arith.constant 0 : index
      %c0_131 = arith.constant 0 : index
      %278 = arith.index_cast %277 : i32 to index
      %c16 = arith.constant 16 : index
      %279 = vector.load %arg5[%c0_129, %c0_130, %c0_131, %278, %c16] : memref<1x1x3x36x32xf32, #tpu.memory_space<vmem>>, vector<1x1x3x8x12xf32>
      %280 = vector.shape_cast %279 : vector<1x1x3x8x12xf32> to vector<3x8x12xf32>
      %281 = vector.shape_cast %276 : vector<8x12xf32> to vector<1x8x12xf32>
      %282 = vector.broadcast %281 : vector<1x8x12xf32> to vector<3x8x12xf32>
      %283 = arith.mulf %282, %280 : vector<3x8x12xf32>
      %284 = arith.addf %268, %283 : vector<3x8x12xf32>
      %285 = arith.addf %269, %276 : vector<8x12xf32>
      %c21_i32_132 = arith.constant 21 : i32
      %286 = arith.muli %arg7, %c21_i32_132 : i32
      %c17_i32 = arith.constant 17 : i32
      %287 = arith.addi %286, %c17_i32 : i32
      %c0_133 = arith.constant 0 : index
      %288 = arith.index_cast %287 : i32 to index
      %c0_134 = arith.constant 0 : index
      %c0_135 = arith.constant 0 : index
      %289 = vector.load %arg3[%c0_133, %288, %c0_134, %c0_135] : memref<1x441x8x12xf32, #tpu.memory_space<vmem>>, vector<1x1x8x12xf32>
      %290 = vector.shape_cast %289 : vector<1x1x8x12xf32> to vector<8x12xf32>
      %291 = arith.subf %290, %2 : vector<8x12xf32>
      %292 = math.exp %291 : vector<8x12xf32>
      %293 = arith.addi %0, %arg7 : i32
      %c0_136 = arith.constant 0 : index
      %c0_137 = arith.constant 0 : index
      %c0_138 = arith.constant 0 : index
      %294 = arith.index_cast %293 : i32 to index
      %c17 = arith.constant 17 : index
      %295 = vector.load %arg5[%c0_136, %c0_137, %c0_138, %294, %c17] : memref<1x1x3x36x32xf32, #tpu.memory_space<vmem>>, vector<1x1x3x8x12xf32>
      %296 = vector.shape_cast %295 : vector<1x1x3x8x12xf32> to vector<3x8x12xf32>
      %297 = vector.shape_cast %292 : vector<8x12xf32> to vector<1x8x12xf32>
      %298 = vector.broadcast %297 : vector<1x8x12xf32> to vector<3x8x12xf32>
      %299 = arith.mulf %298, %296 : vector<3x8x12xf32>
      %300 = arith.addf %284, %299 : vector<3x8x12xf32>
      %301 = arith.addf %285, %292 : vector<8x12xf32>
      %c21_i32_139 = arith.constant 21 : i32
      %302 = arith.muli %arg7, %c21_i32_139 : i32
      %c18_i32 = arith.constant 18 : i32
      %303 = arith.addi %302, %c18_i32 : i32
      %c0_140 = arith.constant 0 : index
      %304 = arith.index_cast %303 : i32 to index
      %c0_141 = arith.constant 0 : index
      %c0_142 = arith.constant 0 : index
      %305 = vector.load %arg3[%c0_140, %304, %c0_141, %c0_142] : memref<1x441x8x12xf32, #tpu.memory_space<vmem>>, vector<1x1x8x12xf32>
      %306 = vector.shape_cast %305 : vector<1x1x8x12xf32> to vector<8x12xf32>
      %307 = arith.subf %306, %2 : vector<8x12xf32>
      %308 = math.exp %307 : vector<8x12xf32>
      %309 = arith.addi %0, %arg7 : i32
      %c0_143 = arith.constant 0 : index
      %c0_144 = arith.constant 0 : index
      %c0_145 = arith.constant 0 : index
      %310 = arith.index_cast %309 : i32 to index
      %c18 = arith.constant 18 : index
      %311 = vector.load %arg5[%c0_143, %c0_144, %c0_145, %310, %c18] : memref<1x1x3x36x32xf32, #tpu.memory_space<vmem>>, vector<1x1x3x8x12xf32>
      %312 = vector.shape_cast %311 : vector<1x1x3x8x12xf32> to vector<3x8x12xf32>
      %313 = vector.shape_cast %308 : vector<8x12xf32> to vector<1x8x12xf32>
      %314 = vector.broadcast %313 : vector<1x8x12xf32> to vector<3x8x12xf32>
      %315 = arith.mulf %314, %312 : vector<3x8x12xf32>
      %316 = arith.addf %300, %315 : vector<3x8x12xf32>
      %317 = arith.addf %301, %308 : vector<8x12xf32>
      %c21_i32_146 = arith.constant 21 : i32
      %318 = arith.muli %arg7, %c21_i32_146 : i32
      %c19_i32 = arith.constant 19 : i32
      %319 = arith.addi %318, %c19_i32 : i32
      %c0_147 = arith.constant 0 : index
      %320 = arith.index_cast %319 : i32 to index
      %c0_148 = arith.constant 0 : index
      %c0_149 = arith.constant 0 : index
      %321 = vector.load %arg3[%c0_147, %320, %c0_148, %c0_149] : memref<1x441x8x12xf32, #tpu.memory_space<vmem>>, vector<1x1x8x12xf32>
      %322 = vector.shape_cast %321 : vector<1x1x8x12xf32> to vector<8x12xf32>
      %323 = arith.subf %322, %2 : vector<8x12xf32>
      %324 = math.exp %323 : vector<8x12xf32>
      %325 = arith.addi %0, %arg7 : i32
      %c0_150 = arith.constant 0 : index
      %c0_151 = arith.constant 0 : index
      %c0_152 = arith.constant 0 : index
      %326 = arith.index_cast %325 : i32 to index
      %c19 = arith.constant 19 : index
      %327 = vector.load %arg5[%c0_150, %c0_151, %c0_152, %326, %c19] : memref<1x1x3x36x32xf32, #tpu.memory_space<vmem>>, vector<1x1x3x8x12xf32>
      %328 = vector.shape_cast %327 : vector<1x1x3x8x12xf32> to vector<3x8x12xf32>
      %329 = vector.shape_cast %324 : vector<8x12xf32> to vector<1x8x12xf32>
      %330 = vector.broadcast %329 : vector<1x8x12xf32> to vector<3x8x12xf32>
      %331 = arith.mulf %330, %328 : vector<3x8x12xf32>
      %332 = arith.addf %316, %331 : vector<3x8x12xf32>
      %333 = arith.addf %317, %324 : vector<8x12xf32>
      %c21_i32_153 = arith.constant 21 : i32
      %334 = arith.muli %arg7, %c21_i32_153 : i32
      %c20_i32 = arith.constant 20 : i32
      %335 = arith.addi %334, %c20_i32 : i32
      %c0_154 = arith.constant 0 : index
      %336 = arith.index_cast %335 : i32 to index
      %c0_155 = arith.constant 0 : index
      %c0_156 = arith.constant 0 : index
      %337 = vector.load %arg3[%c0_154, %336, %c0_155, %c0_156] : memref<1x441x8x12xf32, #tpu.memory_space<vmem>>, vector<1x1x8x12xf32>
      %338 = vector.shape_cast %337 : vector<1x1x8x12xf32> to vector<8x12xf32>
      %339 = arith.subf %338, %2 : vector<8x12xf32>
      %340 = math.exp %339 : vector<8x12xf32>
      %341 = arith.addi %0, %arg7 : i32
      %c0_157 = arith.constant 0 : index
      %c0_158 = arith.constant 0 : index
      %c0_159 = arith.constant 0 : index
      %342 = arith.index_cast %341 : i32 to index
      %c20 = arith.constant 20 : index
      %343 = vector.load %arg5[%c0_157, %c0_158, %c0_159, %342, %c20] : memref<1x1x3x36x32xf32, #tpu.memory_space<vmem>>, vector<1x1x3x8x12xf32>
      %344 = vector.shape_cast %343 : vector<1x1x3x8x12xf32> to vector<3x8x12xf32>
      %345 = vector.shape_cast %340 : vector<8x12xf32> to vector<1x8x12xf32>
      %346 = vector.broadcast %345 : vector<1x8x12xf32> to vector<3x8x12xf32>
      %347 = arith.mulf %346, %344 : vector<3x8x12xf32>
      %348 = arith.addf %332, %347 : vector<3x8x12xf32>
      %349 = arith.addf %333, %340 : vector<8x12xf32>
      scf.yield %348, %349 : vector<3x8x12xf32>, vector<8x12xf32>
    }
    %c21_i32_4 = arith.constant 21 : i32
    %7 = tpu.reciprocal %6#1 : vector<8x12xf32> -> vector<8x12xf32>
    %8 = vector.shape_cast %7 : vector<8x12xf32> to vector<1x8x12xf32>
    %9 = vector.broadcast %8 : vector<1x8x12xf32> to vector<3x8x12xf32>
    %10 = arith.mulf %6#0, %9 : vector<3x8x12xf32>
    %c0_5 = arith.constant 0 : index
    %c0_6 = arith.constant 0 : index
    %c0_7 = arith.constant 0 : index
    %c0_8 = arith.constant 0 : index
    %11 = vector.load %arg6[%c0_5, %c0_6, %c0_7, %c0_8] : memref<1x3x8x12xf32, #tpu.memory_space<vmem>>, vector<1x3x8x12xf32>
    %12 = vector.shape_cast %11 : vector<1x3x8x12xf32> to vector<3x8x12xf32>
    %13 = vector.shape_cast %10 : vector<3x8x12xf32> to vector<1x3x8x12xf32>
    tpu.vector_store %arg6[%c0_5, %c0_6, %c0_7, %c0_8], %13 {strides = array<i32>} : memref<1x3x8x12xf32, #tpu.memory_space<vmem>>, vector<1x3x8x12xf32>,
    return
  }
  func.func @transform_0(%arg0: i32, %arg1: i32, %arg2: i32) -> (i32, i32, i32, i32) {
    %c0_i32 = arith.constant 0 : i32
    %c0_i32_0 = arith.constant 0 : i32
    return %arg0, %c0_i32, %arg2, %arg1 : i32, i32, i32, i32
  }
  func.func @transform_1(%arg0: i32, %arg1: i32, %arg2: i32) -> (i32, i32, i32, i32) {
    %c0_i32 = arith.constant 0 : i32
    %c0_i32_0 = arith.constant 0 : i32
    return %arg0, %c0_i32, %arg2, %arg1 : i32, i32, i32, i32
  }
  func.func @transform_2(%arg0: i32, %arg1: i32, %arg2: i32) -> (i32, i32, i32, i32, i32) {
    %c0_i32 = arith.constant 0 : i32
    %c0_i32_0 = arith.constant 0 : i32
    %c0_i32_1 = arith.constant 0 : i32
    %c0_i32_2 = arith.constant 0 : i32
    return %arg0, %arg1, %c0_i32, %c0_i32_0, %c0_i32_1 : i32, i32, i32, i32, i32
  }
  func.func @transform_3(%arg0: i32, %arg1: i32, %arg2: i32) -> (i32, i32, i32, i32) {
    %c0_i32 = arith.constant 0 : i32
    %c0_i32_0 = arith.constant 0 : i32
    return %arg0, %c0_i32, %arg2, %arg1 : i32, i32, i32, i32
  }
}

</mosaic_0001>

<bundles_post_ra>
// kernel: _lambda_.4
= control target key start
LH: loop header
LB: loop body
LE: loop exit
PB: predicated region body
PF: predicated region fallthrough
CT: control target
= control target key end

     0   :  { %s490_s12 = smov 0   ;;  %s492_s13 = smov 0   ;;  %s533_s0 = inlined_call_operand.vmem [shape: f32[2,45,256], index: 0, kind: input, shape index: {}]   ;;  %s534_s1 = inlined_call_operand.vmem [shape: f32[8,45], index: 1, kind: input, shape index: {}]   ;;  %s535_s2 = inlined_call_operand.vmem [shape: f32[8,1], index: 2, kind: input, shape index: {}]   ;;  %s536_s3 = inlined_call_operand.vmem [shape: f32[2,8,256], index: 3, kind: output, shape index: {}]  }
   0x1   :  { %s494_s14 = smov 0  }
   0x2 LB: > { %s25_s15 = sadd.s32 1, %s462_s13  ;;  %p406_p0 = scmp.ge.s32.totalorder %s466_s14, 1  ;;  %s466_s14 = sphi %s494_s14, %s13_s14   ;;  %s462_s13 = sphi %s492_s13, %s538_s13   ;;  %s458_s12 = sphi %s490_s12, %s537_s12  }
   0x3   : > { %p27_p1 = scmp.ge.s32.totalorder %s25_s15, 2  ;;  %p158_p2 = scmp.lt.s32.totalorder %s466_s14, 3 }
   0x5   : > { %s540_s15 = smov (%p27_p1, %s25_s15), 0  ;;  %p159_p3 = pnand %p406_p0, %p158_p2 }
   0x6   : > { %p191_p4 = scmp.lt.s32.totalorder (!%p159_p3), %s458_s12, 1 }
   0x7   : > { %162 = sbr.rel (%p159_p3) target bundleno = 229 (0xe5), region = 32 }
   0xc   : > { %v468_v0 = vmov 0.0   ;;  %v469_v1 = vmov 0   ;;  %v223_v2 = vld [vmem:[%s535_s2] sm:$0xff]  ;;  %s542_s12 = smov (!%p191_p4, %s458_s12), 1  ;;  %vm233_vm0 = vcmask 1044480   ;;  %vm229_vm1 = vcmask 367616  }
   0xd   : > { %304 = vmatprep.mubr.f32.mxu0 %v468_v0  ;;  %443 = vset.pattern.permute.xlu0 %v469_v1  ;;  %s416_s18 = smul.u32 96, %s542_s12  ;;  %v210_v15 = vld [vmem:[%s534_s1] sm:$0xff]  ;;  %s415_s24 = sshll.u32 %s542_s12, 4 }
   0xe   : > { %226 = vperm.xlu0 %443, %v223_v2   ;;  %s208_s27 = scalar_lea.vmem %s536_s3, %s415_s24 }
   0xf   : > { %s198_s21 = scalar_lea.vmem %s533_s0, %s416_s18 }
  0x10   : > { %v222_v3 = vld [vmem:[%s198_s21 + $0x58] sm:$0x1f]  ;;  %v221_v4 = vld [vmem:[%s198_s21 + $0x50] sm:$0x1f]  ;;  %v220_v5 = vld [vmem:[%s198_s21 + $0x48] sm:$0xff] }
  0x11   : > { %410 = vmatprep.subr.msk.mxu0 %vm233_vm0, %v222_v3  ;;  %v219_v6 = vld [vmem:[%s198_s21 + $0x40] sm:$0xff]  ;;  %v218_v7 = vld [vmem:[%s198_s21 + $0x38] sm:$0xff]  ;;  %v217_v8 = vld [vmem:[%s198_s21 + $0x30] sm:$0xff] }
  0x12   : > { %411 = vmatpush1.msk.msra.mxu0 %vm233_vm0, %v221_v4  ;;  %v216_v9 = vld [vmem:[%s198_s21 + $0x28] sm:$0xff]  ;;  %v215_v10 = vld [vmem:[%s198_s21 + $0x20] sm:$0xff]  ;;  %v214_v11 = vld [vmem:[%s198_s21 + $0x18] sm:$0xff] }
  0x13   : > { %262 = vmatprep.subr.mxu0 %v220_v5  ;;  %v213_v12 = vld [vmem:[%s198_s21 + $0x10] sm:$0xff]  ;;  %v212_v13 = vld [vmem:[%s198_s21 + $0x8] sm:$0xff]  ;;  %v211_v14 = vld [vmem:[%s198_s21] sm:$0xff] }
  0x14   : > { %263 = vmatpush1.msra.mxu0 %v219_v6 }
  0x15   : > { %264 = vmatprep.subr.mxu0 %v218_v7 }
  0x16   : > { %265 = vmatpush1.msra.mxu0 %v217_v8 }
  0x17   : > { %266 = vmatprep.subr.mxu0 %v216_v9 }
  0x18   : > { %267 = vmatpush1.msra.mxu0 %v215_v10 }
  0x19   : > { %268 = vmatprep.subr.mxu0 %v214_v11 }
  0x1a   : > { %269 = vmatpush1.msra.mxu0 %v213_v12 }
  0x1b   : > { %270 = vmatprep.subr.mxu0 %v212_v13 }
  0x1c   : > { %271 = vmatpush1.msra.mxu0 %v211_v14 }
  0x1d   : > { %412 = vmatmul.mubr.msk.f32.vlgmr.msra.gmra.mxu0 %vm229_vm1, %v210_v15 }
  0x89   : > { %v227_v16 = vpop.permute.xlu0 %226 }
  0xdd   : > { %v306_v17 = vpop.f32.mrf.mxu0 }
  0xde   : > { %v307_v18 = vadd.f32 %v306_v17, %v227_v16 }
  0xdf   : > { %v308_v19 = vpop.f32.mrf.mxu0 }
  0xe0   : > { %v311_v20 = vmax.f32 %v307_v18, 0.0  ;;  %v309_v21 = vadd.f32 %v308_v19, %v227_v16 }
  0xe2   : > { %313 = vst [vmem:[%s208_s27] sm:$0xff] %v311_v20  ;;  %v312_v22 = vmax.f32 %v309_v21, 0.0 }
  0xe4   : > { %314 = vst [vmem:[%s208_s27 + $0x8] sm:$0xff] %v312_v22 }
  0xe5 PF: > { %s13_s14 = sadd.s32 1, %s466_s14   ;;  %s537_s12 = smov %s462_s13 }
  0xe6   : > { %p10_p5 = scmp.ge.s32.totalorder %s13_s14, 4   ;;  %s538_s13 = smov %s540_s15 }
  0xe8   :  { %12 = sbr.rel (!%p10_p5) target bundleno = 2 (0x2), region = 62 }

// kernel: _lambda_.5
= control target key start
LH: loop header
LB: loop body
LE: loop exit
PB: predicated region body
PF: predicated region fallthrough
CT: control target
= control target key end

     0   :  { %s488_s12 = smov 0   ;;  %s490_s13 = smov 0   ;;  %s551_s0 = inlined_call_operand.vmem [shape: f32[2,72,196], index: 0, kind: input, shape index: {}]   ;;  %s552_s1 = inlined_call_operand.vmem [shape: f32[8,72], index: 1, kind: input, shape index: {}]   ;;  %s553_s2 = inlined_call_operand.vmem [shape: f32[8,1], index: 2, kind: input, shape index: {}]   ;;  %s554_s3 = inlined_call_operand.vmem [shape: f32[2,8,196], index: 3, kind: output, shape index: {}]  }
   0x1   :  { %s492_s14 = smov 0  }
   0x2 LB: > { %s25_s15 = sadd.s32 1, %s460_s13  ;;  %p406_p0 = scmp.ge.s32.totalorder %s464_s14, 1  ;;  %s464_s14 = sphi %s492_s14, %s13_s14   ;;  %s460_s13 = sphi %s490_s13, %s556_s13   ;;  %s456_s12 = sphi %s488_s12, %s555_s12  }
   0x3   : > { %p27_p1 = scmp.ge.s32.totalorder %s25_s15, 2  ;;  %p158_p2 = scmp.lt.s32.totalorder %s464_s14, 3 }
   0x5   : > { %s558_s15 = smov (%p27_p1, %s25_s15), 0  ;;  %p159_p3 = pnand %p406_p0, %p158_p2 }
   0x6   : > { %p191_p4 = scmp.lt.s32.totalorder (!%p159_p3), %s456_s12, 1 }
   0x7   : > { %162 = sbr.rel (%p159_p3) target bundleno = 235 (0xeb), region = 32 }
   0xc   : > { %v229_v0 = vld [vmem:[%s553_s2] sm:$0xff]  ;;  %v466_v1 = vmov 0.0   ;;  %v467_v2 = vmov 0   ;;  %s560_s12 = smov (!%p191_p4, %s456_s12), 1  ;;  %vm235_vm0 = vcmask 588800   ;;  %vm313_vm1 = vcmask 556032  }
   0xd   : > { %303 = vmatprep.mubr.f32.mxu0 %v466_v1  ;;  %441 = vset.pattern.permute.xlu0 %v467_v2  ;;  %s414_s18 = smul.u32 144, %s560_s12  ;;  %v210_v21 = vld [vmem:[%s552_s1] sm:$0xff]  ;;  %s413_s24 = sshll.u32 %s560_s12, 4 }
   0xe   : > { %232 = vperm.xlu0 %441, %v229_v0   ;;  %s208_s27 = scalar_lea.vmem %s554_s3, %s413_s24 }
   0xf   : > { %s515_s21 = scalar_lea.vmem %s551_s0, %s414_s18 }
  0x10   : > { %v228_v3 = vld [vmem:[%s515_s21 + $0x88] sm:$0xff]  ;;  %v227_v4 = vld [vmem:[%s515_s21 + $0x80] sm:$0xff]  ;;  %v226_v5 = vld [vmem:[%s515_s21 + $0x78] sm:$0xff] }
  0x11   : > { %253 = vmatprep.subr.mxu0 %v228_v3  ;;  %v225_v6 = vld [vmem:[%s515_s21 + $0x70] sm:$0xff]  ;;  %v224_v7 = vld [vmem:[%s515_s21 + $0x68] sm:$0xff]  ;;  %v223_v8 = vld [vmem:[%s515_s21 + $0x60] sm:$0xff] }
  0x12   : > { %254 = vmatpush1.msra.mxu0 %v227_v4  ;;  %v222_v9 = vld [vmem:[%s515_s21 + $0x58] sm:$0xff]  ;;  %v221_v10 = vld [vmem:[%s515_s21 + $0x50] sm:$0xff]  ;;  %v220_v11 = vld [vmem:[%s515_s21 + $0x48] sm:$0xff] }
  0x13   : > { %255 = vmatprep.subr.mxu0 %v226_v5  ;;  %v219_v12 = vld [vmem:[%s515_s21 + $0x40] sm:$0xff]  ;;  %v218_v13 = vld [vmem:[%s515_s21 + $0x38] sm:$0xff]  ;;  %v217_v14 = vld [vmem:[%s515_s21 + $0x30] sm:$0xff] }
  0x14   : > { %256 = vmatpush1.msra.mxu0 %v225_v6  ;;  %v216_v15 = vld [vmem:[%s515_s21 + $0x28] sm:$0xff]  ;;  %v215_v16 = vld [vmem:[%s515_s21 + $0x20] sm:$0xff]  ;;  %v214_v17 = vld [vmem:[%s515_s21 + $0x18] sm:$0xff] }
  0x15   : > { %257 = vmatprep.subr.mxu0 %v224_v7  ;;  %v213_v18 = vld [vmem:[%s515_s21 + $0x10] sm:$0xff]  ;;  %v212_v19 = vld [vmem:[%s515_s21 + $0x8] sm:$0xff]  ;;  %v211_v20 = vld [vmem:[%s515_s21] sm:$0xff] }
  0x16   : > { %258 = vmatpush1.msra.mxu0 %v223_v8 }
  0x17   : > { %259 = vmatprep.subr.mxu0 %v222_v9 }
  0x18   : > { %260 = vmatpush1.msra.mxu0 %v221_v10 }
  0x19   : > { %261 = vmatprep.subr.mxu0 %v220_v11 }
  0x1a   : > { %262 = vmatpush1.msra.mxu0 %v219_v12 }
  0x1b   : > { %263 = vmatprep.subr.mxu0 %v218_v13 }
  0x1c   : > { %264 = vmatpush1.msra.mxu0 %v217_v14 }
  0x1d   : > { %265 = vmatprep.subr.mxu0 %v216_v15 }
  0x1e   : > { %266 = vmatpush1.msra.mxu0 %v215_v16 }
  0x1f   : > { %267 = vmatprep.subr.mxu0 %v214_v17 }
  0x20   : > { %268 = vmatpush1.msra.mxu0 %v213_v18 }
  0x21   : > { %269 = vmatprep.subr.mxu0 %v212_v19 }
  0x22   : > { %270 = vmatpush1.msra.mxu0 %v211_v20 }
  0x23   : > { %410 = vmatmul.mubr.msk.f32.vlgmr.msra.gmra.mxu0 %vm235_vm0, %v210_v21 }
  0x89   : > { %v233_v22 = vpop.permute.xlu0 %232 }
  0xe3   : > { %v305_v23 = vpop.f32.mrf.mxu0 }
  0xe4   : > { %v306_v24 = vadd.f32 %v305_v23, %v233_v22 }
  0xe5   : > { %v307_v25 = vpop.f32.mrf.mxu0 }
  0xe6   : > { %v310_v26 = vmax.f32 %v306_v24, 0.0  ;;  %v308_v27 = vadd.f32 %v307_v25, %v233_v22 }
  0xe8   : > { %312 = vst [vmem:[%s208_s27] sm:$0xff] %v310_v26  ;;  %v311_v28 = vmax.f32 %v308_v27, 0.0 }
  0xea   : > { %314 = vst.msk [vmem:[%s208_s27 + $0x8] sm:$0xff] %vm313_vm1, %v311_v28 }
  0xeb PF: > { %s13_s14 = sadd.s32 1, %s464_s14   ;;  %s555_s12 = smov %s460_s13 }
  0xec   : > { %p10_p5 = scmp.ge.s32.totalorder %s13_s14, 4   ;;  %s556_s13 = smov %s558_s15 }
  0xee   :  { %12 = sbr.rel (!%p10_p5) target bundleno = 2 (0x2), region = 62 }

// kernel: _lambda_.6
= control target key start
LH: loop header
LB: loop body
LE: loop exit
PB: predicated region body
PF: predicated region fallthrough
CT: control target
= control target key end

     0   :  { %s1854_s15 = smov 0   ;;  %s1856_s16 = smov 0   ;;  %s3040_s0 = inlined_call_operand.vmem [shape: f32[2,72,144], index: 0, kind: input, shape index: {}]   ;;  %s3041_s1 = inlined_call_operand.vmem [shape: f32[441,72], index: 1, kind: input, shape index: {}]   ;;  %s3042_s2 = inlined_call_operand.vmem [shape: f32[441,1], index: 2, kind: input, shape index: {}]   ;;  %s3043_s3 = inlined_call_operand.vmem [shape: f32[2,441,144], index: 3, kind: output, shape index: {0}]   ;;  %s3044_s4 = inlined_call_operand.vmem [shape: f32[2,1,144], index: 4, kind: output, shape index: {1}]  }
   0x1   :  { %s1858_s17 = smov 0  }
   0x2 LB: > { %s27_s18 = sadd.s32 1, %s1820_s16  ;;  %p1691_p0 = scmp.ge.s32.totalorder %s1824_s17, 1  ;;  %s1824_s17 = sphi %s1858_s17, %s15_s17   ;;  %s1820_s16 = sphi %s1856_s16, %s3081_s16   ;;  %s1816_s15 = sphi %s1854_s15, %s3080_s15  }
   0x3   : > { %p29_p1 = scmp.ge.s32.totalorder %s27_s18, 2  ;;  %p188_p2 = scmp.lt.s32.totalorder %s1824_s17, 3 }
   0x5   : > { %s3083_s18 = smov (%p29_p1, %s27_s18), 0  ;;  %p189_p3 = pnand %p1691_p0, %p188_p2 }
   0x7   : > { %192 = sbr.rel (%p189_p3) target bundleno = 369 (0x171), region = 32 }
   0xc   : > { %p231_p4 = scmp.lt.s32.totalorder %s1816_s15, 1  ;;  %v335_v0 = vld [vmem:[%s3042_s2 + $0x10] sm:$0xff]  ;;  %v333_v1 = vld [vmem:[%s3042_s2] sm:$0xff]  ;;  %v1826_v2 = vmov 0   ;;  %v336_v3 = vld [vmem:[%s3042_s2 + $0x18] sm:$0xff]  ;;  %v1827_v5 = vmov 0.0  }
   0xd   : > { %1801 = vset.pattern.permute.xlu1 %v1826_v2  ;;  %1800 = vset.pattern.permute.xlu0 %v1826_v2  ;;  %v334_v4 = vld [vmem:[%s3042_s2 + $0x8] sm:$0xff]  ;;  %v337_v24 = vld [vmem:[%s3042_s2 + $0x20] sm:$0xff]  ;;  %vm669_vm0 = vcmask 588800   ;;  %v340_v28 = vld [vmem:[%s3042_s2 + $0x38] sm:$0xff]  ;;  %vm1240_vm1 = vcmask 130048   ;;  %vm1406_vm2 = vcmask 1040384  }
   0xe   : > { %s3085_s15 = smov (!%p231_p4, %s1816_s15), 1  ;;  %401 = vperm.xlu1 %1801, %v335_v0   ;;  %391 = vperm.xlu0 %1800, %v333_v1   ;;  %v338_v23 = vld [vmem:[%s3042_s2 + $0x28] sm:$0xff]  ;;  %v259_v26 = vld [vmem:[%s3041_s1] sm:$0xff]  ;;  %v339_v29 = vld [vmem:[%s3042_s2 + $0x30] sm:$0xff]  ;;  %vm1351_vm3 = vcmask 122880  }
   0xf   : > { %902 = vmatprep.mubr.f32.mxu0 %v1827_v5  ;;  %1070 = vmatprep.mubr.f32.mxu1 %v1827_v5  ;;  %s1771_s27 = smul.u32 144, %s3085_s15  ;;  %v287_v27 = vld [vmem:[%s3041_s1 + $0xe0] sm:$0xff]  ;;  %v260_v30 = vld [vmem:[%s3041_s1 + $0x8] sm:$0xff]  ;;  %v261_v34 = vld [vmem:[%s3041_s1 + $0x10] sm:$0xff]  ;;  %s1694_s5 = sshll.u32 %s3085_s15, 1 }
  0x10   : > { %v288_v31 = vld [vmem:[%s3041_s1 + $0xe8] sm:$0xff]  ;;  %v341_v33 = vld [vmem:[%s3042_s2 + $0x40] sm:$0xff]  ;;  %v289_v35 = vld [vmem:[%s3041_s1 + $0xf0] sm:$0xff]  ;;  %s257_s8 = scalar_lea.vmem %s3044_s4, %s1694_s5 }
  0x11   : > { %s1892_s30 = scalar_lea.vmem %s3040_s0, %s1771_s27  ;;  %v342_v32 = vld [vmem:[%s3042_s2 + $0x48] sm:$0xff]  ;;  %v344_v36 = vld [vmem:[%s3042_s2 + $0x58] sm:$0xff]  ;;  %v343_v37 = vld [vmem:[%s3042_s2 + $0x50] sm:$0xff]  ;;  %s1772_s27 = smul.u32 896, %s3085_s15 }
  0x12   : > { %406 = vperm.xlu1 %1801, %v336_v3   ;;  %396 = vperm.xlu0 %1800, %v334_v4   ;;  %v332_v6 = vld [vmem:[%s1892_s30 + $0x88] sm:$0xff]  ;;  %v331_v7 = vld [vmem:[%s1892_s30 + $0x80] sm:$0xff]  ;;  %v330_v8 = vld [vmem:[%s1892_s30 + $0x78] sm:$0xff] }
  0x13   : > { %852 = vmatprep.subr.mxu0 %v332_v6  ;;  %1753 = vmatprep.subr.mxu1 %v332_v6  ;;  %v329_v9 = vld [vmem:[%s1892_s30 + $0x70] sm:$0xff]  ;;  %v328_v10 = vld [vmem:[%s1892_s30 + $0x68] sm:$0xff]  ;;  %v327_v11 = vld [vmem:[%s1892_s30 + $0x60] sm:$0xff] }
  0x14   : > { %853 = vmatpush1.msra.mxu0 %v331_v7  ;;  %1762 = vmatpush1.msra.mxu1 %v331_v7  ;;  %v326_v12 = vld [vmem:[%s1892_s30 + $0x58] sm:$0xff]  ;;  %v325_v13 = vld [vmem:[%s1892_s30 + $0x50] sm:$0xff]  ;;  %v324_v14 = vld [vmem:[%s1892_s30 + $0x48] sm:$0xff] }
  0x15   : > { %854 = vmatprep.subr.mxu0 %v330_v8  ;;  %1754 = vmatprep.subr.mxu1 %v330_v8  ;;  %v323_v15 = vld [vmem:[%s1892_s30 + $0x40] sm:$0xff]  ;;  %v322_v16 = vld [vmem:[%s1892_s30 + $0x38] sm:$0xff]  ;;  %v321_v17 = vld [vmem:[%s1892_s30 + $0x30] sm:$0xff] }
  0x16   : > { %855 = vmatpush1.msra.mxu0 %v329_v9  ;;  %1763 = vmatpush1.msra.mxu1 %v329_v9  ;;  %v320_v18 = vld [vmem:[%s1892_s30 + $0x28] sm:$0xff]  ;;  %v319_v19 = vld [vmem:[%s1892_s30 + $0x20] sm:$0xff]  ;;  %v318_v20 = vld [vmem:[%s1892_s30 + $0x18] sm:$0xff] }
  0x17   : > { %856 = vmatprep.subr.mxu0 %v328_v10  ;;  %1755 = vmatprep.subr.mxu1 %v328_v10  ;;  %v317_v21 = vld [vmem:[%s1892_s30 + $0x10] sm:$0xff]  ;;  %v316_v22 = vld [vmem:[%s1892_s30 + $0x8] sm:$0xff]  ;;  %v315_v25 = vld [vmem:[%s1892_s30] sm:$0xff]  ;;  %s2402_s30 = scalar_lea.vmem %s3043_s3, %s1772_s27 }
  0x18   : > { %857 = vmatpush1.msra.mxu0 %v327_v11  ;;  %1764 = vmatpush1.msra.mxu1 %v327_v11  ;;  %v262_v38 = vld [vmem:[%s3041_s1 + $0x18] sm:$0xff]  ;;  %v346_v40 = vld [vmem:[%s3042_s2 + $0x68] sm:$0xff]  ;;  %v345_v41 = vld [vmem:[%s3042_s2 + $0x60] sm:$0xff] }
  0x19   : > { %858 = vmatprep.subr.mxu0 %v326_v12  ;;  %1756 = vmatprep.subr.mxu1 %v326_v12  ;;  %v290_v39 = vld [vmem:[%s3041_s1 + $0xf8] sm:$0xff]  ;;  %v263_v42 = vld [vmem:[%s3041_s1 + $0x20] sm:$0xff]  ;;  %v347_v45 = vld [vmem:[%s3042_s2 + $0x70] sm:$0xff] }
  0x1a   : > { %859 = vmatpush1.msra.mxu0 %v325_v13  ;;  %1765 = vmatpush1.msra.mxu1 %v325_v13  ;;  %v291_v43 = vld [vmem:[%s3041_s1 + $0x100] sm:$0xff]  ;;  %v348_v44 = vld [vmem:[%s3042_s2 + $0x78] sm:$0xff]  ;;  %v264_v46 = vld [vmem:[%s3041_s1 + $0x28] sm:$0xff] }
  0x1b   : > { %860 = vmatprep.subr.mxu0 %v324_v14  ;;  %1757 = vmatprep.subr.mxu1 %v324_v14  ;;  %v292_v47 = vld [vmem:[%s3041_s1 + $0x108] sm:$0xff]  ;;  %v349_v49 = vld [vmem:[%s3042_s2 + $0x80] sm:$0xff]  ;;  %v265_v50 = vld [vmem:[%s3041_s1 + $0x30] sm:$0xff] }
  0x1c   : > { %861 = vmatpush1.msra.mxu0 %v323_v15  ;;  %1766 = vmatpush1.msra.mxu1 %v323_v15  ;;  %v350_v48 = vld [vmem:[%s3042_s2 + $0x88] sm:$0xff]  ;;  %v293_v51 = vld [vmem:[%s3041_s1 + $0x110] sm:$0xff]  ;;  %v352_v52 = vld [vmem:[%s3042_s2 + $0x98] sm:$0xff] }
  0x1d   : > { %862 = vmatprep.subr.mxu0 %v322_v16  ;;  %1758 = vmatprep.subr.mxu1 %v322_v16  ;;  %v351_v53 = vld [vmem:[%s3042_s2 + $0x90] sm:$0xff]  ;;  %v266_v54 = vld [vmem:[%s3041_s1 + $0x38] sm:$0xff]  ;;  %v354_v56 = vld [vmem:[%s3042_s2 + $0xa8] sm:$0xff] }
  0x1e   : > { %863 = vmatpush1.msra.mxu0 %v321_v17  ;;  %1767 = vmatpush1.msra.mxu1 %v321_v17  ;;  %v294_v55 = vld [vmem:[%s3041_s1 + $0x118] sm:$0xff]  ;;  %v353_v57 = vld [vmem:[%s3042_s2 + $0xa0] sm:$0xff]  ;;  %v355_v61 = vld [vmem:[%s3042_s2 + $0xb0] sm:$0xff] }
  0x1f   : > { %864 = vmatprep.subr.mxu0 %v320_v18  ;;  %1759 = vmatprep.subr.mxu1 %v320_v18  ;;  %v267_v58 = vld [vmem:[%s3041_s1 + $0x40] sm:$0xff]  ;;  %v356_v60 = vld [vmem:[%s3042_s2 + $0xb8] sm:$0xff]  ;;  %v268_v62 = vld [vmem:[%s3041_s1 + $0x48] sm:$0xff] }
  0x20   : > { %865 = vmatpush1.msra.mxu0 %v319_v19  ;;  %1768 = vmatpush1.msra.mxu1 %v319_v19  ;;  %v295_v59 = vld [vmem:[%s3041_s1 + $0x120] sm:$0xff]  ;;  %v296_v63 = vld [vmem:[%s3041_s1 + $0x128] sm:$0xff]  ;;  %v269_v2 = vld [vmem:[%s3041_s1 + $0x50] sm:$0xff] }
  0x21   : > { %866 = vmatprep.subr.mxu0 %v318_v20  ;;  %1760 = vmatprep.subr.mxu1 %v318_v20  ;;  %v358_v0 = vld [vmem:[%s3042_s2 + $0xc8] sm:$0xff]  ;;  %v357_v1 = vld [vmem:[%s3042_s2 + $0xc0] sm:$0xff]  ;;  %v297_v3 = vld [vmem:[%s3041_s1 + $0x130] sm:$0xff] }
  0x22   : > { %867 = vmatpush1.msra.mxu0 %v317_v21  ;;  %1769 = vmatpush1.msra.mxu1 %v317_v21  ;;  %v360_v4 = vld [vmem:[%s3042_s2 + $0xd8] sm:$0xff]  ;;  %v359_v6 = vld [vmem:[%s3042_s2 + $0xd0] sm:$0xff]  ;;  %v362_v9 = vld [vmem:[%s3042_s2 + $0xe8] sm:$0xff] }
  0x23   : > { %868 = vmatprep.subr.mxu0 %v316_v22  ;;  %1761 = vmatprep.subr.mxu1 %v316_v22  ;;  %v270_v7 = vld [vmem:[%s3041_s1 + $0x58] sm:$0xff]  ;;  %v361_v10 = vld [vmem:[%s3042_s2 + $0xe0] sm:$0xff]  ;;  %v363_v14 = vld [vmem:[%s3042_s2 + $0xf0] sm:$0xff] }
  0x24   : > { %416 = vperm.xlu1 %1801, %v338_v23   ;;  %411 = vperm.xlu0 %1800, %v337_v24   ;;  %v298_v8 = vld [vmem:[%s3041_s1 + $0x138] sm:$0xff]  ;;  %v271_v11 = vld [vmem:[%s3041_s1 + $0x60] sm:$0xff]  ;;  %v272_v15 = vld [vmem:[%s3041_s1 + $0x68] sm:$0xff] }
  0x25   : > { %869 = vmatpush1.msra.mxu0 %v315_v25  ;;  %1770 = vmatpush1.msra.mxu1 %v315_v25  ;;  %v299_v12 = vld [vmem:[%s3041_s1 + $0x140] sm:$0xff]  ;;  %v364_v13 = vld [vmem:[%s3042_s2 + $0xf8] sm:$0xff]  ;;  %v300_v16 = vld [vmem:[%s3041_s1 + $0x148] sm:$0xff] }
  0x26   : > { %1695 = vmatmul.mubr.msk.f32.vlgmr.msra.gmra.mxu0 %vm669_vm0, %v259_v26  ;;  %1723 = vmatmul.mubr.msk.f32.vlgmr.msra.gmra.mxu1 %vm669_vm0, %v287_v27  ;;  %v366_v17 = vld [vmem:[%s3042_s2 + $0x108] sm:$0xff]  ;;  %v365_v18 = vld [vmem:[%s3042_s2 + $0x100] sm:$0xff]  ;;  %v273_v19 = vld [vmem:[%s3041_s1 + $0x70] sm:$0xff] }
  0x27   : > { %908 = vmatprep.mubr.f32.mxu0 %v1827_v5  ;;  %1076 = vmatprep.mubr.f32.mxu1 %v1827_v5  ;;  %v301_v20 = vld [vmem:[%s3041_s1 + $0x150] sm:$0xff]  ;;  %v368_v21 = vld [vmem:[%s3042_s2 + $0x118] sm:$0xff]  ;;  %v370_v25 = vld [vmem:[%s3042_s2 + $0x128] sm:$0xff] }
  0x28   : > { %426 = vperm.xlu1 %1801, %v340_v28   ;;  %421 = vperm.xlu0 %1800, %v339_v29   ;;  %v367_v22 = vld [vmem:[%s3042_s2 + $0x110] sm:$0xff]  ;;  %v274_v23 = vld [vmem:[%s3041_s1 + $0x78] sm:$0xff]  ;;  %v369_v26 = vld [vmem:[%s3042_s2 + $0x120] sm:$0xff] }
  0x29   : > { %v302_v24 = vld [vmem:[%s3041_s1 + $0x158] sm:$0xff]  ;;  %v275_v27 = vld [vmem:[%s3041_s1 + $0x80] sm:$0xff] }
  0x2a   : > { %1696 = vmatmul.mubr.msk.f32.gmra.mxu0 %vm669_vm0, %v260_v30  ;;  %1724 = vmatmul.mubr.msk.f32.gmra.mxu1 %vm669_vm0, %v288_v31  ;;  %v303_v28 = vld [vmem:[%s3041_s1 + $0x160] sm:$0xff]  ;;  %v372_v29 = vld [vmem:[%s3042_s2 + $0x138] sm:$0xff]  ;;  %v371_v30 = vld [vmem:[%s3042_s2 + $0x130] sm:$0xff] }
  0x2b   : > { %914 = vmatprep.mubr.f32.mxu0 %v1827_v5  ;;  %1082 = vmatprep.mubr.f32.mxu1 %v1827_v5  ;;  %v276_v31 = vld [vmem:[%s3041_s1 + $0x88] sm:$0xff] }
  0x2c   : > { %436 = vperm.xlu1 %1801, %v342_v32   ;;  %431 = vperm.xlu0 %1800, %v341_v33   ;;  %v304_v32 = vld [vmem:[%s3041_s1 + $0x168] sm:$0xff] }
  0x2d   : > { %v374_v33 = vld [vmem:[%s3042_s2 + $0x148] sm:$0xff] }
  0x2e   : > { %1697 = vmatmul.mubr.msk.f32.gmra.mxu0 %vm669_vm0, %v261_v34  ;;  %1725 = vmatmul.mubr.msk.f32.gmra.mxu1 %vm669_vm0, %v289_v35  ;;  %v373_v34 = vld [vmem:[%s3042_s2 + $0x140] sm:$0xff]  ;;  %v277_v35 = vld [vmem:[%s3041_s1 + $0x90] sm:$0xff] }
  0x2f   : > { %920 = vmatprep.mubr.f32.mxu0 %v1827_v5  ;;  %1088 = vmatprep.mubr.f32.mxu1 %v1827_v5 }
  0x30   : > { %446 = vperm.xlu1 %1801, %v344_v36   ;;  %441 = vperm.xlu0 %1800, %v343_v37   ;;  %v305_v36 = vld [vmem:[%s3041_s1 + $0x170] sm:$0xff]  ;;  %v376_v37 = vld [vmem:[%s3042_s2 + $0x158] sm:$0xff] }
  0x32   : > { %1698 = vmatmul.mubr.msk.f32.gmra.mxu0 %vm669_vm0, %v262_v38  ;;  %1726 = vmatmul.mubr.msk.f32.gmra.mxu1 %vm669_vm0, %v290_v39  ;;  %v375_v38 = vld [vmem:[%s3042_s2 + $0x150] sm:$0xff]  ;;  %v278_v39 = vld [vmem:[%s3041_s1 + $0x98] sm:$0xff] }
  0x33   : > { %926 = vmatprep.mubr.f32.mxu0 %v1827_v5  ;;  %1094 = vmatprep.mubr.f32.mxu1 %v1827_v5 }
  0x34   : > { %456 = vperm.xlu1 %1801, %v346_v40   ;;  %451 = vperm.xlu0 %1800, %v345_v41   ;;  %v306_v40 = vld [vmem:[%s3041_s1 + $0x178] sm:$0xff]  ;;  %v378_v41 = vld [vmem:[%s3042_s2 + $0x168] sm:$0xff] }
  0x36   : > { %1699 = vmatmul.mubr.msk.f32.gmra.mxu0 %vm669_vm0, %v263_v42  ;;  %1727 = vmatmul.mubr.msk.f32.gmra.mxu1 %vm669_vm0, %v291_v43  ;;  %v377_v42 = vld [vmem:[%s3042_s2 + $0x160] sm:$0xff] }
  0x37   : > { %932 = vmatprep.mubr.f32.mxu0 %v1827_v5  ;;  %1100 = vmatprep.mubr.f32.mxu1 %v1827_v5  ;;  %v279_v43 = vld [vmem:[%s3041_s1 + $0xa0] sm:$0xff] }
  0x38   : > { %466 = vperm.xlu1 %1801, %v348_v44   ;;  %461 = vperm.xlu0 %1800, %v347_v45   ;;  %v307_v44 = vld [vmem:[%s3041_s1 + $0x180] sm:$0xff]  ;;  %v380_v45 = vld [vmem:[%s3042_s2 + $0x178] sm:$0xff] }
  0x3a   : > { %1700 = vmatmul.mubr.msk.f32.gmra.mxu0 %vm669_vm0, %v264_v46  ;;  %1728 = vmatmul.mubr.msk.f32.gmra.mxu1 %vm669_vm0, %v292_v47  ;;  %v379_v46 = vld [vmem:[%s3042_s2 + $0x170] sm:$0xff]  ;;  %v280_v47 = vld [vmem:[%s3041_s1 + $0xa8] sm:$0xff] }
  0x3b   : > { %938 = vmatprep.mubr.f32.mxu0 %v1827_v5  ;;  %1106 = vmatprep.mubr.f32.mxu1 %v1827_v5 }
  0x3c   : > { %476 = vperm.xlu1 %1801, %v350_v48   ;;  %471 = vperm.xlu0 %1800, %v349_v49   ;;  %v308_v48 = vld [vmem:[%s3041_s1 + $0x188] sm:$0xff] }
  0x3d   : > { %v382_v49 = vld [vmem:[%s3042_s2 + $0x188] sm:$0xff] }
  0x3e   : > { %1701 = vmatmul.mubr.msk.f32.gmra.mxu0 %vm669_vm0, %v265_v50  ;;  %1729 = vmatmul.mubr.msk.f32.gmra.mxu1 %vm669_vm0, %v293_v51  ;;  %v381_v50 = vld [vmem:[%s3042_s2 + $0x180] sm:$0xff]  ;;  %v281_v51 = vld [vmem:[%s3041_s1 + $0xb0] sm:$0xff] }
  0x3f   : > { %944 = vmatprep.mubr.f32.mxu0 %v1827_v5  ;;  %1112 = vmatprep.mubr.f32.mxu1 %v1827_v5 }
  0x40   : > { %486 = vperm.xlu1 %1801, %v352_v52   ;;  %481 = vperm.xlu0 %1800, %v351_v53   ;;  %v309_v52 = vld [vmem:[%s3041_s1 + $0x190] sm:$0xff]  ;;  %v384_v53 = vld [vmem:[%s3042_s2 + $0x198] sm:$0xff] }
  0x42   : > { %1702 = vmatmul.mubr.msk.f32.gmra.mxu0 %vm669_vm0, %v266_v54  ;;  %1730 = vmatmul.mubr.msk.f32.gmra.mxu1 %vm669_vm0, %v294_v55  ;;  %v383_v54 = vld [vmem:[%s3042_s2 + $0x190] sm:$0xff]  ;;  %v282_v55 = vld [vmem:[%s3041_s1 + $0xb8] sm:$0xff] }
  0x43   : > { %950 = vmatprep.mubr.f32.mxu0 %v1827_v5  ;;  %1118 = vmatprep.mubr.f32.mxu1 %v1827_v5 }
  0x44   : > { %496 = vperm.xlu1 %1801, %v354_v56   ;;  %491 = vperm.xlu0 %1800, %v353_v57   ;;  %v310_v56 = vld [vmem:[%s3041_s1 + $0x198] sm:$0xff]  ;;  %v386_v57 = vld [vmem:[%s3042_s2 + $0x1a8] sm:$0xff] }
  0x46   : > { %1703 = vmatmul.mubr.msk.f32.gmra.mxu0 %vm669_vm0, %v267_v58  ;;  %1731 = vmatmul.mubr.msk.f32.gmra.mxu1 %vm669_vm0, %v295_v59  ;;  %v385_v58 = vld [vmem:[%s3042_s2 + $0x1a0] sm:$0xff] }
  0x47   : > { %956 = vmatprep.mubr.f32.mxu0 %v1827_v5  ;;  %1124 = vmatprep.mubr.f32.mxu1 %v1827_v5  ;;  %v283_v59 = vld [vmem:[%s3041_s1 + $0xc0] sm:$0xff] }
  0x48   : > { %506 = vperm.xlu1 %1801, %v356_v60   ;;  %501 = vperm.xlu0 %1800, %v355_v61   ;;  %v311_v60 = vld [vmem:[%s3041_s1 + $0x1a0] sm:$0xff]  ;;  %v388_v61 = vld [vmem:[%s3042_s2 + $0x1b8] sm:$0x1] }
  0x4a   : > { %1704 = vmatmul.mubr.msk.f32.gmra.mxu0 %vm669_vm0, %v268_v62  ;;  %1732 = vmatmul.mubr.msk.f32.gmra.mxu1 %vm669_vm0, %v296_v63  ;;  %v387_v62 = vld [vmem:[%s3042_s2 + $0x1b0] sm:$0xff]  ;;  %v284_v63 = vld [vmem:[%s3041_s1 + $0xc8] sm:$0xff] }
  0x4b   : > { %962 = vmatprep.mubr.f32.mxu0 %v1827_v5  ;;  %1130 = vmatprep.mubr.f32.mxu1 %v1827_v5 }
  0x4c   : > { %516 = vperm.xlu1 %1801, %v358_v0   ;;  %511 = vperm.xlu0 %1800, %v357_v1   ;;  %v312_v0 = vld [vmem:[%s3041_s1 + $0x1a8] sm:$0xff]  ;;  %v285_v1 = vld [vmem:[%s3041_s1 + $0xd0] sm:$0xff] }
  0x4e   : > { %1705 = vmatmul.mubr.msk.f32.gmra.mxu0 %vm669_vm0, %v269_v2  ;;  %1733 = vmatmul.mubr.msk.f32.gmra.mxu1 %vm669_vm0, %v297_v3  ;;  %v313_v2 = vld [vmem:[%s3041_s1 + $0x1b0] sm:$0xff]  ;;  %v286_v3 = vld [vmem:[%s3041_s1 + $0xd8] sm:$0xff] }
  0x4f   : > { %968 = vmatprep.mubr.f32.mxu0 %v1827_v5  ;;  %1136 = vmatprep.mubr.f32.mxu1 %v1827_v5 }
  0x50   : > { %526 = vperm.xlu1 %1801, %v360_v4   ;;  %521 = vperm.xlu0 %1800, %v359_v6   ;;  %v314_v4 = vld [vmem:[%s3041_s1 + $0x1b8] sm:$0x1] }
  0x52   : > { %1706 = vmatmul.mubr.msk.f32.gmra.mxu0 %vm669_vm0, %v270_v7  ;;  %1734 = vmatmul.mubr.msk.f32.gmra.mxu1 %vm669_vm0, %v298_v8 }
  0x53   : > { %974 = vmatprep.mubr.f32.mxu0 %v1827_v5  ;;  %1142 = vmatprep.mubr.f32.mxu1 %v1827_v5 }
  0x54   : > { %536 = vperm.xlu1 %1801, %v362_v9   ;;  %531 = vperm.xlu0 %1800, %v361_v10  }
  0x56   : > { %1707 = vmatmul.mubr.msk.f32.gmra.mxu0 %vm669_vm0, %v271_v11  ;;  %1735 = vmatmul.mubr.msk.f32.gmra.mxu1 %vm669_vm0, %v299_v12 }
  0x57   : > { %980 = vmatprep.mubr.f32.mxu0 %v1827_v5  ;;  %1148 = vmatprep.mubr.f32.mxu1 %v1827_v5 }
  0x58   : > { %546 = vperm.xlu1 %1801, %v364_v13   ;;  %541 = vperm.xlu0 %1800, %v363_v14  }
  0x5a   : > { %1708 = vmatmul.mubr.msk.f32.gmra.mxu0 %vm669_vm0, %v272_v15  ;;  %1736 = vmatmul.mubr.msk.f32.gmra.mxu1 %vm669_vm0, %v300_v16 }
  0x5b   : > { %986 = vmatprep.mubr.f32.mxu0 %v1827_v5  ;;  %1154 = vmatprep.mubr.f32.mxu1 %v1827_v5 }
  0x5c   : > { %556 = vperm.xlu1 %1801, %v366_v17   ;;  %551 = vperm.xlu0 %1800, %v365_v18  }
  0x5e   : > { %1709 = vmatmul.mubr.msk.f32.gmra.mxu0 %vm669_vm0, %v273_v19  ;;  %1737 = vmatmul.mubr.msk.f32.gmra.mxu1 %vm669_vm0, %v301_v20 }
  0x5f   : > { %992 = vmatprep.mubr.f32.mxu0 %v1827_v5  ;;  %1160 = vmatprep.mubr.f32.mxu1 %v1827_v5 }
  0x60   : > { %566 = vperm.xlu1 %1801, %v368_v21   ;;  %561 = vperm.xlu0 %1800, %v367_v22  }
  0x62   : > { %1710 = vmatmul.mubr.msk.f32.gmra.mxu0 %vm669_vm0, %v274_v23  ;;  %1738 = vmatmul.mubr.msk.f32.gmra.mxu1 %vm669_vm0, %v302_v24 }
  0x63   : > { %998 = vmatprep.mubr.f32.mxu0 %v1827_v5  ;;  %1166 = vmatprep.mubr.f32.mxu1 %v1827_v5 }
  0x64   : > { %576 = vperm.xlu1 %1801, %v370_v25   ;;  %571 = vperm.xlu0 %1800, %v369_v26  }
  0x66   : > { %1711 = vmatmul.mubr.msk.f32.gmra.mxu0 %vm669_vm0, %v275_v27  ;;  %1739 = vmatmul.mubr.msk.f32.gmra.mxu1 %vm669_vm0, %v303_v28 }
  0x67   : > { %1004 = vmatprep.mubr.f32.mxu0 %v1827_v5  ;;  %1172 = vmatprep.mubr.f32.mxu1 %v1827_v5 }
  0x68   : > { %586 = vperm.xlu1 %1801, %v372_v29   ;;  %581 = vperm.xlu0 %1800, %v371_v30  }
  0x6a   : > { %1712 = vmatmul.mubr.msk.f32.gmra.mxu0 %vm669_vm0, %v276_v31  ;;  %1740 = vmatmul.mubr.msk.f32.gmra.mxu1 %vm669_vm0, %v304_v32 }
  0x6b   : > { %1010 = vmatprep.mubr.f32.mxu0 %v1827_v5  ;;  %1178 = vmatprep.mubr.f32.mxu1 %v1827_v5 }
  0x6c   : > { %596 = vperm.xlu1 %1801, %v374_v33   ;;  %591 = vperm.xlu0 %1800, %v373_v34  }
  0x6e   : > { %1713 = vmatmul.mubr.msk.f32.gmra.mxu0 %vm669_vm0, %v277_v35  ;;  %1741 = vmatmul.mubr.msk.f32.gmra.mxu1 %vm669_vm0, %v305_v36 }
  0x6f   : > { %1016 = vmatprep.mubr.f32.mxu0 %v1827_v5  ;;  %1184 = vmatprep.mubr.f32.mxu1 %v1827_v5 }
  0x70   : > { %606 = vperm.xlu1 %1801, %v376_v37   ;;  %601 = vperm.xlu0 %1800, %v375_v38  }
  0x72   : > { %1714 = vmatmul.mubr.msk.f32.gmra.mxu0 %vm669_vm0, %v278_v39  ;;  %1742 = vmatmul.mubr.msk.f32.gmra.mxu1 %vm669_vm0, %v306_v40 }
  0x73   : > { %1022 = vmatprep.mubr.f32.mxu0 %v1827_v5  ;;  %1190 = vmatprep.mubr.f32.mxu1 %v1827_v5 }
  0x74   : > { %616 = vperm.xlu1 %1801, %v378_v41   ;;  %611 = vperm.xlu0 %1800, %v377_v42  }
  0x76   : > { %1715 = vmatmul.mubr.msk.f32.gmra.mxu0 %vm669_vm0, %v279_v43  ;;  %1743 = vmatmul.mubr.msk.f32.gmra.mxu1 %vm669_vm0, %v307_v44 }
  0x77   : > { %1028 = vmatprep.mubr.f32.mxu0 %v1827_v5  ;;  %1196 = vmatprep.mubr.f32.mxu1 %v1827_v5 }
  0x78   : > { %626 = vperm.xlu1 %1801, %v380_v45   ;;  %621 = vperm.xlu0 %1800, %v379_v46  }
  0x7a   : > { %1716 = vmatmul.mubr.msk.f32.gmra.mxu0 %vm669_vm0, %v280_v47  ;;  %1744 = vmatmul.mubr.msk.f32.gmra.mxu1 %vm669_vm0, %v308_v48 }
  0x7b   : > { %1034 = vmatprep.mubr.f32.mxu0 %v1827_v5  ;;  %1202 = vmatprep.mubr.f32.mxu1 %v1827_v5 }
  0x7c   : > { %636 = vperm.xlu1 %1801, %v382_v49   ;;  %631 = vperm.xlu0 %1800, %v381_v50  }
  0x7e   : > { %1717 = vmatmul.mubr.msk.f32.gmra.mxu0 %vm669_vm0, %v281_v51  ;;  %1745 = vmatmul.mubr.msk.f32.gmra.mxu1 %vm669_vm0, %v309_v52 }
  0x7f   : > { %1040 = vmatprep.mubr.f32.mxu0 %v1827_v5  ;;  %1208 = vmatprep.mubr.f32.mxu1 %v1827_v5 }
  0x80   : > { %646 = vperm.xlu1 %1801, %v384_v53   ;;  %641 = vperm.xlu0 %1800, %v383_v54  }
  0x82   : > { %1718 = vmatmul.mubr.msk.f32.gmra.mxu0 %vm669_vm0, %v282_v55  ;;  %1746 = vmatmul.mubr.msk.f32.gmra.mxu1 %vm669_vm0, %v310_v56 }
  0x83   : > { %1046 = vmatprep.mubr.f32.mxu0 %v1827_v5  ;;  %1214 = vmatprep.mubr.f32.mxu1 %v1827_v5 }
  0x84   : > { %656 = vperm.xlu1 %1801, %v386_v57   ;;  %651 = vperm.xlu0 %1800, %v385_v58  }
  0x86   : > { %1719 = vmatmul.mubr.msk.f32.gmra.mxu0 %vm669_vm0, %v283_v59  ;;  %1747 = vmatmul.mubr.msk.f32.gmra.mxu1 %vm669_vm0, %v311_v60 }
  0x87   : > { %1052 = vmatprep.mubr.f32.mxu0 %v1827_v5  ;;  %1220 = vmatprep.mubr.f32.mxu1 %v1827_v5 }
  0x88   : > { %666 = vperm.xlu1 %1801, %v388_v61   ;;  %661 = vperm.xlu0 %1800, %v387_v62  }
  0x89   : > { %v392_v6 = vpop.permute.xlu0 %391  ;;  %v2346_v7 = vpop.permute.xlu1 %401 }
  0x8a   : > { %1720 = vmatmul.mubr.msk.f32.gmra.mxu0 %vm669_vm0, %v284_v63  ;;  %1748 = vmatmul.mubr.msk.f32.gmra.mxu1 %vm669_vm0, %v312_v0 }
  0x8b   : > { %1058 = vmatprep.mubr.f32.mxu0 %v1827_v5  ;;  %1226 = vmatprep.mubr.f32.mxu1 %v1827_v5 }
  0x8d   : > { %v397_v8 = vpop.permute.xlu0 %396  ;;  %v2348_v9 = vpop.permute.xlu1 %406 }
  0x8e   : > { %1721 = vmatmul.mubr.msk.f32.gmra.mxu0 %vm669_vm0, %v285_v1  ;;  %1749 = vmatmul.mubr.msk.f32.gmra.mxu1 %vm669_vm0, %v313_v2 }
  0x8f   : > { %1064 = vmatprep.mubr.f32.mxu0 %v1827_v5  ;;  %1232 = vmatprep.mubr.f32.mxu1 %v1827_v5 }
  0x92   : > { %1722 = vmatmul.mubr.msk.f32.gmra.mxu0 %vm669_vm0, %v286_v3  ;;  %1750 = vmatmul.mubr.msk.f32.gmra.mxu1 %vm669_vm0, %v314_v4 }
  0x9f   : > { %v2350_v10 = vpop.permute.xlu0 %411  ;;  %v2352_v5 = vpop.permute.xlu1 %416 }
  0xa3   : > { %v2354_v11 = vpop.permute.xlu0 %421  ;;  %v2356_v12 = vpop.permute.xlu1 %426 }
  0xa7   : > { %v2358_v13 = vpop.permute.xlu0 %431  ;;  %v2360_v14 = vpop.permute.xlu1 %436 }
  0xab   : > { %v2362_v15 = vpop.permute.xlu0 %441  ;;  %v2364_v16 = vpop.permute.xlu1 %446 }
  0xaf   : > { %v2366_v17 = vpop.permute.xlu0 %451  ;;  %v2368_v18 = vpop.permute.xlu1 %456 }
  0xb3   : > { %v2370_v19 = vpop.permute.xlu0 %461  ;;  %v2372_v20 = vpop.permute.xlu1 %466 }
  0xb7   : > { %v2374_v21 = vpop.permute.xlu0 %471  ;;  %v2376_v22 = vpop.permute.xlu1 %476 }
  0xbb   : > { %v2378_v23 = vpop.permute.xlu0 %481  ;;  %v2380_v24 = vpop.permute.xlu1 %486 }
  0xbf   : > { %v2382_v25 = vpop.permute.xlu0 %491  ;;  %v2384_v26 = vpop.permute.xlu1 %496 }
  0xc0   : > { %3056 = vst [vmem:[#allocation2_spill] sm:$0xff] %v2384_v26 }
  0xc3   : > { %v2386_v27 = vpop.permute.xlu0 %501  ;;  %v2388_v28 = vpop.permute.xlu1 %506 }
  0xc4   : > { %3057 = vst [vmem:[#allocation3_spill] sm:$0xff] %v2386_v27  ;;  %3058 = vst [vmem:[#allocation4_spill] sm:$0xff] %v2388_v28 }
  0xc7   : > { %v2390_v29 = vpop.permute.xlu0 %511  ;;  %v2392_v30 = vpop.permute.xlu1 %516 }
  0xc8   : > { %3059 = vst [vmem:[#allocation5_spill] sm:$0xff] %v2390_v29  ;;  %3060 = vst [vmem:[#allocation6_spill] sm:$0xff] %v2392_v30 }
  0xcb   : > { %v2394_v31 = vpop.permute.xlu0 %521  ;;  %v2397_v32 = vpop.permute.xlu1 %526 }
  0xcc   : > { %3061 = vst [vmem:[#allocation7_spill] sm:$0xff] %v2394_v31  ;;  %3062 = vst [vmem:[#allocation8_spill] sm:$0xff] %v2397_v32 }
  0xcf   : > { %v532_v33 = vpop.permute.xlu0 %531  ;;  %v537_v40 = vpop.permute.xlu1 %536 }
  0xd3   : > { %v542_v49 = vpop.permute.xlu0 %541  ;;  %v547_v58 = vpop.permute.xlu1 %546 }
  0xe6   : > { %v904_v34 = vpop.f32.mrf.mxu0  ;;  %v1072_v35 = vpop.f32.mrf.mxu1 }
  0xe7   : > { %v2404_v36 = vadd.f32 %v904_v34, %v392_v6  ;;  %v2406_v37 = vadd.f32 %v1072_v35, %v532_v33 }
  0xe8   : > { %v906_v38 = vpop.f32.mrf.mxu0  ;;  %v1074_v39 = vpop.f32.mrf.mxu1 }
  0xe9   : > { %1239 = vst [vmem:[%s2402_s30] sm:$0xff] %v2404_v36  ;;  %1296 = vst [vmem:[%s2402_s30 + $0x1c0] sm:$0xff] %v2406_v37  ;;  %v907_v41 = vadd.f32 %v906_v38, %v392_v6  ;;  %v2412_v42 = vadd.f32 %v1074_v39, %v532_v33 }
  0xea   : > { %v910_v43 = vpop.f32.mrf.mxu0  ;;  %v1078_v44 = vpop.f32.mrf.mxu1 }
  0xeb   : > { %1241 = vst.msk [vmem:[%s2402_s30 + $0x8] sm:$0xff] %vm1240_vm1, %v907_v41  ;;  %1297 = vst.msk [vmem:[%s2402_s30 + $0x1c8] sm:$0xff] %vm1240_vm1, %v2412_v42  ;;  %v2419_v45 = vadd.f32 %v910_v43, %v397_v8  ;;  %v2421_v46 = vadd.f32 %v1078_v44, %v537_v40  ;;  %v1416_v0 = vsel %vm1240_vm1, %v907_v41, -inf }
  0xec   : > { %v912_v47 = vpop.f32.mrf.mxu0  ;;  %v1080_v48 = vpop.f32.mrf.mxu1 }
  0xed   : > { %1242 = vst [vmem:[%s2402_s30 + $0x10] sm:$0xff] %v2419_v45  ;;  %1298 = vst [vmem:[%s2402_s30 + $0x1d0] sm:$0xff] %v2421_v46  ;;  %v913_v50 = vadd.f32 %v912_v47, %v397_v8  ;;  %v2427_v51 = vadd.f32 %v1080_v48, %v537_v40  ;;  %v552_v8 = vpop.permute.xlu0 %551  ;;  %v557_v47 = vpop.permute.xlu1 %556 }
  0xee   : > { %v916_v52 = vpop.f32.mrf.mxu0  ;;  %v1084_v53 = vpop.f32.mrf.mxu1 }
  0xef   : > { %1243 = vst.msk [vmem:[%s2402_s30 + $0x18] sm:$0xff] %vm1240_vm1, %v913_v50  ;;  %1299 = vst.msk [vmem:[%s2402_s30 + $0x1d8] sm:$0xff] %vm1240_vm1, %v2427_v51  ;;  %v917_v54 = vadd.f32 %v916_v52, %v2346_v7  ;;  %v2435_v55 = vadd.f32 %v1084_v53, %v542_v49  ;;  %v1417_v39 = vsel %vm1240_vm1, %v913_v50, -inf }
  0xf0   : > { %v918_v56 = vpop.f32.mrf.mxu0  ;;  %v1086_v57 = vpop.f32.mrf.mxu1 }
  0xf1   : > { %1244 = vst [vmem:[%s2402_s30 + $0x20] sm:$0xff] %v917_v54  ;;  %v1353_v59 = vmax.f32 %v2404_v36, %v917_v54  ;;  %1300 = vst [vmem:[%s2402_s30 + $0x1e0] sm:$0xff] %v2435_v55  ;;  %v919_v60 = vadd.f32 %v918_v56, %v2346_v7  ;;  %v2442_v61 = vadd.f32 %v1086_v57, %v542_v49 }
  0xf2   : > { %v922_v62 = vpop.f32.mrf.mxu0  ;;  %v1090_v63 = vpop.f32.mrf.mxu1 }
  0xf3   : > { %1245 = vst.msk [vmem:[%s2402_s30 + $0x28] sm:$0xff] %vm1240_vm1, %v919_v60  ;;  %v1418_v1 = vsel %vm1240_vm1, %v919_v60, -inf  ;;  %1301 = vst.msk [vmem:[%s2402_s30 + $0x1e8] sm:$0xff] %vm1240_vm1, %v2442_v61  ;;  %v923_v2 = vadd.f32 %v922_v62, %v2348_v9  ;;  %v2452_v3 = vadd.f32 %v1090_v63, %v547_v58  ;;  %v562_v60 = vpop.permute.xlu0 %561 }
  0xf4   : > { %v1419_v4 = vmax.f32 %v1416_v0, %v1418_v1  ;;  %v924_v6 = vpop.f32.mrf.mxu0  ;;  %v1092_v7 = vpop.f32.mrf.mxu1 }
  0xf5   : > { %1246 = vst [vmem:[%s2402_s30 + $0x30] sm:$0xff] %v923_v2  ;;  %v1354_v33 = vmax.f32 %v2419_v45, %v923_v2  ;;  %1302 = vst [vmem:[%s2402_s30 + $0x1f0] sm:$0xff] %v2452_v3  ;;  %v925_v34 = vadd.f32 %v924_v6, %v2348_v9  ;;  %v2459_v35 = vadd.f32 %v1092_v7, %v547_v58 }
  0xf6   : > { %v928_v36 = vpop.f32.mrf.mxu0  ;;  %v1096_v38 = vpop.f32.mrf.mxu1 }
  0xf7   : > { %1247 = vst.msk [vmem:[%s2402_s30 + $0x38] sm:$0xff] %vm1240_vm1, %v925_v34  ;;  %v1420_v40 = vsel %vm1240_vm1, %v925_v34, -inf  ;;  %1303 = vst.msk [vmem:[%s2402_s30 + $0x1f8] sm:$0xff] %vm1240_vm1, %v2459_v35  ;;  %v929_v41 = vadd.f32 %v928_v36, %v2350_v10  ;;  %v2469_v43 = vadd.f32 %v1096_v38, %v552_v8  ;;  %v567_v34 = vpop.permute.xlu1 %566 }
  0xf8   : > { %v1421_v9 = vmax.f32 %v1417_v39, %v1420_v40  ;;  %v930_v44 = vpop.f32.mrf.mxu0  ;;  %v1098_v45 = vpop.f32.mrf.mxu1 }
  0xf9   : > { %1248 = vst [vmem:[%s2402_s30 + $0x40] sm:$0xff] %v929_v41  ;;  %v2472_v48 = vmax.f32 %v1353_v59, %v929_v41  ;;  %1304 = vst [vmem:[%s2402_s30 + $0x200] sm:$0xff] %v2469_v43  ;;  %v931_v49 = vadd.f32 %v930_v44, %v2350_v10  ;;  %v2477_v50 = vadd.f32 %v1098_v45, %v552_v8 }
  0xfa   : > { %v934_v52 = vpop.f32.mrf.mxu0  ;;  %v1102_v53 = vpop.f32.mrf.mxu1 }
  0xfb   : > { %1249 = vst.msk [vmem:[%s2402_s30 + $0x48] sm:$0xff] %vm1240_vm1, %v931_v49  ;;  %v1422_v54 = vsel %vm1240_vm1, %v931_v49, -inf  ;;  %1305 = vst.msk [vmem:[%s2402_s30 + $0x208] sm:$0xff] %vm1240_vm1, %v2477_v50  ;;  %v935_v56 = vadd.f32 %v934_v52, %v2352_v5  ;;  %v2486_v57 = vadd.f32 %v1102_v53, %v557_v47 }
  0xfc   : > { %v2488_v58 = vmax.f32 %v1419_v4, %v1422_v54  ;;  %v936_v10 = vpop.f32.mrf.mxu0  ;;  %v1104_v59 = vpop.f32.mrf.mxu1 }
  0xfd   : > { %1250 = vst [vmem:[%s2402_s30 + $0x50] sm:$0xff] %v935_v56  ;;  %v2491_v62 = vmax.f32 %v1354_v33, %v935_v56  ;;  %1306 = vst [vmem:[%s2402_s30 + $0x210] sm:$0xff] %v2486_v57  ;;  %v937_v63 = vadd.f32 %v936_v10, %v2352_v5  ;;  %v2496_v0 = vadd.f32 %v1104_v59, %v557_v47  ;;  %v572_v47 = vpop.permute.xlu0 %571 }
  0xfe   : > { %v940_v1 = vpop.f32.mrf.mxu0  ;;  %v1108_v2 = vpop.f32.mrf.mxu1 }
  0xff   : > { %1251 = vst.msk [vmem:[%s2402_s30 + $0x58] sm:$0xff] %vm1240_vm1, %v937_v63  ;;  %v1424_v4 = vsel %vm1240_vm1, %v937_v63, -inf  ;;  %1307 = vst.msk [vmem:[%s2402_s30 + $0x218] sm:$0xff] %vm1240_vm1, %v2496_v0  ;;  %v2505_v6 = vadd.f32 %v940_v1, %v2354_v11  ;;  %v2507_v7 = vadd.f32 %v1108_v2, %v562_v60  ;;  %v577_v63 = vpop.permute.xlu1 %576 }
 0x100   : > { %v2509_v8 = vmax.f32 %v1421_v9, %v1424_v4  ;;  %v942_v5 = vpop.f32.mrf.mxu0  ;;  %v1110_v33 = vpop.f32.mrf.mxu1 }
 0x101   : > { %1252 = vst [vmem:[%s2402_s30 + $0x60] sm:$0xff] %v2505_v6  ;;  %1308 = vst [vmem:[%s2402_s30 + $0x220] sm:$0xff] %v2507_v7  ;;  %v2518_v38 = vadd.f32 %v942_v5, %v2354_v11  ;;  %v2520_v39 = vadd.f32 %v1110_v33, %v562_v60 }
 0x102   : > { %v946_v40 = vpop.f32.mrf.mxu0  ;;  %v1114_v41 = vpop.f32.mrf.mxu1 }
 0x103   : > { %1253 = vst.msk [vmem:[%s2402_s30 + $0x68] sm:$0xff] %vm1240_vm1, %v2518_v38  ;;  %1309 = vst.msk [vmem:[%s2402_s30 + $0x228] sm:$0xff] %vm1240_vm1, %v2520_v39  ;;  %v2529_v9 = vadd.f32 %v946_v40, %v2356_v12  ;;  %v2531_v44 = vadd.f32 %v1114_v41, %v567_v34  ;;  %v582_v41 = vpop.permute.xlu0 %581 }
 0x104   : > { %v948_v45 = vpop.f32.mrf.mxu0  ;;  %v1116_v11 = vpop.f32.mrf.mxu1 }
 0x105   : > { %1254 = vst [vmem:[%s2402_s30 + $0x70] sm:$0xff] %v2529_v9  ;;  %1310 = vst [vmem:[%s2402_s30 + $0x230] sm:$0xff] %v2531_v44  ;;  %v2540_v52 = vadd.f32 %v948_v45, %v2356_v12  ;;  %v2542_v53 = vadd.f32 %v1116_v11, %v567_v34 }
 0x106   : > { %v952_v54 = vpop.f32.mrf.mxu0  ;;  %v1120_v56 = vpop.f32.mrf.mxu1 }
 0x107   : > { %1255 = vst.msk [vmem:[%s2402_s30 + $0x78] sm:$0xff] %vm1240_vm1, %v2540_v52  ;;  %1311 = vst.msk [vmem:[%s2402_s30 + $0x238] sm:$0xff] %vm1240_vm1, %v2542_v53  ;;  %v2551_v10 = vadd.f32 %v952_v54, %v2358_v13  ;;  %v2553_v59 = vadd.f32 %v1120_v56, %v572_v47 }
 0x108   : > { %v954_v60 = vpop.f32.mrf.mxu0  ;;  %v1122_v12 = vpop.f32.mrf.mxu1 }
 0x109   : > { %1256 = vst [vmem:[%s2402_s30 + $0x80] sm:$0xff] %v2551_v10  ;;  %1312 = vst [vmem:[%s2402_s30 + $0x240] sm:$0xff] %v2553_v59  ;;  %v2560_v1 = vadd.f32 %v954_v60, %v2358_v13  ;;  %v2562_v2 = vadd.f32 %v1122_v12, %v572_v47 }
 0x10a   : > { %v958_v4 = vpop.f32.mrf.mxu0  ;;  %v1126_v5 = vpop.f32.mrf.mxu1 }
 0x10b   : > { %1257 = vst.msk [vmem:[%s2402_s30 + $0x88] sm:$0xff] %vm1240_vm1, %v2560_v1  ;;  %1313 = vst.msk [vmem:[%s2402_s30 + $0x248] sm:$0xff] %vm1240_vm1, %v2562_v2  ;;  %v2571_v33 = vadd.f32 %v958_v4, %v2360_v14  ;;  %v2573_v34 = vadd.f32 %v1126_v5, %v577_v63 }
 0x10c   : > { %v960_v40 = vpop.f32.mrf.mxu0  ;;  %v1128_v13 = vpop.f32.mrf.mxu1 }
 0x10d   : > { %1258 = vst [vmem:[%s2402_s30 + $0x90] sm:$0xff] %v2571_v33  ;;  %1314 = vst [vmem:[%s2402_s30 + $0x250] sm:$0xff] %v2573_v34  ;;  %v2580_v45 = vadd.f32 %v960_v40, %v2360_v14  ;;  %v2582_v11 = vadd.f32 %v1128_v13, %v577_v63  ;;  %v587_v63 = vpop.permute.xlu1 %586 }
 0x10e   : > { %v964_v47 = vpop.f32.mrf.mxu0  ;;  %v1132_v54 = vpop.f32.mrf.mxu1 }
 0x10f   : > { %1259 = vst.msk [vmem:[%s2402_s30 + $0x98] sm:$0xff] %vm1240_vm1, %v2580_v45  ;;  %1315 = vst.msk [vmem:[%s2402_s30 + $0x258] sm:$0xff] %vm1240_vm1, %v2582_v11  ;;  %v2591_v56 = vadd.f32 %v964_v47, %v2362_v15  ;;  %v2593_v60 = vadd.f32 %v1132_v54, %v582_v41 }
 0x110   : > { %v966_v12 = vpop.f32.mrf.mxu0  ;;  %v1134_v14 = vpop.f32.mrf.mxu1 }
 0x111   : > { %1260 = vst [vmem:[%s2402_s30 + $0xa0] sm:$0xff] %v2591_v56  ;;  %1316 = vst [vmem:[%s2402_s30 + $0x260] sm:$0xff] %v2593_v60  ;;  %v2600_v4 = vadd.f32 %v966_v12, %v2362_v15  ;;  %v2602_v5 = vadd.f32 %v1134_v14, %v582_v41  ;;  %v592_v41 = vpop.permute.xlu0 %591 }
 0x112   : > { %v970_v40 = vpop.f32.mrf.mxu0  ;;  %v1138_v13 = vpop.f32.mrf.mxu1 }
 0x113   : > { %1261 = vst.msk [vmem:[%s2402_s30 + $0xa8] sm:$0xff] %vm1240_vm1, %v2600_v4  ;;  %1317 = vst.msk [vmem:[%s2402_s30 + $0x268] sm:$0xff] %vm1240_vm1, %v2602_v5  ;;  %v2611_v47 = vadd.f32 %v970_v40, %v2364_v16  ;;  %v2613_v54 = vadd.f32 %v1138_v13, %v587_v63 }
 0x114   : > { %v972_v49 = vpop.f32.mrf.mxu0  ;;  %v1140_v15 = vpop.f32.mrf.mxu1 }
 0x115   : > { %1262 = vst [vmem:[%s2402_s30 + $0xb0] sm:$0xff] %v2611_v47  ;;  %1318 = vst [vmem:[%s2402_s30 + $0x270] sm:$0xff] %v2613_v54  ;;  %v2620_v12 = vadd.f32 %v972_v49, %v2364_v16  ;;  %v2622_v14 = vadd.f32 %v1140_v15, %v587_v63  ;;  %v597_v49 = vpop.permute.xlu1 %596 }
 0x116   : > { %v976_v36 = vpop.f32.mrf.mxu0  ;;  %v1144_v40 = vpop.f32.mrf.mxu1 }
 0x117   : > { %1263 = vst.msk [vmem:[%s2402_s30 + $0xb8] sm:$0xff] %vm1240_vm1, %v2620_v12  ;;  %1319 = vst.msk [vmem:[%s2402_s30 + $0x278] sm:$0xff] %vm1240_vm1, %v2622_v14  ;;  %v2631_v13 = vadd.f32 %v976_v36, %v2366_v17  ;;  %v2633_v32 = vadd.f32 %v1144_v40, %v592_v41 }
 0x118   : > { %v978_v31 = vpop.f32.mrf.mxu0  ;;  %v1146_v16 = vpop.f32.mrf.mxu1 }
 0x119   : > { %3063 = vst [vmem:[#allocation9_spill] sm:$0xff] %v2631_v13  ;;  %1264 = vst [vmem:[%s2402_s30 + $0xc0] sm:$0xff] %v2631_v13  ;;  %v2640_v63 = vadd.f32 %v978_v31, %v2366_v17  ;;  %v2642_v15 = vadd.f32 %v1146_v16, %v592_v41  ;;  %v602_v31 = vpop.permute.xlu0 %601  ;;  %v1476_v13 = vsel %vm1240_vm1, %v2459_v35, -inf  ;;  %v1478_v35 = vsel %vm1240_vm1, %v2477_v50, -inf }
 0x11a   : > { %1320 = vst [vmem:[%s2402_s30 + $0x280] sm:$0xff] %v2633_v32  ;;  %v982_v30 = vpop.f32.mrf.mxu0  ;;  %v1150_v36 = vpop.f32.mrf.mxu1 }
 0x11b   : > { %1265 = vst.msk [vmem:[%s2402_s30 + $0xc8] sm:$0xff] %vm1240_vm1, %v2640_v63  ;;  %1321 = vst.msk [vmem:[%s2402_s30 + $0x288] sm:$0xff] %vm1240_vm1, %v2642_v15  ;;  %v2651_v40 = vadd.f32 %v982_v30, %v2368_v18  ;;  %v2653_v29 = vadd.f32 %v1150_v36, %v597_v49  ;;  %v1472_v30 = vsel %vm1240_vm1, %v2427_v51, -inf  ;;  %v1470_v51 = vsel %vm1240_vm1, %v2412_v42, -inf }
 0x11c   : > { %v984_v28 = vpop.f32.mrf.mxu0  ;;  %v1152_v17 = vpop.f32.mrf.mxu1 }
 0x11d   : > { %3064 = vst [vmem:[#allocation10_spill] sm:$0xff] %v2651_v40  ;;  %3065 = vst [vmem:[#allocation11_spill] sm:$0xff] %v2653_v29  ;;  %v2660_v41 = vadd.f32 %v984_v28, %v2368_v18  ;;  %v2662_v16 = vadd.f32 %v1152_v17, %v597_v49  ;;  %v1379_v18 = vmax.f32 %v2421_v46, %v2406_v37  ;;  %v607_v17 = vpop.permute.xlu1 %606 }
 0x11e   : > { %1266 = vst [vmem:[%s2402_s30 + $0xd0] sm:$0xff] %v2651_v40  ;;  %1322 = vst [vmem:[%s2402_s30 + $0x290] sm:$0xff] %v2653_v29  ;;  %v988_v27 = vpop.f32.mrf.mxu0  ;;  %v1156_v26 = vpop.f32.mrf.mxu1  ;;  %v1471_v37 = vmax.f32 %v1472_v30, %v1470_v51 }
 0x11f   : > { %3066 = vst [vmem:[#allocation12_spill] sm:$0xff] %v2660_v41  ;;  %1267 = vst.msk [vmem:[%s2402_s30 + $0xd8] sm:$0xff] %vm1240_vm1, %v2660_v41  ;;  %v2673_v36 = vadd.f32 %v988_v27, %v2370_v19  ;;  %v2675_v40 = vadd.f32 %v1156_v26, %v602_v31  ;;  %v1474_v41 = vsel %vm1240_vm1, %v2442_v61, -inf  ;;  %v1381_v46 = vmax.f32 %v1379_v18, %v2435_v55 }
 0x120   : > { %1323 = vst.msk [vmem:[%s2402_s30 + $0x298] sm:$0xff] %vm1240_vm1, %v2662_v16  ;;  %v990_v28 = vpop.f32.mrf.mxu0  ;;  %v1158_v49 = vpop.f32.mrf.mxu1 }
 0x121   : > { %1268 = vst [vmem:[%s2402_s30 + $0xe0] sm:$0xff] %v2673_v36  ;;  %1324 = vst [vmem:[%s2402_s30 + $0x2a0] sm:$0xff] %v2675_v40  ;;  %v2688_v26 = vadd.f32 %v990_v28, %v2370_v19  ;;  %v2690_v27 = vadd.f32 %v1158_v49, %v602_v31  ;;  %v1475_v31 = vmax.f32 %v1471_v37, %v1474_v41  ;;  %v612_v28 = vpop.permute.xlu0 %611 }
 0x122   : > { %v994_v29 = vpop.f32.mrf.mxu0  ;;  %v1162_v42 = vpop.f32.mrf.mxu1  ;;  %v1383_v55 = vmax.f32 %v1381_v46, %v2452_v3  ;;  %v1480_v46 = vsel %vm1240_vm1, %v2496_v0, -inf  ;;  %v1482_v0 = vsel %vm1240_vm1, %v2520_v39, -inf  ;;  %v1484_v39 = vsel %vm1240_vm1, %v2542_v53, -inf }
 0x123   : > { %1269 = vst.msk [vmem:[%s2402_s30 + $0xe8] sm:$0xff] %vm1240_vm1, %v2688_v26  ;;  %1325 = vst.msk [vmem:[%s2402_s30 + $0x2a8] sm:$0xff] %vm1240_vm1, %v2690_v27  ;;  %v2702_v19 = vadd.f32 %v994_v29, %v2372_v20  ;;  %v2704_v61 = vadd.f32 %v1162_v42, %v607_v17  ;;  %v1479_v41 = vmax.f32 %v1475_v31, %v1476_v13  ;;  %v617_v31 = vpop.permute.xlu1 %616  ;;  %v1428_v53 = vsel %vm1240_vm1, %v2540_v52, -inf }
 0x124   : > { %v996_v30 = vpop.f32.mrf.mxu0  ;;  %v1164_v18 = vpop.f32.mrf.mxu1  ;;  %v1385_v3 = vmax.f32 %v1383_v55, %v2469_v43  ;;  %v1430_v52 = vsel %vm1240_vm1, %v2560_v1, -inf  ;;  %v3067_v1 = vmax.f32 %v2472_v48, %v2505_v6 }
 0x125   : > { %1270 = vst [vmem:[%s2402_s30 + $0xf0] sm:$0xff] %v2702_v19  ;;  %1326 = vst [vmem:[%s2402_s30 + $0x2b0] sm:$0xff] %v2704_v61  ;;  %v2714_v29 = vadd.f32 %v996_v30, %v2372_v20  ;;  %v2716_v49 = vadd.f32 %v1164_v18, %v607_v17  ;;  %v1483_v13 = vmax.f32 %v1479_v41, %v1478_v35 }
 0x126   : > { %v1000_v51 = vpop.f32.mrf.mxu0  ;;  %v1168_v37 = vpop.f32.mrf.mxu1  ;;  %v1387_v43 = vmax.f32 %v1385_v3, %v2486_v57  ;;  %v1426_v3 = vsel %vm1240_vm1, %v2518_v38, -inf }
 0x127   : > { %1271 = vst.msk [vmem:[%s2402_s30 + $0xf8] sm:$0xff] %vm1240_vm1, %v2714_v29  ;;  %1327 = vst.msk [vmem:[%s2402_s30 + $0x2b8] sm:$0xff] %vm1240_vm1, %v2716_v49  ;;  %v2728_v20 = vadd.f32 %v1000_v51, %v2374_v21  ;;  %v2730_v50 = vadd.f32 %v1168_v37, %v612_v28  ;;  %v1487_v18 = vmax.f32 %v1483_v13, %v1480_v46  ;;  %v622_v46 = vpop.permute.xlu0 %621  ;;  %v1486_v13 = vsel %vm1240_vm1, %v2562_v2, -inf }
 0x128   : > { %v1002_v17 = vpop.f32.mrf.mxu0  ;;  %v1170_v42 = vpop.f32.mrf.mxu1  ;;  %v1389_v35 = vmax.f32 %v1387_v43, %v2507_v7  ;;  %v1488_v2 = vsel %vm1240_vm1, %v2582_v11, -inf }
 0x129   : > { %1272 = vst [vmem:[%s2402_s30 + $0x100] sm:$0xff] %v2728_v20  ;;  %1328 = vst [vmem:[%s2402_s30 + $0x2c0] sm:$0xff] %v2730_v50  ;;  %v2740_v55 = vadd.f32 %v1002_v17, %v2374_v21  ;;  %v2742_v30 = vadd.f32 %v1170_v42, %v612_v28  ;;  %v1491_v28 = vmax.f32 %v1487_v18, %v1482_v0 }
 0x12a   : > { %v1006_v57 = vpop.f32.mrf.mxu0  ;;  %v1174_v41 = vpop.f32.mrf.mxu1  ;;  %v1391_v51 = vmax.f32 %v1389_v35, %v2531_v44  ;;  %v1427_v44 = vmax.f32 %v2488_v58, %v1426_v3 }
 0x12b   : > { %1273 = vst.msk [vmem:[%s2402_s30 + $0x108] sm:$0xff] %vm1240_vm1, %v2740_v55  ;;  %1329 = vst.msk [vmem:[%s2402_s30 + $0x2c8] sm:$0xff] %vm1240_vm1, %v2742_v30  ;;  %v2756_v21 = vadd.f32 %v1006_v57, %v2376_v22  ;;  %v2758_v7 = vadd.f32 %v1174_v41, %v617_v31  ;;  %v1495_v42 = vmax.f32 %v1491_v28, %v1484_v39  ;;  %v627_v39 = vpop.permute.xlu1 %626  ;;  %v1432_v28 = vsel %vm1240_vm1, %v2580_v45, -inf }
 0x12c   : > { %v1008_v37 = vpop.f32.mrf.mxu0  ;;  %v1176_v38 = vpop.f32.mrf.mxu1  ;;  %v1393_v0 = vmax.f32 %v1391_v51, %v2553_v59  ;;  %v1429_v59 = vmax.f32 %v2509_v8, %v1428_v53  ;;  %v1490_v51 = vsel %vm1240_vm1, %v2602_v5, -inf  ;;  %v1431_v8 = vmax.f32 %v1427_v44, %v1430_v52 }
 0x12d   : > { %1274 = vst [vmem:[%s2402_s30 + $0x110] sm:$0xff] %v2756_v21  ;;  %1330 = vst [vmem:[%s2402_s30 + $0x2d0] sm:$0xff] %v2758_v7  ;;  %v2770_v43 = vadd.f32 %v1008_v37, %v2376_v22  ;;  %v2772_v17 = vadd.f32 %v1176_v38, %v617_v31  ;;  %v1359_v31 = vmax.f32 %v3067_v1, %v2551_v10  ;;  %v1434_v53 = vsel %vm1240_vm1, %v2600_v4, -inf }
 0x12e   : > { %v1012_v18 = vpop.f32.mrf.mxu0  ;;  %v1180_v35 = vpop.f32.mrf.mxu1  ;;  %v1499_v57 = vmax.f32 %v1495_v42, %v1486_v13  ;;  %v1395_v11 = vmax.f32 %v1393_v0, %v2573_v34  ;;  %v3068_v10 = vmax.f32 %v2491_v62, %v2529_v9  ;;  %v1436_v42 = vsel %vm1240_vm1, %v2620_v12, -inf }
 0x12f   : > { %1275 = vst.msk [vmem:[%s2402_s30 + $0x118] sm:$0xff] %vm1240_vm1, %v2770_v43  ;;  %1331 = vst.msk [vmem:[%s2402_s30 + $0x2d8] sm:$0xff] %vm1240_vm1, %v2772_v17  ;;  %v2787_v22 = vadd.f32 %v1012_v18, %v2378_v23  ;;  %v2789_v58 = vadd.f32 %v1180_v35, %v622_v46  ;;  %v1494_v0 = vsel %vm1240_vm1, %v2642_v15, -inf  ;;  %v1438_v15 = vsel %vm1240_vm1, %v2640_v63, -inf  ;;  %v3070_v63 = vld [vmem:[#allocation11_spill] sm:$0xff] }
 0x130   : > { %v1014_v41 = vpop.f32.mrf.mxu0  ;;  %v1182_v3 = vpop.f32.mrf.mxu1  ;;  %v1360_v34 = vmax.f32 %v3068_v10, %v2571_v33  ;;  %v1503_v37 = vmax.f32 %v1499_v57, %v1488_v2  ;;  %v1397_v45 = vmax.f32 %v1395_v11, %v2593_v60  ;;  %v1433_v33 = vmax.f32 %v1429_v59, %v1432_v28  ;;  %v3071_v28 = vld [vmem:[#allocation12_spill] sm:$0xff] }
 0x131   : > { %1276 = vst [vmem:[%s2402_s30 + $0x120] sm:$0xff] %v2787_v22  ;;  %1332 = vst [vmem:[%s2402_s30 + $0x2e0] sm:$0xff] %v2789_v58  ;;  %v2806_v48 = vadd.f32 %v1014_v41, %v2378_v23  ;;  %v2808_v6 = vadd.f32 %v1182_v3, %v622_v46  ;;  %v1492_v23 = vsel %vm1240_vm1, %v2622_v14, -inf  ;;  %v1361_v60 = vmax.f32 %v1359_v31, %v2591_v56  ;;  %v632_v14 = vpop.permute.xlu0 %631  ;;  %v3069_v31 = vld [vmem:[#allocation9_spill] sm:$0xff] }
 0x132   : > { %v1018_v38 = vpop.f32.mrf.mxu0  ;;  %v1186_v5 = vpop.f32.mrf.mxu1  ;;  %v1507_v46 = vmax.f32 %v1503_v37, %v1490_v51  ;;  %v1399_v4 = vmax.f32 %v1397_v45, %v2613_v54  ;;  %v1435_v54 = vmax.f32 %v1431_v8, %v1434_v53  ;;  %v1362_v35 = vmax.f32 %v1360_v34, %v2611_v47  ;;  %v3072_v45 = vld [vmem:[#allocation10_spill] sm:$0xff] }
 0x133   : > { %1277 = vst.msk [vmem:[%s2402_s30 + $0x128] sm:$0xff] %vm1240_vm1, %v2806_v48  ;;  %1333 = vst.msk [vmem:[%s2402_s30 + $0x2e8] sm:$0xff] %vm1240_vm1, %v2808_v6  ;;  %v2826_v62 = vadd.f32 %v1018_v38, %v2380_v24  ;;  %v2828_v9 = vadd.f32 %v1186_v5, %v627_v39  ;;  %v1496_v1 = vsel %vm1240_vm1, %v2662_v16, -inf  ;;  %v1437_v47 = vmax.f32 %v1433_v33, %v1436_v42  ;;  %v637_v16 = vpop.permute.xlu1 %636 }
 0x134   : > { %v1020_v13 = vpop.f32.mrf.mxu0  ;;  %v1188_v44 = vpop.f32.mrf.mxu1  ;;  %v1511_v52 = vmax.f32 %v1507_v46, %v1492_v23  ;;  %v1401_v2 = vmax.f32 %v1399_v4, %v2633_v32  ;;  %v1363_v57 = vmax.f32 %v1361_v60, %v3069_v31  ;;  %v1440_v51 = vsel %vm1240_vm1, %v3071_v28, -inf }
 0x135   : > { %1278 = vst [vmem:[%s2402_s30 + $0x130] sm:$0xff] %v2826_v62  ;;  %1334 = vst [vmem:[%s2402_s30 + $0x2f0] sm:$0xff] %v2828_v9  ;;  %v2841_v56 = vadd.f32 %v1020_v13, %v2380_v24  ;;  %v2843_v18 = vadd.f32 %v1188_v44, %v627_v39  ;;  %v1498_v8 = vsel %vm1240_vm1, %v2690_v27, -inf  ;;  %v1439_v37 = vmax.f32 %v1435_v54, %v1438_v15 }
 0x136   : > { %v1024_v59 = vpop.f32.mrf.mxu0  ;;  %v1192_v12 = vpop.f32.mrf.mxu1  ;;  %v1515_v11 = vmax.f32 %v1511_v52, %v1494_v0  ;;  %v1403_v41 = vmax.f32 %v1401_v2, %v3070_v63  ;;  %v1364_v38 = vmax.f32 %v1362_v35, %v3072_v45  ;;  %v1442_v27 = vsel %vm1240_vm1, %v2688_v26, -inf  ;;  %v3075_v45 = vld [vmem:[#allocation4_spill] sm:$0xff] }
 0x137   : > { %1279 = vst.msk [vmem:[%s2402_s30 + $0x138] sm:$0xff] %vm1240_vm1, %v2841_v56  ;;  %1335 = vst.msk [vmem:[%s2402_s30 + $0x2f8] sm:$0xff] %vm1240_vm1, %v2843_v18  ;;  %v2858_v24 = vadd.f32 %v1024_v59, %v2382_v25  ;;  %v2860_v32 = vadd.f32 %v1192_v12, %v632_v14  ;;  %v1500_v60 = vsel %vm1240_vm1, %v2716_v49, -inf  ;;  %v1441_v4 = vmax.f32 %v1437_v47, %v1440_v51  ;;  %v642_v49 = vpop.permute.xlu0 %641 }
 0x138   : > { %v1026_v3 = vpop.f32.mrf.mxu0  ;;  %v1194_v39 = vpop.f32.mrf.mxu1  ;;  %v1519_v5 = vmax.f32 %v1515_v11, %v1496_v1  ;;  %v1405_v53 = vmax.f32 %v1403_v41, %v2675_v40  ;;  %v1365_v13 = vmax.f32 %v1363_v57, %v2673_v36  ;;  %v1444_v0 = vsel %vm1240_vm1, %v2714_v29, -inf  ;;  %v3074_v1 = vld [vmem:[#allocation3_spill] sm:$0xff] }
 0x139   : > { %1280 = vst [vmem:[%s2402_s30 + $0x140] sm:$0xff] %v2858_v24  ;;  %1336 = vst [vmem:[%s2402_s30 + $0x300] sm:$0xff] %v2860_v32  ;;  %v2873_v10 = vadd.f32 %v1026_v3, %v2382_v25  ;;  %v2875_v34 = vadd.f32 %v1194_v39, %v632_v14  ;;  %v3073_v25 = vld [vmem:[#allocation2_spill] sm:$0xff]  ;;  %v1502_v54 = vsel %vm1240_vm1, %v2742_v30, -inf  ;;  %v1366_v52 = vmax.f32 %v1364_v38, %v2702_v19 }
 0x13a   : > { %v1030_v23 = vpop.f32.mrf.mxu0  ;;  %v1198_v33 = vpop.f32.mrf.mxu1  ;;  %v1523_v44 = vmax.f32 %v1519_v5, %v1498_v8  ;;  %v1380_v26 = vmax.f32 %v2704_v61, %v1405_v53  ;;  %v1443_v61 = vmax.f32 %v1439_v37, %v1442_v27  ;;  %v1446_v29 = vsel %vm1240_vm1, %v2740_v55, -inf }
 0x13b   : > { %1281 = vst.msk [vmem:[%s2402_s30 + $0x148] sm:$0xff] %vm1240_vm1, %v2873_v10  ;;  %1337 = vst.msk [vmem:[%s2402_s30 + $0x308] sm:$0xff] %vm1240_vm1, %v2875_v34  ;;  %v2890_v46 = vadd.f32 %v1030_v23, %v3073_v25  ;;  %v2892_v40 = vadd.f32 %v1198_v33, %v637_v16  ;;  %v1504_v30 = vsel %vm1240_vm1, %v2772_v17, -inf  ;;  %v1367_v31 = vmax.f32 %v1365_v13, %v2728_v20  ;;  %v647_v17 = vpop.permute.xlu1 %646 }
 0x13c   : > { %v1032_v14 = vpop.f32.mrf.mxu0  ;;  %v1200_v42 = vpop.f32.mrf.mxu1  ;;  %v1469_v2 = vmax.f32 %v1500_v60, %v1523_v44  ;;  %v1382_v59 = vmax.f32 %v1380_v26, %v2730_v50  ;;  %v1445_v50 = vmax.f32 %v1441_v4, %v1444_v0  ;;  %v1448_v41 = vsel %vm1240_vm1, %v2770_v43, -inf }
 0x13d   : > { %1282 = vst [vmem:[%s2402_s30 + $0x150] sm:$0xff] %v2890_v46  ;;  %1338 = vst [vmem:[%s2402_s30 + $0x310] sm:$0xff] %v2892_v40  ;;  %v2905_v36 = vadd.f32 %v1032_v14, %v3073_v25  ;;  %v1201_v35 = vadd.f32 %v1200_v42, %v637_v16  ;;  %v1506_v3 = vsel %vm1240_vm1, %v2808_v6, -inf  ;;  %v1368_v16 = vmax.f32 %v1366_v52, %v2756_v21  ;;  %v3076_v42 = vld [vmem:[#allocation5_spill] sm:$0xff] }
 0x13e   : > { %v1036_v12 = vpop.f32.mrf.mxu0  ;;  %v1204_v15 = vpop.f32.mrf.mxu1  ;;  %v1473_v57 = vmax.f32 %v1469_v2, %v1502_v54  ;;  %v1384_v55 = vmax.f32 %v1382_v59, %v2758_v7  ;;  %v1447_v7 = vmax.f32 %v1443_v61, %v1446_v29  ;;  %v1450_v43 = vsel %vm1240_vm1, %v2806_v48, -inf }
 0x13f   : > { %1283 = vst.msk [vmem:[%s2402_s30 + $0x158] sm:$0xff] %vm1240_vm1, %v2905_v36  ;;  %1339 = vst.msk [vmem:[%s2402_s30 + $0x318] sm:$0xff] %vm1240_vm1, %v1201_v35  ;;  %v2919_v19 = vadd.f32 %v1036_v12, %v3074_v1  ;;  %v2921_v47 = vadd.f32 %v1204_v15, %v642_v49  ;;  %v1508_v6 = vsel %vm1240_vm1, %v2843_v18, -inf  ;;  %v1369_v5 = vmax.f32 %v1367_v31, %v2787_v22  ;;  %v652_v18 = vpop.permute.xlu0 %651 }
 0x140   : > { %v1038_v11 = vpop.f32.mrf.mxu0  ;;  %v1206_v63 = vpop.f32.mrf.mxu1  ;;  %v1477_v28 = vmax.f32 %v1473_v57, %v1504_v30  ;;  %v1386_v51 = vmax.f32 %v1384_v55, %v2789_v58  ;;  %v1449_v58 = vmax.f32 %v1445_v50, %v1448_v41  ;;  %v1452_v27 = vsel %vm1240_vm1, %v2841_v56, -inf  ;;  %v3077_v57 = vld [vmem:[#allocation6_spill] sm:$0xff] }
 0x141   : > { %1284 = vst [vmem:[%s2402_s30 + $0x160] sm:$0xff] %v2919_v19  ;;  %1340 = vst [vmem:[%s2402_s30 + $0x320] sm:$0xff] %v2921_v47  ;;  %v2934_v20 = vadd.f32 %v1038_v11, %v3074_v1  ;;  %v1207_v39 = vadd.f32 %v1206_v63, %v642_v49  ;;  %v1510_v60 = vsel %vm1240_vm1, %v2875_v34, -inf  ;;  %v1451_v4 = vmax.f32 %v1447_v7, %v1450_v43 }
 0x142   : > { %v1042_v8 = vpop.f32.mrf.mxu0  ;;  %v1210_v37 = vpop.f32.mrf.mxu1  ;;  %v1481_v53 = vmax.f32 %v1477_v28, %v1506_v3  ;;  %v1388_v48 = vmax.f32 %v1386_v51, %v2828_v9  ;;  %v1370_v9 = vmax.f32 %v1368_v16, %v2826_v62  ;;  %v1454_v56 = vsel %vm1240_vm1, %v2873_v10, -inf }
 0x143   : > { %1285 = vst.msk [vmem:[%s2402_s30 + $0x168] sm:$0xff] %vm1240_vm1, %v2934_v20  ;;  %1341 = vst.msk [vmem:[%s2402_s30 + $0x328] sm:$0xff] %vm1240_vm1, %v1207_v39  ;;  %v2948_v21 = vadd.f32 %v1042_v8, %v3075_v45  ;;  %v2950_v38 = vadd.f32 %v1210_v37, %v647_v17  ;;  %v1512_v34 = vsel %vm1240_vm1, %v1201_v35, -inf  ;;  %v1453_v62 = vmax.f32 %v1449_v58, %v1452_v27  ;;  %v657_v10 = vpop.permute.xlu1 %656  ;;  %v3078_v58 = vld [vmem:[#allocation7_spill] sm:$0xff] }
 0x144   : > { %v1044_v23 = vpop.f32.mrf.mxu0  ;;  %v1212_v33 = vpop.f32.mrf.mxu1  ;;  %v1485_v13 = vmax.f32 %v1481_v53, %v1508_v6  ;;  %v1390_v44 = vmax.f32 %v1388_v48, %v2860_v32  ;;  %v1371_v54 = vmax.f32 %v1369_v5, %v2858_v24  ;;  %v1456_v35 = vsel %vm1240_vm1, %v2905_v36, -inf }
 0x145   : > { %1286 = vst [vmem:[%s2402_s30 + $0x170] sm:$0xff] %v2948_v21  ;;  %1342 = vst [vmem:[%s2402_s30 + $0x330] sm:$0xff] %v2950_v38  ;;  %v1045_v22 = vadd.f32 %v1044_v23, %v3075_v45  ;;  %v1213_v25 = vadd.f32 %v1212_v33, %v647_v17  ;;  %v1514_v59 = vsel %vm1240_vm1, %v1207_v39, -inf  ;;  %v1455_v29 = vmax.f32 %v1451_v4, %v1454_v56  ;;  %v662_v39 = vpop.permute.xlu0 %661 }
 0x146   : > { %v1048_v26 = vpop.f32.mrf.mxu0  ;;  %v1216_v14 = vpop.f32.mrf.mxu1  ;;  %v1489_v32 = vmax.f32 %v1485_v13, %v1510_v60  ;;  %v1392_v61 = vmax.f32 %v1390_v44, %v2892_v40  ;;  %v1372_v24 = vmax.f32 %v1370_v9, %v2890_v46  ;;  %v1457_v63 = vmax.f32 %v1453_v62, %v1456_v35 }
 0x147   : > { %1287 = vst.msk [vmem:[%s2402_s30 + $0x178] sm:$0xff] %vm1240_vm1, %v1045_v22  ;;  %1343 = vst.msk [vmem:[%s2402_s30 + $0x338] sm:$0xff] %vm1240_vm1, %v1213_v25  ;;  %v1049_v49 = vadd.f32 %v1048_v26, %v3076_v42  ;;  %v1217_v0 = vadd.f32 %v1216_v14, %v652_v18  ;;  %v1460_v31 = vsel %vm1240_vm1, %v1045_v22, -inf  ;;  %v1516_v36 = vsel %vm1240_vm1, %v1213_v25, -inf }
 0x148   : > { %v1050_v52 = vpop.f32.mrf.mxu0  ;;  %v1218_v2 = vpop.f32.mrf.mxu1  ;;  %v1493_v30 = vmax.f32 %v1489_v32, %v1512_v34  ;;  %v1394_v40 = vmax.f32 %v1392_v61, %v2921_v47  ;;  %v1373_v46 = vmax.f32 %v1371_v54, %v2919_v19  ;;  %v1458_v7 = vsel %vm1240_vm1, %v2934_v20, -inf }
 0x149   : > { %1288 = vst [vmem:[%s2402_s30 + $0x180] sm:$0xff] %v1049_v49  ;;  %1344 = vst [vmem:[%s2402_s30 + $0x340] sm:$0xff] %v1217_v0  ;;  %v1051_v12 = vadd.f32 %v1050_v52, %v3076_v42  ;;  %v1219_v15 = vadd.f32 %v1218_v2, %v652_v18  ;;  %v1461_v8 = vmax.f32 %v1457_v63, %v1460_v31 }
 0x14a   : > { %v1054_v1 = vpop.f32.mrf.mxu0  ;;  %v1222_v50 = vpop.f32.mrf.mxu1  ;;  %v1497_v17 = vmax.f32 %v1493_v30, %v1514_v59  ;;  %v1396_v47 = vmax.f32 %v1394_v40, %v2950_v38  ;;  %v1375_v37 = vmax.f32 %v1373_v46, %v1049_v49  ;;  %v1459_v48 = vmax.f32 %v1455_v29, %v1458_v7 }
 0x14b   : > { %1289 = vst.msk [vmem:[%s2402_s30 + $0x188] sm:$0xff] %vm1240_vm1, %v1051_v12  ;;  %1345 = vst.msk [vmem:[%s2402_s30 + $0x348] sm:$0xff] %vm1240_vm1, %v1219_v15  ;;  %v1055_v55 = vadd.f32 %v1054_v1, %v3077_v57  ;;  %v1223_v11 = vadd.f32 %v1222_v50, %v657_v10  ;;  %v1518_v16 = vsel %vm1240_vm1, %v1219_v15, -inf  ;;  %v1462_v38 = vsel %vm1240_vm1, %v1051_v12, -inf }
 0x14c   : > { %v1056_v41 = vpop.f32.mrf.mxu0  ;;  %v1224_v3 = vpop.f32.mrf.mxu1  ;;  %v1501_v19 = vmax.f32 %v1497_v17, %v1516_v36  ;;  %v1398_v43 = vmax.f32 %v1396_v47, %v1217_v0  ;;  %v1374_v23 = vmax.f32 %v1372_v24, %v2948_v21  ;;  %v1463_v13 = vmax.f32 %v1459_v48, %v1462_v38  ;;  %v3079_v0 = vld [vmem:[#allocation8_spill] sm:$0xff] }
 0x14d   : > { %1290 = vst [vmem:[%s2402_s30 + $0x190] sm:$0xff] %v1055_v55  ;;  %1346 = vst [vmem:[%s2402_s30 + $0x350] sm:$0xff] %v1223_v11  ;;  %v1057_v28 = vadd.f32 %v1056_v41, %v3077_v57  ;;  %v1225_v51 = vadd.f32 %v1224_v3, %v657_v10  ;;  %v667_v21 = vpop.permute.xlu1 %666  ;;  %v1828_v47 = vmov 1966171168   ;;  %v1539_v3 = vlaneseq }
 0x14e   : > { %v1060_v6 = vpop.f32.mrf.mxu0  ;;  %v1228_v45 = vpop.f32.mrf.mxu1  ;;  %v1505_v33 = vmax.f32 %v1501_v19, %v1518_v16  ;;  %v1400_v22 = vmax.f32 %v1398_v43, %v1223_v11  ;;  %v1376_v44 = vmax.f32 %v1374_v23, %v1055_v55  ;;  %v1537_v41 = vunpack.c.l.s4 %v1828_v47 }
 0x14f   : > { %1291 = vst.msk [vmem:[%s2402_s30 + $0x198] sm:$0xff] %vm1240_vm1, %v1057_v28  ;;  %v1464_v20 = vsel %vm1240_vm1, %v1057_v28, -inf  ;;  %1347 = vst.msk [vmem:[%s2402_s30 + $0x358] sm:$0xff] %vm1240_vm1, %v1225_v51  ;;  %v1061_v5 = vadd.f32 %v1060_v6, %v3078_v58  ;;  %v1229_v53 = vadd.f32 %v1228_v45, %v662_v39  ;;  %v1520_v34 = vsel %vm1240_vm1, %v1225_v51, -inf }
 0x150   : > { %v1465_v18 = vmax.f32 %v1461_v8, %v1464_v20  ;;  %v1062_v27 = vpop.f32.mrf.mxu0  ;;  %v1230_v60 = vpop.f32.mrf.mxu1  ;;  %v1538_v51 = vunpack.c.0.s8 %v1537_v41  ;;  %v1540_v8 = vshrl.u32 %v1539_v3, 7  ;;  %vm1553_vm4 = vcmp.lt.s32.totalorder %v1539_v3, 144 }
 0x151   : > { %1292 = vst [vmem:[%s2402_s30 + $0x1a0] sm:$0xff] %v1061_v5  ;;  %v1377_v25 = vmax.f32 %v1375_v37, %v1061_v5  ;;  %1348 = vst [vmem:[%s2402_s30 + $0x360] sm:$0xff] %v1229_v53  ;;  %v1063_v4 = vadd.f32 %v1062_v27, %v3078_v58  ;;  %v1231_v9 = vadd.f32 %v1230_v60, %v662_v39 }
 0x152   : > { %v1509_v26 = vmax.f32 %v1505_v33, %v1465_v18  ;;  %v1066_v14 = vpop.f32.mrf.mxu0  ;;  %v1234_v56 = vpop.f32.mrf.mxu1  ;;  %v1541_v6 = vsub.s32 %v1538_v51, %v1540_v8 }
 0x153   : > { %v1402_v42 = vmax.f32 %v1400_v22, %v1377_v25  ;;  %1293 = vst.msk [vmem:[%s2402_s30 + $0x1a8] sm:$0xff] %vm1240_vm1, %v1063_v4  ;;  %v1466_v49 = vsel %vm1240_vm1, %v1063_v4, -inf  ;;  %1349 = vst.msk [vmem:[%s2402_s30 + $0x368] sm:$0xff] %vm1240_vm1, %v1231_v9  ;;  %v1067_v62 = vadd.f32 %v1066_v14, %v3079_v0  ;;  %v1235_v61 = vadd.f32 %v1234_v56, %v667_v21 }
 0x154   : > { %v1513_v54 = vmax.f32 %v1509_v26, %v1520_v34  ;;  %v1467_v32 = vmax.f32 %v1463_v13, %v1466_v49  ;;  %v1068_v52 = vpop.f32.mrf.mxu0  ;;  %v1236_v2 = vpop.f32.mrf.mxu1  ;;  %v1522_v29 = vsel %vm1240_vm1, %v1231_v9, -inf }
 0x155   : > { %v1404_v10 = vmax.f32 %v1402_v42, %v1229_v53  ;;  %1294 = vst [vmem:[%s2402_s30 + $0x1b0] sm:$0xff] %v1067_v62  ;;  %v1378_v35 = vmax.f32 %v1376_v44, %v1067_v62  ;;  %v1069_v59 = vadd.f32 %v1068_v52, %v3079_v0  ;;  %v1237_v12 = vadd.f32 %v1236_v2, %v667_v21 }
 0x156   : > { %v1517_v15 = vmax.f32 %v1513_v54, %v1467_v32  ;;  %1350 = vst [vmem:[%s2402_s30 + $0x370] sm:$0x1] %v1235_v61  ;;  %v1407_v40 = vsel %vm1406_vm2, %v1235_v61, -inf }
 0x157   : > { %v1408_v24 = vmax.f32 %v1404_v10, %v1378_v35  ;;  %1295 = vst.msk [vmem:[%s2402_s30 + $0x1b8] sm:$0xff] %vm1240_vm1, %v1069_v59  ;;  %v1468_v50 = vsel %vm1240_vm1, %v1069_v59, -inf  ;;  %v1524_v57 = vsel %vm1351_vm3, %v1237_v12, -inf }
 0x158   : > { %1352 = vst.msk [vmem:[%s2402_s30 + $0x378] sm:$0x1] %vm1351_vm3, %v1237_v12  ;;  %v1521_v30 = vmax.f32 %v1517_v15, %v1522_v29 }
 0x159   : > { %v1409_v1 = vmax.f32 %v1407_v40, %v1408_v24 }
 0x15a   : > { %v1525_v31 = vmax.f32 %v1521_v30, %v1468_v50 }
 0x15b   : > { %v1410_v36 = vrot.slane %v1409_v1, 4 }
 0x15c   : > { %v1526_v55 = vmax.f32 %v1524_v57, %v1525_v31 }
 0x15d   : > { %v1411_v11 = vmax.f32 %v1409_v1, %v1410_v36 }
 0x15e   : > { %v1527_v63 = vrot.slane %v1526_v55, 4 }
 0x15f   : > { %v1412_v46 = vrot.slane %v1411_v11, 2 }
 0x160   : > { %v1528_v17 = vmax.f32 %v1526_v55, %v1527_v63 }
 0x161   : > { %v1413_v39 = vmax.f32 %v1411_v11, %v1412_v46 }
 0x162   : > { %v1529_v7 = vrot.slane %v1528_v17, 2 }
 0x163   : > { %v1414_v16 = vrot.slane %v1413_v39, 1 }
 0x164   : > { %v1530_v28 = vmax.f32 %v1528_v17, %v1529_v7 }
 0x165   : > { %v1415_v37 = vmax.f32 %v1413_v39, %v1414_v16 }
 0x166   : > { %v1531_v19 = vrot.slane %v1530_v28, 1 }
 0x168   : > { %v1532_v43 = vmax.f32 %v1530_v28, %v1531_v19 }
 0x16a   : > { %v1535_v45 = vcombine.low %v1415_v37, %v1532_v43 }
 0x16c   : > { %v1542_v38 = vrot.slane %v1535_v45, %v1541_v6 }
 0x16e   : > { %v1549_v20 = vrot.slane %v1542_v38, %v1541_v6 }
 0x170   : > { %1555 = vst.msk [vmem:[%s257_s8] sm:$0x3] %vm1553_vm4, %v1549_v20 }
 0x171 PF: > { %s15_s17 = sadd.s32 1, %s1824_s17   ;;  %s3080_s15 = smov %s1820_s16 }
 0x172   : > { %p12_p5 = scmp.ge.s32.totalorder %s15_s17, 4   ;;  %s3081_s16 = smov %s3083_s18 }
 0x174   :  { %14 = sbr.rel (!%p12_p5) target bundleno = 2 (0x2), region = 74 }

// kernel: _lambda_.7
= control target key start
LH: loop header
LB: loop body
LE: loop exit
PB: predicated region body
PF: predicated region fallthrough
CT: control target
= control target key end

     0   :  { %s3198_s12 = smov 0   ;;  %s3200_s13 = smov 0   ;;  %s4493_s0 = inlined_call_operand.vmem [shape: f32[2,441,12,12], index: 0, kind: input, shape index: {}]   ;;  %s4494_s1 = inlined_call_operand.vmem [shape: f32[2,1,12,12], index: 1, kind: input, shape index: {}]   ;;  %s4495_s2 = inlined_call_operand.vmem [shape: f32[2,1,3,36,32], index: 2, kind: input, shape index: {}]   ;;  %s4496_s3 = inlined_call_operand.vmem [shape: f32[2,3,12,12], index: 3, kind: output, shape index: {}]  }
   0x1   :  { %s3202_s14 = smov 0   ;;  %s3204_s15 = smov 0  }
   0x2   :  { %s3206_s16 = smov 0   ;;  %s3208_s17 = smov 0  }
   0x3   :  { %s3210_s18 = smov 0  }
   0x4 LB: > { %s25_s19 = sadd.s32 1, %s3128_s16  ;;  %s32_s20 = sadd.s32 1, %s3132_s17  ;;  %s3136_s18 = sphi %s3210_s18, %s13_s18   ;;  %s3132_s17 = sphi %s3208_s17, %s4508_s17   ;;  %s3128_s16 = sphi %s3206_s16, %s4507_s16   ;;  %s3124_s15 = sphi %s3204_s15, %s4506_s15   ;;  %s3120_s14 = sphi %s3202_s14, %s4505_s14   ;;  %s3116_s13 = sphi %s3200_s13, %s4504_s13   ;;  %s3112_s12 = sphi %s3198_s12, %s4503_s12  }
   0x5   : > { %p26_p0 = scmp.ge.s32.totalorder %s25_s19, 2  ;;  %s2842_s21 = sadd.s32 4294967295, %s3136_s18  }
   0x6   : > { %p50_p1 = scmp.ne.s32.totalorder %s3116_s13, %s3112_s12  ;;  %p51_p2 = scmp.eq.s32.totalorder %s3136_s18, 0 }
   0x7   : > { %s4510_s19 = smov (%p26_p0, %s25_s19), 0  ;;  %s4512_s20 = smov (!%p26_p0, %s32_s20), %s3132_s17 }
   0x8   : > { %p34_p3 = scmp.ge.s32.totalorder %s4512_s20, 2  ;;  %p142_p4 = scmp.eq.s32.totalorder %s2842_s21, 3 }
   0x9   : > { %s37_s22 = ssub.s32 %s3128_s16, %s4510_s19  ;;  %p52_p5 = por %p51_p2, %p50_p1 }
   0xa   : > { %s4514_s20 = smov (%p34_p3, %s4512_s20), 0  ;;  %p3246_p6 = por %p142_p4, %p50_p1 }
   0xb   : > { %s36_s24 = ssub.s32 %s3132_s17, %s4514_s20  ;;  %s43_s26 = sadd.s32 1, %s3116_s13 }
   0xc   : > { %s38_s25 = sor.u32 %s37_s22, %s36_s24  ;;  %p2845_p8 = scmp.ge.s32.totalorder %s3136_s18, 4 }
   0xd   : > { %p41_p7 = scmp.eq.s32.totalorder %s38_s25, 0 }
   0xe   : > { %164 = sbr.rel (%p2845_p8) target bundleno = 247 (0xf7), region = 16 }
   0xf   : > { %s3254_s27 = scalar_select %p41_p7, %s3116_s13, %s43_s26  }
  0x13   : > { %167 = sbr.rel (!%p52_p5) target bundleno = 247 (0xf7), region = 20  ;;  %s169_s28 = sand.u32 (%p52_p5), 1, %s3116_s13  }
  0x14   : > { %s2897_s29 = smul.u32 (%p52_p5), 882, %s3132_s17 }
  0x15   : > { %s2896_s30 = smul.u32 (%p52_p5), 3528, %s169_s28 }
  0x16   : > { %s174_s4 = sadd.s32 (%p52_p5), %s3128_s16, %s2897_s29 }
  0x17   : > { %s2846_s5 = sshll.u32 (%p52_p5), %s174_s4, 3  ;;  %s3268_s9 = scalar_lea.vmem (%p52_p5), [#allocation2], %s2896_s30 }
  0x18   : > { %s3263_s8 = scalar_lea.vmem %s4493_s0, %s2846_s5 }
  0x19   : > { %v1085_v0 = vld [vmem:[%s3263_s8] sm:$0xff]  ;;  %v1087_v1 = vld [vmem:[%s3263_s8 + $0x10] sm:$0xff] }
  0x1a   : > { %v1089_v2 = vld [vmem:[%s3263_s8 + $0x20] sm:$0xff]  ;;  %1086 = vst [vmem:[%s3268_s9] sm:$0xff] %v1085_v0  ;;  %1088 = vst [vmem:[%s3268_s9 + $0x8] sm:$0xff] %v1087_v1  ;;  %v1091_v3 = vld [vmem:[%s3263_s8 + $0x30] sm:$0xff] }
  0x1b   : > { %1090 = vst [vmem:[%s3268_s9 + $0x10] sm:$0xff] %v1089_v2  ;;  %v1093_v4 = vld [vmem:[%s3263_s8 + $0x40] sm:$0xff]  ;;  %v1095_v5 = vld [vmem:[%s3263_s8 + $0x50] sm:$0xff]  ;;  %1092 = vst [vmem:[%s3268_s9 + $0x18] sm:$0xff] %v1091_v3 }
  0x1c   : > { %1094 = vst [vmem:[%s3268_s9 + $0x20] sm:$0xff] %v1093_v4  ;;  %1096 = vst [vmem:[%s3268_s9 + $0x28] sm:$0xff] %v1095_v5  ;;  %v1097_v6 = vld [vmem:[%s3263_s8 + $0x60] sm:$0xff]  ;;  %v1099_v7 = vld [vmem:[%s3263_s8 + $0x70] sm:$0xff] }
  0x1d   : > { %v1101_v8 = vld [vmem:[%s3263_s8 + $0x80] sm:$0xff]  ;;  %1098 = vst [vmem:[%s3268_s9 + $0x30] sm:$0xff] %v1097_v6  ;;  %1100 = vst [vmem:[%s3268_s9 + $0x38] sm:$0xff] %v1099_v7  ;;  %v1103_v9 = vld [vmem:[%s3263_s8 + $0x90] sm:$0xff] }
  0x1e   : > { %1102 = vst [vmem:[%s3268_s9 + $0x40] sm:$0xff] %v1101_v8  ;;  %v1105_v10 = vld [vmem:[%s3263_s8 + $0xa0] sm:$0xff]  ;;  %v1107_v11 = vld [vmem:[%s3263_s8 + $0xb0] sm:$0xff]  ;;  %1104 = vst [vmem:[%s3268_s9 + $0x48] sm:$0xff] %v1103_v9 }
  0x1f   : > { %1106 = vst [vmem:[%s3268_s9 + $0x50] sm:$0xff] %v1105_v10  ;;  %1108 = vst [vmem:[%s3268_s9 + $0x58] sm:$0xff] %v1107_v11  ;;  %v1109_v12 = vld [vmem:[%s3263_s8 + $0xc0] sm:$0xff]  ;;  %v1111_v13 = vld [vmem:[%s3263_s8 + $0xd0] sm:$0xff] }
  0x20   : > { %v1113_v14 = vld [vmem:[%s3263_s8 + $0xe0] sm:$0xff]  ;;  %1110 = vst [vmem:[%s3268_s9 + $0x60] sm:$0xff] %v1109_v12  ;;  %1112 = vst [vmem:[%s3268_s9 + $0x68] sm:$0xff] %v1111_v13  ;;  %v1115_v15 = vld [vmem:[%s3263_s8 + $0xf0] sm:$0xff] }
  0x21   : > { %1114 = vst [vmem:[%s3268_s9 + $0x70] sm:$0xff] %v1113_v14  ;;  %v1117_v16 = vld [vmem:[%s3263_s8 + $0x100] sm:$0xff]  ;;  %v1119_v17 = vld [vmem:[%s3263_s8 + $0x110] sm:$0xff]  ;;  %1116 = vst [vmem:[%s3268_s9 + $0x78] sm:$0xff] %v1115_v15 }
  0x22   : > { %1118 = vst [vmem:[%s3268_s9 + $0x80] sm:$0xff] %v1117_v16  ;;  %1120 = vst [vmem:[%s3268_s9 + $0x88] sm:$0xff] %v1119_v17  ;;  %v1121_v18 = vld [vmem:[%s3263_s8 + $0x120] sm:$0xff]  ;;  %v1123_v19 = vld [vmem:[%s3263_s8 + $0x130] sm:$0xff] }
  0x23   : > { %v1125_v20 = vld [vmem:[%s3263_s8 + $0x140] sm:$0xff]  ;;  %1122 = vst [vmem:[%s3268_s9 + $0x90] sm:$0xff] %v1121_v18  ;;  %1124 = vst [vmem:[%s3268_s9 + $0x98] sm:$0xff] %v1123_v19  ;;  %v1127_v21 = vld [vmem:[%s3263_s8 + $0x150] sm:$0xff] }
  0x24   : > { %1126 = vst [vmem:[%s3268_s9 + $0xa0] sm:$0xff] %v1125_v20  ;;  %v1129_v22 = vld [vmem:[%s3263_s8 + $0x160] sm:$0xff]  ;;  %v1131_v23 = vld [vmem:[%s3263_s8 + $0x170] sm:$0xff]  ;;  %1128 = vst [vmem:[%s3268_s9 + $0xa8] sm:$0xff] %v1127_v21 }
  0x25   : > { %1130 = vst [vmem:[%s3268_s9 + $0xb0] sm:$0xff] %v1129_v22  ;;  %1132 = vst [vmem:[%s3268_s9 + $0xb8] sm:$0xff] %v1131_v23  ;;  %v1133_v24 = vld [vmem:[%s3263_s8 + $0x180] sm:$0xff]  ;;  %v1135_v25 = vld [vmem:[%s3263_s8 + $0x190] sm:$0xff] }
  0x26   : > { %v1137_v26 = vld [vmem:[%s3263_s8 + $0x1a0] sm:$0xff]  ;;  %1134 = vst [vmem:[%s3268_s9 + $0xc0] sm:$0xff] %v1133_v24  ;;  %1136 = vst [vmem:[%s3268_s9 + $0xc8] sm:$0xff] %v1135_v25  ;;  %v1139_v27 = vld [vmem:[%s3263_s8 + $0x1b0] sm:$0xff] }
  0x27   : > { %1138 = vst [vmem:[%s3268_s9 + $0xd0] sm:$0xff] %v1137_v26  ;;  %v1141_v28 = vld [vmem:[%s3263_s8 + $0x1c0] sm:$0xff]  ;;  %v1143_v29 = vld [vmem:[%s3263_s8 + $0x1d0] sm:$0xff]  ;;  %1140 = vst [vmem:[%s3268_s9 + $0xd8] sm:$0xff] %v1139_v27 }
  0x28   : > { %1142 = vst [vmem:[%s3268_s9 + $0xe0] sm:$0xff] %v1141_v28  ;;  %1144 = vst [vmem:[%s3268_s9 + $0xe8] sm:$0xff] %v1143_v29  ;;  %v1145_v30 = vld [vmem:[%s3263_s8 + $0x1e0] sm:$0xff]  ;;  %v1147_v31 = vld [vmem:[%s3263_s8 + $0x1f0] sm:$0xff] }
  0x29   : > { %v1149_v32 = vld [vmem:[%s3263_s8 + $0x200] sm:$0xff]  ;;  %1146 = vst [vmem:[%s3268_s9 + $0xf0] sm:$0xff] %v1145_v30  ;;  %1148 = vst [vmem:[%s3268_s9 + $0xf8] sm:$0xff] %v1147_v31  ;;  %v1151_v33 = vld [vmem:[%s3263_s8 + $0x210] sm:$0xff] }
  0x2a   : > { %1150 = vst [vmem:[%s3268_s9 + $0x100] sm:$0xff] %v1149_v32  ;;  %v1153_v34 = vld [vmem:[%s3263_s8 + $0x220] sm:$0xff]  ;;  %v1155_v35 = vld [vmem:[%s3263_s8 + $0x230] sm:$0xff]  ;;  %1152 = vst [vmem:[%s3268_s9 + $0x108] sm:$0xff] %v1151_v33 }
  0x2b   : > { %1154 = vst [vmem:[%s3268_s9 + $0x110] sm:$0xff] %v1153_v34  ;;  %1156 = vst [vmem:[%s3268_s9 + $0x118] sm:$0xff] %v1155_v35  ;;  %v1157_v36 = vld [vmem:[%s3263_s8 + $0x240] sm:$0xff]  ;;  %v1159_v37 = vld [vmem:[%s3263_s8 + $0x250] sm:$0xff] }
  0x2c   : > { %v1161_v38 = vld [vmem:[%s3263_s8 + $0x260] sm:$0xff]  ;;  %1158 = vst [vmem:[%s3268_s9 + $0x120] sm:$0xff] %v1157_v36  ;;  %1160 = vst [vmem:[%s3268_s9 + $0x128] sm:$0xff] %v1159_v37  ;;  %v1163_v39 = vld [vmem:[%s3263_s8 + $0x270] sm:$0xff] }
  0x2d   : > { %1162 = vst [vmem:[%s3268_s9 + $0x130] sm:$0xff] %v1161_v38  ;;  %v1165_v40 = vld [vmem:[%s3263_s8 + $0x280] sm:$0xff]  ;;  %v1167_v41 = vld [vmem:[%s3263_s8 + $0x290] sm:$0xff]  ;;  %1164 = vst [vmem:[%s3268_s9 + $0x138] sm:$0xff] %v1163_v39 }
  0x2e   : > { %1166 = vst [vmem:[%s3268_s9 + $0x140] sm:$0xff] %v1165_v40  ;;  %1168 = vst [vmem:[%s3268_s9 + $0x148] sm:$0xff] %v1167_v41  ;;  %v1169_v42 = vld [vmem:[%s3263_s8 + $0x2a0] sm:$0xff]  ;;  %v1171_v43 = vld [vmem:[%s3263_s8 + $0x2b0] sm:$0xff] }
  0x2f   : > { %v1173_v44 = vld [vmem:[%s3263_s8 + $0x2c0] sm:$0xff]  ;;  %1170 = vst [vmem:[%s3268_s9 + $0x150] sm:$0xff] %v1169_v42  ;;  %1172 = vst [vmem:[%s3268_s9 + $0x158] sm:$0xff] %v1171_v43  ;;  %v1175_v45 = vld [vmem:[%s3263_s8 + $0x2d0] sm:$0xff] }
  0x30   : > { %1174 = vst [vmem:[%s3268_s9 + $0x160] sm:$0xff] %v1173_v44  ;;  %v1177_v46 = vld [vmem:[%s3263_s8 + $0x2e0] sm:$0xff]  ;;  %v1179_v47 = vld [vmem:[%s3263_s8 + $0x2f0] sm:$0xff]  ;;  %1176 = vst [vmem:[%s3268_s9 + $0x168] sm:$0xff] %v1175_v45 }
  0x31   : > { %1178 = vst [vmem:[%s3268_s9 + $0x170] sm:$0xff] %v1177_v46  ;;  %1180 = vst [vmem:[%s3268_s9 + $0x178] sm:$0xff] %v1179_v47  ;;  %v1181_v48 = vld [vmem:[%s3263_s8 + $0x300] sm:$0xff]  ;;  %v1183_v49 = vld [vmem:[%s3263_s8 + $0x310] sm:$0xff] }
  0x32   : > { %v1185_v50 = vld [vmem:[%s3263_s8 + $0x320] sm:$0xff]  ;;  %1182 = vst [vmem:[%s3268_s9 + $0x180] sm:$0xff] %v1181_v48  ;;  %1184 = vst [vmem:[%s3268_s9 + $0x188] sm:$0xff] %v1183_v49  ;;  %v1187_v51 = vld [vmem:[%s3263_s8 + $0x330] sm:$0xff] }
  0x33   : > { %1186 = vst [vmem:[%s3268_s9 + $0x190] sm:$0xff] %v1185_v50  ;;  %v1189_v52 = vld [vmem:[%s3263_s8 + $0x340] sm:$0xff]  ;;  %v1191_v53 = vld [vmem:[%s3263_s8 + $0x350] sm:$0xff]  ;;  %1188 = vst [vmem:[%s3268_s9 + $0x198] sm:$0xff] %v1187_v51 }
  0x34   : > { %1190 = vst [vmem:[%s3268_s9 + $0x1a0] sm:$0xff] %v1189_v52  ;;  %1192 = vst [vmem:[%s3268_s9 + $0x1a8] sm:$0xff] %v1191_v53  ;;  %v1193_v54 = vld [vmem:[%s3263_s8 + $0x360] sm:$0xff]  ;;  %v1195_v55 = vld [vmem:[%s3263_s8 + $0x370] sm:$0xff] }
  0x35   : > { %v1197_v56 = vld [vmem:[%s3263_s8 + $0x380] sm:$0xff]  ;;  %1194 = vst [vmem:[%s3268_s9 + $0x1b0] sm:$0xff] %v1193_v54  ;;  %1196 = vst [vmem:[%s3268_s9 + $0x1b8] sm:$0xff] %v1195_v55  ;;  %v1199_v57 = vld [vmem:[%s3263_s8 + $0x390] sm:$0xff] }
  0x36   : > { %1198 = vst [vmem:[%s3268_s9 + $0x1c0] sm:$0xff] %v1197_v56  ;;  %v1201_v58 = vld [vmem:[%s3263_s8 + $0x3a0] sm:$0xff]  ;;  %v1203_v59 = vld [vmem:[%s3263_s8 + $0x3b0] sm:$0xff]  ;;  %1200 = vst [vmem:[%s3268_s9 + $0x1c8] sm:$0xff] %v1199_v57 }
  0x37   : > { %1202 = vst [vmem:[%s3268_s9 + $0x1d0] sm:$0xff] %v1201_v58  ;;  %1204 = vst [vmem:[%s3268_s9 + $0x1d8] sm:$0xff] %v1203_v59  ;;  %v1205_v60 = vld [vmem:[%s3263_s8 + $0x3c0] sm:$0xff]  ;;  %v1207_v61 = vld [vmem:[%s3263_s8 + $0x3d0] sm:$0xff] }
  0x38   : > { %v1209_v62 = vld [vmem:[%s3263_s8 + $0x3e0] sm:$0xff]  ;;  %1206 = vst [vmem:[%s3268_s9 + $0x1e0] sm:$0xff] %v1205_v60  ;;  %1208 = vst [vmem:[%s3268_s9 + $0x1e8] sm:$0xff] %v1207_v61  ;;  %v1211_v63 = vld [vmem:[%s3263_s8 + $0x3f0] sm:$0xff] }
  0x39   : > { %1210 = vst [vmem:[%s3268_s9 + $0x1f0] sm:$0xff] %v1209_v62  ;;  %v1213_v0 = vld [vmem:[%s3263_s8 + $0x400] sm:$0xff]  ;;  %v1215_v1 = vld [vmem:[%s3263_s8 + $0x410] sm:$0xff]  ;;  %1212 = vst [vmem:[%s3268_s9 + $0x1f8] sm:$0xff] %v1211_v63 }
  0x3a   : > { %1214 = vst [vmem:[%s3268_s9 + $0x200] sm:$0xff] %v1213_v0  ;;  %1216 = vst [vmem:[%s3268_s9 + $0x208] sm:$0xff] %v1215_v1  ;;  %v1217_v2 = vld [vmem:[%s3263_s8 + $0x420] sm:$0xff]  ;;  %v1219_v3 = vld [vmem:[%s3263_s8 + $0x430] sm:$0xff] }
  0x3b   : > { %v1221_v4 = vld [vmem:[%s3263_s8 + $0x440] sm:$0xff]  ;;  %1218 = vst [vmem:[%s3268_s9 + $0x210] sm:$0xff] %v1217_v2  ;;  %1220 = vst [vmem:[%s3268_s9 + $0x218] sm:$0xff] %v1219_v3  ;;  %v1223_v5 = vld [vmem:[%s3263_s8 + $0x450] sm:$0xff] }
  0x3c   : > { %1222 = vst [vmem:[%s3268_s9 + $0x220] sm:$0xff] %v1221_v4  ;;  %v1225_v6 = vld [vmem:[%s3263_s8 + $0x460] sm:$0xff]  ;;  %v1227_v7 = vld [vmem:[%s3263_s8 + $0x470] sm:$0xff]  ;;  %1224 = vst [vmem:[%s3268_s9 + $0x228] sm:$0xff] %v1223_v5 }
  0x3d   : > { %1226 = vst [vmem:[%s3268_s9 + $0x230] sm:$0xff] %v1225_v6  ;;  %1228 = vst [vmem:[%s3268_s9 + $0x238] sm:$0xff] %v1227_v7  ;;  %v1229_v8 = vld [vmem:[%s3263_s8 + $0x480] sm:$0xff]  ;;  %v1231_v9 = vld [vmem:[%s3263_s8 + $0x490] sm:$0xff] }
  0x3e   : > { %v1233_v10 = vld [vmem:[%s3263_s8 + $0x4a0] sm:$0xff]  ;;  %1230 = vst [vmem:[%s3268_s9 + $0x240] sm:$0xff] %v1229_v8  ;;  %1232 = vst [vmem:[%s3268_s9 + $0x248] sm:$0xff] %v1231_v9  ;;  %v1235_v11 = vld [vmem:[%s3263_s8 + $0x4b0] sm:$0xff] }
  0x3f   : > { %1234 = vst [vmem:[%s3268_s9 + $0x250] sm:$0xff] %v1233_v10  ;;  %v1237_v12 = vld [vmem:[%s3263_s8 + $0x4c0] sm:$0xff]  ;;  %v1239_v13 = vld [vmem:[%s3263_s8 + $0x4d0] sm:$0xff]  ;;  %1236 = vst [vmem:[%s3268_s9 + $0x258] sm:$0xff] %v1235_v11 }
  0x40   : > { %1238 = vst [vmem:[%s3268_s9 + $0x260] sm:$0xff] %v1237_v12  ;;  %1240 = vst [vmem:[%s3268_s9 + $0x268] sm:$0xff] %v1239_v13  ;;  %v1241_v14 = vld [vmem:[%s3263_s8 + $0x4e0] sm:$0xff]  ;;  %v1243_v15 = vld [vmem:[%s3263_s8 + $0x4f0] sm:$0xff] }
  0x41   : > { %v1245_v16 = vld [vmem:[%s3263_s8 + $0x500] sm:$0xff]  ;;  %1242 = vst [vmem:[%s3268_s9 + $0x270] sm:$0xff] %v1241_v14  ;;  %1244 = vst [vmem:[%s3268_s9 + $0x278] sm:$0xff] %v1243_v15  ;;  %v1247_v17 = vld [vmem:[%s3263_s8 + $0x510] sm:$0xff] }
  0x42   : > { %1246 = vst [vmem:[%s3268_s9 + $0x280] sm:$0xff] %v1245_v16  ;;  %v1249_v18 = vld [vmem:[%s3263_s8 + $0x520] sm:$0xff]  ;;  %v1251_v19 = vld [vmem:[%s3263_s8 + $0x530] sm:$0xff]  ;;  %1248 = vst [vmem:[%s3268_s9 + $0x288] sm:$0xff] %v1247_v17 }
  0x43   : > { %1250 = vst [vmem:[%s3268_s9 + $0x290] sm:$0xff] %v1249_v18  ;;  %1252 = vst [vmem:[%s3268_s9 + $0x298] sm:$0xff] %v1251_v19  ;;  %v1253_v20 = vld [vmem:[%s3263_s8 + $0x540] sm:$0xff]  ;;  %v1255_v21 = vld [vmem:[%s3263_s8 + $0x550] sm:$0xff] }
  0x44   : > { %v1257_v22 = vld [vmem:[%s3263_s8 + $0x560] sm:$0xff]  ;;  %1254 = vst [vmem:[%s3268_s9 + $0x2a0] sm:$0xff] %v1253_v20  ;;  %1256 = vst [vmem:[%s3268_s9 + $0x2a8] sm:$0xff] %v1255_v21  ;;  %v1259_v23 = vld [vmem:[%s3263_s8 + $0x570] sm:$0xff] }
  0x45   : > { %1258 = vst [vmem:[%s3268_s9 + $0x2b0] sm:$0xff] %v1257_v22  ;;  %v1261_v24 = vld [vmem:[%s3263_s8 + $0x580] sm:$0xff]  ;;  %v1263_v25 = vld [vmem:[%s3263_s8 + $0x590] sm:$0xff]  ;;  %1260 = vst [vmem:[%s3268_s9 + $0x2b8] sm:$0xff] %v1259_v23 }
  0x46   : > { %1262 = vst [vmem:[%s3268_s9 + $0x2c0] sm:$0xff] %v1261_v24  ;;  %1264 = vst [vmem:[%s3268_s9 + $0x2c8] sm:$0xff] %v1263_v25  ;;  %v1265_v26 = vld [vmem:[%s3263_s8 + $0x5a0] sm:$0xff]  ;;  %v1267_v27 = vld [vmem:[%s3263_s8 + $0x5b0] sm:$0xff] }
  0x47   : > { %v1269_v28 = vld [vmem:[%s3263_s8 + $0x5c0] sm:$0xff]  ;;  %1266 = vst [vmem:[%s3268_s9 + $0x2d0] sm:$0xff] %v1265_v26  ;;  %1268 = vst [vmem:[%s3268_s9 + $0x2d8] sm:$0xff] %v1267_v27  ;;  %v1271_v29 = vld [vmem:[%s3263_s8 + $0x5d0] sm:$0xff] }
  0x48   : > { %1270 = vst [vmem:[%s3268_s9 + $0x2e0] sm:$0xff] %v1269_v28  ;;  %v1273_v30 = vld [vmem:[%s3263_s8 + $0x5e0] sm:$0xff]  ;;  %v1275_v31 = vld [vmem:[%s3263_s8 + $0x5f0] sm:$0xff]  ;;  %1272 = vst [vmem:[%s3268_s9 + $0x2e8] sm:$0xff] %v1271_v29 }
  0x49   : > { %1274 = vst [vmem:[%s3268_s9 + $0x2f0] sm:$0xff] %v1273_v30  ;;  %1276 = vst [vmem:[%s3268_s9 + $0x2f8] sm:$0xff] %v1275_v31  ;;  %v1277_v32 = vld [vmem:[%s3263_s8 + $0x600] sm:$0xff]  ;;  %v1279_v33 = vld [vmem:[%s3263_s8 + $0x610] sm:$0xff] }
  0x4a   : > { %v1281_v34 = vld [vmem:[%s3263_s8 + $0x620] sm:$0xff]  ;;  %1278 = vst [vmem:[%s3268_s9 + $0x300] sm:$0xff] %v1277_v32  ;;  %1280 = vst [vmem:[%s3268_s9 + $0x308] sm:$0xff] %v1279_v33  ;;  %v1283_v35 = vld [vmem:[%s3263_s8 + $0x630] sm:$0xff] }
  0x4b   : > { %1282 = vst [vmem:[%s3268_s9 + $0x310] sm:$0xff] %v1281_v34  ;;  %v1285_v36 = vld [vmem:[%s3263_s8 + $0x640] sm:$0xff]  ;;  %v1287_v37 = vld [vmem:[%s3263_s8 + $0x650] sm:$0xff]  ;;  %1284 = vst [vmem:[%s3268_s9 + $0x318] sm:$0xff] %v1283_v35 }
  0x4c   : > { %1286 = vst [vmem:[%s3268_s9 + $0x320] sm:$0xff] %v1285_v36  ;;  %1288 = vst [vmem:[%s3268_s9 + $0x328] sm:$0xff] %v1287_v37  ;;  %v1289_v38 = vld [vmem:[%s3263_s8 + $0x660] sm:$0xff]  ;;  %v1291_v39 = vld [vmem:[%s3263_s8 + $0x670] sm:$0xff] }
  0x4d   : > { %v1293_v40 = vld [vmem:[%s3263_s8 + $0x680] sm:$0xff]  ;;  %1290 = vst [vmem:[%s3268_s9 + $0x330] sm:$0xff] %v1289_v38  ;;  %1292 = vst [vmem:[%s3268_s9 + $0x338] sm:$0xff] %v1291_v39  ;;  %v1295_v41 = vld [vmem:[%s3263_s8 + $0x690] sm:$0xff] }
  0x4e   : > { %1294 = vst [vmem:[%s3268_s9 + $0x340] sm:$0xff] %v1293_v40  ;;  %v1297_v42 = vld [vmem:[%s3263_s8 + $0x6a0] sm:$0xff]  ;;  %v1299_v43 = vld [vmem:[%s3263_s8 + $0x6b0] sm:$0xff]  ;;  %1296 = vst [vmem:[%s3268_s9 + $0x348] sm:$0xff] %v1295_v41 }
  0x4f   : > { %1298 = vst [vmem:[%s3268_s9 + $0x350] sm:$0xff] %v1297_v42  ;;  %1300 = vst [vmem:[%s3268_s9 + $0x358] sm:$0xff] %v1299_v43  ;;  %v1301_v44 = vld [vmem:[%s3263_s8 + $0x6c0] sm:$0xff]  ;;  %v1303_v45 = vld [vmem:[%s3263_s8 + $0x6d0] sm:$0xff] }
  0x50   : > { %v1305_v46 = vld [vmem:[%s3263_s8 + $0x6e0] sm:$0xff]  ;;  %1302 = vst [vmem:[%s3268_s9 + $0x360] sm:$0xff] %v1301_v44  ;;  %1304 = vst [vmem:[%s3268_s9 + $0x368] sm:$0xff] %v1303_v45  ;;  %v1307_v47 = vld [vmem:[%s3263_s8 + $0x6f0] sm:$0xff] }
  0x51   : > { %1306 = vst [vmem:[%s3268_s9 + $0x370] sm:$0xff] %v1305_v46  ;;  %v1309_v48 = vld [vmem:[%s3263_s8 + $0x700] sm:$0xff]  ;;  %v1311_v49 = vld [vmem:[%s3263_s8 + $0x710] sm:$0xff]  ;;  %1308 = vst [vmem:[%s3268_s9 + $0x378] sm:$0xff] %v1307_v47 }
  0x52   : > { %1310 = vst [vmem:[%s3268_s9 + $0x380] sm:$0xff] %v1309_v48  ;;  %1312 = vst [vmem:[%s3268_s9 + $0x388] sm:$0xff] %v1311_v49  ;;  %v1313_v50 = vld [vmem:[%s3263_s8 + $0x720] sm:$0xff]  ;;  %v1315_v51 = vld [vmem:[%s3263_s8 + $0x730] sm:$0xff] }
  0x53   : > { %v1317_v52 = vld [vmem:[%s3263_s8 + $0x740] sm:$0xff]  ;;  %1314 = vst [vmem:[%s3268_s9 + $0x390] sm:$0xff] %v1313_v50  ;;  %1316 = vst [vmem:[%s3268_s9 + $0x398] sm:$0xff] %v1315_v51  ;;  %v1319_v53 = vld [vmem:[%s3263_s8 + $0x750] sm:$0xff] }
  0x54   : > { %1318 = vst [vmem:[%s3268_s9 + $0x3a0] sm:$0xff] %v1317_v52  ;;  %v1321_v54 = vld [vmem:[%s3263_s8 + $0x760] sm:$0xff]  ;;  %v1323_v55 = vld [vmem:[%s3263_s8 + $0x770] sm:$0xff]  ;;  %1320 = vst [vmem:[%s3268_s9 + $0x3a8] sm:$0xff] %v1319_v53 }
  0x55   : > { %1322 = vst [vmem:[%s3268_s9 + $0x3b0] sm:$0xff] %v1321_v54  ;;  %1324 = vst [vmem:[%s3268_s9 + $0x3b8] sm:$0xff] %v1323_v55  ;;  %v1325_v56 = vld [vmem:[%s3263_s8 + $0x780] sm:$0xff]  ;;  %v1327_v57 = vld [vmem:[%s3263_s8 + $0x790] sm:$0xff] }
  0x56   : > { %v1329_v58 = vld [vmem:[%s3263_s8 + $0x7a0] sm:$0xff]  ;;  %1326 = vst [vmem:[%s3268_s9 + $0x3c0] sm:$0xff] %v1325_v56  ;;  %1328 = vst [vmem:[%s3268_s9 + $0x3c8] sm:$0xff] %v1327_v57  ;;  %v1331_v59 = vld [vmem:[%s3263_s8 + $0x7b0] sm:$0xff] }
  0x57   : > { %1330 = vst [vmem:[%s3268_s9 + $0x3d0] sm:$0xff] %v1329_v58  ;;  %v1333_v60 = vld [vmem:[%s3263_s8 + $0x7c0] sm:$0xff]  ;;  %v1335_v61 = vld [vmem:[%s3263_s8 + $0x7d0] sm:$0xff]  ;;  %1332 = vst [vmem:[%s3268_s9 + $0x3d8] sm:$0xff] %v1331_v59 }
  0x58   : > { %1334 = vst [vmem:[%s3268_s9 + $0x3e0] sm:$0xff] %v1333_v60  ;;  %1336 = vst [vmem:[%s3268_s9 + $0x3e8] sm:$0xff] %v1335_v61  ;;  %v1337_v62 = vld [vmem:[%s3263_s8 + $0x7e0] sm:$0xff]  ;;  %v1339_v63 = vld [vmem:[%s3263_s8 + $0x7f0] sm:$0xff] }
  0x59   : > { %v1341_v0 = vld [vmem:[%s3263_s8 + $0x800] sm:$0xff]  ;;  %1338 = vst [vmem:[%s3268_s9 + $0x3f0] sm:$0xff] %v1337_v62  ;;  %1340 = vst [vmem:[%s3268_s9 + $0x3f8] sm:$0xff] %v1339_v63  ;;  %v1343_v1 = vld [vmem:[%s3263_s8 + $0x810] sm:$0xff] }
  0x5a   : > { %1342 = vst [vmem:[%s3268_s9 + $0x400] sm:$0xff] %v1341_v0  ;;  %v1345_v2 = vld [vmem:[%s3263_s8 + $0x820] sm:$0xff]  ;;  %v1347_v3 = vld [vmem:[%s3263_s8 + $0x830] sm:$0xff]  ;;  %1344 = vst [vmem:[%s3268_s9 + $0x408] sm:$0xff] %v1343_v1 }
  0x5b   : > { %1346 = vst [vmem:[%s3268_s9 + $0x410] sm:$0xff] %v1345_v2  ;;  %1348 = vst [vmem:[%s3268_s9 + $0x418] sm:$0xff] %v1347_v3  ;;  %v1349_v4 = vld [vmem:[%s3263_s8 + $0x840] sm:$0xff]  ;;  %v1351_v5 = vld [vmem:[%s3263_s8 + $0x850] sm:$0xff] }
  0x5c   : > { %v1353_v6 = vld [vmem:[%s3263_s8 + $0x860] sm:$0xff]  ;;  %1350 = vst [vmem:[%s3268_s9 + $0x420] sm:$0xff] %v1349_v4  ;;  %1352 = vst [vmem:[%s3268_s9 + $0x428] sm:$0xff] %v1351_v5  ;;  %v1355_v7 = vld [vmem:[%s3263_s8 + $0x870] sm:$0xff] }
  0x5d   : > { %1354 = vst [vmem:[%s3268_s9 + $0x430] sm:$0xff] %v1353_v6  ;;  %v1357_v8 = vld [vmem:[%s3263_s8 + $0x880] sm:$0xff]  ;;  %v1359_v9 = vld [vmem:[%s3263_s8 + $0x890] sm:$0xff]  ;;  %1356 = vst [vmem:[%s3268_s9 + $0x438] sm:$0xff] %v1355_v7 }
  0x5e   : > { %1358 = vst [vmem:[%s3268_s9 + $0x440] sm:$0xff] %v1357_v8  ;;  %1360 = vst [vmem:[%s3268_s9 + $0x448] sm:$0xff] %v1359_v9  ;;  %v1361_v10 = vld [vmem:[%s3263_s8 + $0x8a0] sm:$0xff]  ;;  %v1363_v11 = vld [vmem:[%s3263_s8 + $0x8b0] sm:$0xff] }
  0x5f   : > { %v1365_v12 = vld [vmem:[%s3263_s8 + $0x8c0] sm:$0xff]  ;;  %1362 = vst [vmem:[%s3268_s9 + $0x450] sm:$0xff] %v1361_v10  ;;  %1364 = vst [vmem:[%s3268_s9 + $0x458] sm:$0xff] %v1363_v11  ;;  %v1367_v13 = vld [vmem:[%s3263_s8 + $0x8d0] sm:$0xff] }
  0x60   : > { %1366 = vst [vmem:[%s3268_s9 + $0x460] sm:$0xff] %v1365_v12  ;;  %v1369_v14 = vld [vmem:[%s3263_s8 + $0x8e0] sm:$0xff]  ;;  %v1371_v15 = vld [vmem:[%s3263_s8 + $0x8f0] sm:$0xff]  ;;  %1368 = vst [vmem:[%s3268_s9 + $0x468] sm:$0xff] %v1367_v13 }
  0x61   : > { %1370 = vst [vmem:[%s3268_s9 + $0x470] sm:$0xff] %v1369_v14  ;;  %1372 = vst [vmem:[%s3268_s9 + $0x478] sm:$0xff] %v1371_v15  ;;  %v1373_v16 = vld [vmem:[%s3263_s8 + $0x900] sm:$0xff]  ;;  %v1375_v17 = vld [vmem:[%s3263_s8 + $0x910] sm:$0xff] }
  0x62   : > { %v1377_v18 = vld [vmem:[%s3263_s8 + $0x920] sm:$0xff]  ;;  %1374 = vst [vmem:[%s3268_s9 + $0x480] sm:$0xff] %v1373_v16  ;;  %1376 = vst [vmem:[%s3268_s9 + $0x488] sm:$0xff] %v1375_v17  ;;  %v1379_v19 = vld [vmem:[%s3263_s8 + $0x930] sm:$0xff] }
  0x63   : > { %1378 = vst [vmem:[%s3268_s9 + $0x490] sm:$0xff] %v1377_v18  ;;  %v1381_v20 = vld [vmem:[%s3263_s8 + $0x940] sm:$0xff]  ;;  %v1383_v21 = vld [vmem:[%s3263_s8 + $0x950] sm:$0xff]  ;;  %1380 = vst [vmem:[%s3268_s9 + $0x498] sm:$0xff] %v1379_v19 }
  0x64   : > { %1382 = vst [vmem:[%s3268_s9 + $0x4a0] sm:$0xff] %v1381_v20  ;;  %1384 = vst [vmem:[%s3268_s9 + $0x4a8] sm:$0xff] %v1383_v21  ;;  %v1385_v22 = vld [vmem:[%s3263_s8 + $0x960] sm:$0xff]  ;;  %v1387_v23 = vld [vmem:[%s3263_s8 + $0x970] sm:$0xff] }
  0x65   : > { %v1389_v24 = vld [vmem:[%s3263_s8 + $0x980] sm:$0xff]  ;;  %1386 = vst [vmem:[%s3268_s9 + $0x4b0] sm:$0xff] %v1385_v22  ;;  %1388 = vst [vmem:[%s3268_s9 + $0x4b8] sm:$0xff] %v1387_v23  ;;  %v1391_v25 = vld [vmem:[%s3263_s8 + $0x990] sm:$0xff] }
  0x66   : > { %1390 = vst [vmem:[%s3268_s9 + $0x4c0] sm:$0xff] %v1389_v24  ;;  %v1393_v26 = vld [vmem:[%s3263_s8 + $0x9a0] sm:$0xff]  ;;  %v1395_v27 = vld [vmem:[%s3263_s8 + $0x9b0] sm:$0xff]  ;;  %1392 = vst [vmem:[%s3268_s9 + $0x4c8] sm:$0xff] %v1391_v25 }
  0x67   : > { %1394 = vst [vmem:[%s3268_s9 + $0x4d0] sm:$0xff] %v1393_v26  ;;  %1396 = vst [vmem:[%s3268_s9 + $0x4d8] sm:$0xff] %v1395_v27  ;;  %v1397_v28 = vld [vmem:[%s3263_s8 + $0x9c0] sm:$0xff]  ;;  %v1399_v29 = vld [vmem:[%s3263_s8 + $0x9d0] sm:$0xff] }
  0x68   : > { %v1401_v30 = vld [vmem:[%s3263_s8 + $0x9e0] sm:$0xff]  ;;  %1398 = vst [vmem:[%s3268_s9 + $0x4e0] sm:$0xff] %v1397_v28  ;;  %1400 = vst [vmem:[%s3268_s9 + $0x4e8] sm:$0xff] %v1399_v29  ;;  %v1403_v31 = vld [vmem:[%s3263_s8 + $0x9f0] sm:$0xff] }
  0x69   : > { %1402 = vst [vmem:[%s3268_s9 + $0x4f0] sm:$0xff] %v1401_v30  ;;  %v1405_v32 = vld [vmem:[%s3263_s8 + $0xa00] sm:$0xff]  ;;  %v1407_v33 = vld [vmem:[%s3263_s8 + $0xa10] sm:$0xff]  ;;  %1404 = vst [vmem:[%s3268_s9 + $0x4f8] sm:$0xff] %v1403_v31 }
  0x6a   : > { %1406 = vst [vmem:[%s3268_s9 + $0x500] sm:$0xff] %v1405_v32  ;;  %1408 = vst [vmem:[%s3268_s9 + $0x508] sm:$0xff] %v1407_v33  ;;  %v1409_v34 = vld [vmem:[%s3263_s8 + $0xa20] sm:$0xff]  ;;  %v1411_v35 = vld [vmem:[%s3263_s8 + $0xa30] sm:$0xff] }
  0x6b   : > { %v1413_v36 = vld [vmem:[%s3263_s8 + $0xa40] sm:$0xff]  ;;  %1410 = vst [vmem:[%s3268_s9 + $0x510] sm:$0xff] %v1409_v34  ;;  %1412 = vst [vmem:[%s3268_s9 + $0x518] sm:$0xff] %v1411_v35  ;;  %v1415_v37 = vld [vmem:[%s3263_s8 + $0xa50] sm:$0xff] }
  0x6c   : > { %1414 = vst [vmem:[%s3268_s9 + $0x520] sm:$0xff] %v1413_v36  ;;  %v1417_v38 = vld [vmem:[%s3263_s8 + $0xa60] sm:$0xff]  ;;  %v1419_v39 = vld [vmem:[%s3263_s8 + $0xa70] sm:$0xff]  ;;  %1416 = vst [vmem:[%s3268_s9 + $0x528] sm:$0xff] %v1415_v37 }
  0x6d   : > { %1418 = vst [vmem:[%s3268_s9 + $0x530] sm:$0xff] %v1417_v38  ;;  %1420 = vst [vmem:[%s3268_s9 + $0x538] sm:$0xff] %v1419_v39  ;;  %v1421_v40 = vld [vmem:[%s3263_s8 + $0xa80] sm:$0xff]  ;;  %v1423_v41 = vld [vmem:[%s3263_s8 + $0xa90] sm:$0xff] }
  0x6e   : > { %v1425_v42 = vld [vmem:[%s3263_s8 + $0xaa0] sm:$0xff]  ;;  %1422 = vst [vmem:[%s3268_s9 + $0x540] sm:$0xff] %v1421_v40  ;;  %1424 = vst [vmem:[%s3268_s9 + $0x548] sm:$0xff] %v1423_v41  ;;  %v1427_v43 = vld [vmem:[%s3263_s8 + $0xab0] sm:$0xff] }
  0x6f   : > { %1426 = vst [vmem:[%s3268_s9 + $0x550] sm:$0xff] %v1425_v42  ;;  %v1429_v44 = vld [vmem:[%s3263_s8 + $0xac0] sm:$0xff]  ;;  %v1431_v45 = vld [vmem:[%s3263_s8 + $0xad0] sm:$0xff]  ;;  %1428 = vst [vmem:[%s3268_s9 + $0x558] sm:$0xff] %v1427_v43 }
  0x70   : > { %1430 = vst [vmem:[%s3268_s9 + $0x560] sm:$0xff] %v1429_v44  ;;  %1432 = vst [vmem:[%s3268_s9 + $0x568] sm:$0xff] %v1431_v45  ;;  %v1433_v46 = vld [vmem:[%s3263_s8 + $0xae0] sm:$0xff]  ;;  %v1435_v47 = vld [vmem:[%s3263_s8 + $0xaf0] sm:$0xff] }
  0x71   : > { %v1437_v48 = vld [vmem:[%s3263_s8 + $0xb00] sm:$0xff]  ;;  %1434 = vst [vmem:[%s3268_s9 + $0x570] sm:$0xff] %v1433_v46  ;;  %1436 = vst [vmem:[%s3268_s9 + $0x578] sm:$0xff] %v1435_v47  ;;  %v1439_v49 = vld [vmem:[%s3263_s8 + $0xb10] sm:$0xff] }
  0x72   : > { %1438 = vst [vmem:[%s3268_s9 + $0x580] sm:$0xff] %v1437_v48  ;;  %v1441_v50 = vld [vmem:[%s3263_s8 + $0xb20] sm:$0xff]  ;;  %v1443_v51 = vld [vmem:[%s3263_s8 + $0xb30] sm:$0xff]  ;;  %1440 = vst [vmem:[%s3268_s9 + $0x588] sm:$0xff] %v1439_v49 }
  0x73   : > { %1442 = vst [vmem:[%s3268_s9 + $0x590] sm:$0xff] %v1441_v50  ;;  %1444 = vst [vmem:[%s3268_s9 + $0x598] sm:$0xff] %v1443_v51  ;;  %v1445_v52 = vld [vmem:[%s3263_s8 + $0xb40] sm:$0xff]  ;;  %v1447_v53 = vld [vmem:[%s3263_s8 + $0xb50] sm:$0xff] }
  0x74   : > { %v1449_v54 = vld [vmem:[%s3263_s8 + $0xb60] sm:$0xff]  ;;  %1446 = vst [vmem:[%s3268_s9 + $0x5a0] sm:$0xff] %v1445_v52  ;;  %1448 = vst [vmem:[%s3268_s9 + $0x5a8] sm:$0xff] %v1447_v53  ;;  %v1451_v55 = vld [vmem:[%s3263_s8 + $0xb70] sm:$0xff] }
  0x75   : > { %1450 = vst [vmem:[%s3268_s9 + $0x5b0] sm:$0xff] %v1449_v54  ;;  %v1453_v56 = vld [vmem:[%s3263_s8 + $0xb80] sm:$0xff]  ;;  %v1455_v57 = vld [vmem:[%s3263_s8 + $0xb90] sm:$0xff]  ;;  %1452 = vst [vmem:[%s3268_s9 + $0x5b8] sm:$0xff] %v1451_v55 }
  0x76   : > { %1454 = vst [vmem:[%s3268_s9 + $0x5c0] sm:$0xff] %v1453_v56  ;;  %1456 = vst [vmem:[%s3268_s9 + $0x5c8] sm:$0xff] %v1455_v57  ;;  %v1457_v58 = vld [vmem:[%s3263_s8 + $0xba0] sm:$0xff]  ;;  %v1459_v59 = vld [vmem:[%s3263_s8 + $0xbb0] sm:$0xff] }
  0x77   : > { %v1461_v60 = vld [vmem:[%s3263_s8 + $0xbc0] sm:$0xff]  ;;  %1458 = vst [vmem:[%s3268_s9 + $0x5d0] sm:$0xff] %v1457_v58  ;;  %1460 = vst [vmem:[%s3268_s9 + $0x5d8] sm:$0xff] %v1459_v59  ;;  %v1463_v61 = vld [vmem:[%s3263_s8 + $0xbd0] sm:$0xff] }
  0x78   : > { %1462 = vst [vmem:[%s3268_s9 + $0x5e0] sm:$0xff] %v1461_v60  ;;  %v1465_v62 = vld [vmem:[%s3263_s8 + $0xbe0] sm:$0xff]  ;;  %v1467_v63 = vld [vmem:[%s3263_s8 + $0xbf0] sm:$0xff]  ;;  %1464 = vst [vmem:[%s3268_s9 + $0x5e8] sm:$0xff] %v1463_v61 }
  0x79   : > { %1466 = vst [vmem:[%s3268_s9 + $0x5f0] sm:$0xff] %v1465_v62  ;;  %1468 = vst [vmem:[%s3268_s9 + $0x5f8] sm:$0xff] %v1467_v63  ;;  %v1469_v0 = vld [vmem:[%s3263_s8 + $0xc00] sm:$0xff]  ;;  %v1471_v1 = vld [vmem:[%s3263_s8 + $0xc10] sm:$0xff] }
  0x7a   : > { %v1473_v2 = vld [vmem:[%s3263_s8 + $0xc20] sm:$0xff]  ;;  %1470 = vst [vmem:[%s3268_s9 + $0x600] sm:$0xff] %v1469_v0  ;;  %1472 = vst [vmem:[%s3268_s9 + $0x608] sm:$0xff] %v1471_v1  ;;  %v1475_v3 = vld [vmem:[%s3263_s8 + $0xc30] sm:$0xff] }
  0x7b   : > { %1474 = vst [vmem:[%s3268_s9 + $0x610] sm:$0xff] %v1473_v2  ;;  %v1477_v4 = vld [vmem:[%s3263_s8 + $0xc40] sm:$0xff]  ;;  %v1479_v5 = vld [vmem:[%s3263_s8 + $0xc50] sm:$0xff]  ;;  %1476 = vst [vmem:[%s3268_s9 + $0x618] sm:$0xff] %v1475_v3 }
  0x7c   : > { %1478 = vst [vmem:[%s3268_s9 + $0x620] sm:$0xff] %v1477_v4  ;;  %1480 = vst [vmem:[%s3268_s9 + $0x628] sm:$0xff] %v1479_v5  ;;  %v1481_v6 = vld [vmem:[%s3263_s8 + $0xc60] sm:$0xff]  ;;  %v1483_v7 = vld [vmem:[%s3263_s8 + $0xc70] sm:$0xff] }
  0x7d   : > { %v1485_v8 = vld [vmem:[%s3263_s8 + $0xc80] sm:$0xff]  ;;  %1482 = vst [vmem:[%s3268_s9 + $0x630] sm:$0xff] %v1481_v6  ;;  %1484 = vst [vmem:[%s3268_s9 + $0x638] sm:$0xff] %v1483_v7  ;;  %v1487_v9 = vld [vmem:[%s3263_s8 + $0xc90] sm:$0xff] }
  0x7e   : > { %1486 = vst [vmem:[%s3268_s9 + $0x640] sm:$0xff] %v1485_v8  ;;  %v1489_v10 = vld [vmem:[%s3263_s8 + $0xca0] sm:$0xff]  ;;  %v1491_v11 = vld [vmem:[%s3263_s8 + $0xcb0] sm:$0xff]  ;;  %1488 = vst [vmem:[%s3268_s9 + $0x648] sm:$0xff] %v1487_v9 }
  0x7f   : > { %1490 = vst [vmem:[%s3268_s9 + $0x650] sm:$0xff] %v1489_v10  ;;  %1492 = vst [vmem:[%s3268_s9 + $0x658] sm:$0xff] %v1491_v11  ;;  %v1493_v12 = vld [vmem:[%s3263_s8 + $0xcc0] sm:$0xff]  ;;  %v1495_v13 = vld [vmem:[%s3263_s8 + $0xcd0] sm:$0xff] }
  0x80   : > { %v1497_v14 = vld [vmem:[%s3263_s8 + $0xce0] sm:$0xff]  ;;  %1494 = vst [vmem:[%s3268_s9 + $0x660] sm:$0xff] %v1493_v12  ;;  %1496 = vst [vmem:[%s3268_s9 + $0x668] sm:$0xff] %v1495_v13  ;;  %v1499_v15 = vld [vmem:[%s3263_s8 + $0xcf0] sm:$0xff] }
  0x81   : > { %1498 = vst [vmem:[%s3268_s9 + $0x670] sm:$0xff] %v1497_v14  ;;  %v1501_v16 = vld [vmem:[%s3263_s8 + $0xd00] sm:$0xff]  ;;  %v1503_v17 = vld [vmem:[%s3263_s8 + $0xd10] sm:$0xff]  ;;  %1500 = vst [vmem:[%s3268_s9 + $0x678] sm:$0xff] %v1499_v15 }
  0x82   : > { %1502 = vst [vmem:[%s3268_s9 + $0x680] sm:$0xff] %v1501_v16  ;;  %1504 = vst [vmem:[%s3268_s9 + $0x688] sm:$0xff] %v1503_v17  ;;  %v1505_v18 = vld [vmem:[%s3263_s8 + $0xd20] sm:$0xff]  ;;  %v1507_v19 = vld [vmem:[%s3263_s8 + $0xd30] sm:$0xff] }
  0x83   : > { %v1509_v20 = vld [vmem:[%s3263_s8 + $0xd40] sm:$0xff]  ;;  %1506 = vst [vmem:[%s3268_s9 + $0x690] sm:$0xff] %v1505_v18  ;;  %1508 = vst [vmem:[%s3268_s9 + $0x698] sm:$0xff] %v1507_v19  ;;  %v1511_v21 = vld [vmem:[%s3263_s8 + $0xd50] sm:$0xff] }
  0x84   : > { %1510 = vst [vmem:[%s3268_s9 + $0x6a0] sm:$0xff] %v1509_v20  ;;  %v1513_v22 = vld [vmem:[%s3263_s8 + $0xd60] sm:$0xff]  ;;  %v1515_v23 = vld [vmem:[%s3263_s8 + $0xd70] sm:$0xff]  ;;  %1512 = vst [vmem:[%s3268_s9 + $0x6a8] sm:$0xff] %v1511_v21 }
  0x85   : > { %1514 = vst [vmem:[%s3268_s9 + $0x6b0] sm:$0xff] %v1513_v22  ;;  %1516 = vst [vmem:[%s3268_s9 + $0x6b8] sm:$0xff] %v1515_v23  ;;  %v1517_v24 = vld [vmem:[%s3263_s8 + $0xd80] sm:$0xff]  ;;  %v1519_v25 = vld [vmem:[%s3263_s8 + $0xd90] sm:$0xff] }
  0x86   : > { %v1521_v26 = vld [vmem:[%s3263_s8 + $0xda0] sm:$0xff]  ;;  %1518 = vst [vmem:[%s3268_s9 + $0x6c0] sm:$0xff] %v1517_v24  ;;  %1520 = vst [vmem:[%s3268_s9 + $0x6c8] sm:$0xff] %v1519_v25  ;;  %v1523_v27 = vld [vmem:[%s3263_s8 + $0xdb0] sm:$0xff] }
  0x87   : > { %1522 = vst [vmem:[%s3268_s9 + $0x6d0] sm:$0xff] %v1521_v26  ;;  %v1525_v28 = vld [vmem:[%s3263_s8 + $0xdc0] sm:$0xff]  ;;  %v1527_v29 = vld [vmem:[%s3263_s8 + $0xdd0] sm:$0xff]  ;;  %1524 = vst [vmem:[%s3268_s9 + $0x6d8] sm:$0xff] %v1523_v27 }
  0x88   : > { %1526 = vst [vmem:[%s3268_s9 + $0x6e0] sm:$0xff] %v1525_v28  ;;  %1528 = vst [vmem:[%s3268_s9 + $0x6e8] sm:$0xff] %v1527_v29  ;;  %v1529_v30 = vld [vmem:[%s3263_s8 + $0xde0] sm:$0xff]  ;;  %v1531_v31 = vld [vmem:[%s3263_s8 + $0xdf0] sm:$0xff] }
  0x89   : > { %v1533_v32 = vld [vmem:[%s3263_s8 + $0xe00] sm:$0xff]  ;;  %1530 = vst [vmem:[%s3268_s9 + $0x6f0] sm:$0xff] %v1529_v30  ;;  %1532 = vst [vmem:[%s3268_s9 + $0x6f8] sm:$0xff] %v1531_v31  ;;  %v1535_v33 = vld [vmem:[%s3263_s8 + $0xe10] sm:$0xff] }
  0x8a   : > { %1534 = vst [vmem:[%s3268_s9 + $0x700] sm:$0xff] %v1533_v32  ;;  %v1537_v34 = vld [vmem:[%s3263_s8 + $0xe20] sm:$0xff]  ;;  %v1539_v35 = vld [vmem:[%s3263_s8 + $0xe30] sm:$0xff]  ;;  %1536 = vst [vmem:[%s3268_s9 + $0x708] sm:$0xff] %v1535_v33 }
  0x8b   : > { %1538 = vst [vmem:[%s3268_s9 + $0x710] sm:$0xff] %v1537_v34  ;;  %1540 = vst [vmem:[%s3268_s9 + $0x718] sm:$0xff] %v1539_v35  ;;  %v1541_v36 = vld [vmem:[%s3263_s8 + $0xe40] sm:$0xff]  ;;  %v1543_v37 = vld [vmem:[%s3263_s8 + $0xe50] sm:$0xff] }
  0x8c   : > { %v1545_v38 = vld [vmem:[%s3263_s8 + $0xe60] sm:$0xff]  ;;  %1542 = vst [vmem:[%s3268_s9 + $0x720] sm:$0xff] %v1541_v36  ;;  %1544 = vst [vmem:[%s3268_s9 + $0x728] sm:$0xff] %v1543_v37  ;;  %v1547_v39 = vld [vmem:[%s3263_s8 + $0xe70] sm:$0xff] }
  0x8d   : > { %1546 = vst [vmem:[%s3268_s9 + $0x730] sm:$0xff] %v1545_v38  ;;  %v1549_v40 = vld [vmem:[%s3263_s8 + $0xe80] sm:$0xff]  ;;  %v1551_v41 = vld [vmem:[%s3263_s8 + $0xe90] sm:$0xff]  ;;  %1548 = vst [vmem:[%s3268_s9 + $0x738] sm:$0xff] %v1547_v39 }
  0x8e   : > { %1550 = vst [vmem:[%s3268_s9 + $0x740] sm:$0xff] %v1549_v40  ;;  %1552 = vst [vmem:[%s3268_s9 + $0x748] sm:$0xff] %v1551_v41  ;;  %v1553_v42 = vld [vmem:[%s3263_s8 + $0xea0] sm:$0xff]  ;;  %v1555_v43 = vld [vmem:[%s3263_s8 + $0xeb0] sm:$0xff] }
  0x8f   : > { %v1557_v44 = vld [vmem:[%s3263_s8 + $0xec0] sm:$0xff]  ;;  %1554 = vst [vmem:[%s3268_s9 + $0x750] sm:$0xff] %v1553_v42  ;;  %1556 = vst [vmem:[%s3268_s9 + $0x758] sm:$0xff] %v1555_v43  ;;  %v1559_v45 = vld [vmem:[%s3263_s8 + $0xed0] sm:$0xff] }
  0x90   : > { %1558 = vst [vmem:[%s3268_s9 + $0x760] sm:$0xff] %v1557_v44  ;;  %v1561_v46 = vld [vmem:[%s3263_s8 + $0xee0] sm:$0xff]  ;;  %v1563_v47 = vld [vmem:[%s3263_s8 + $0xef0] sm:$0xff]  ;;  %1560 = vst [vmem:[%s3268_s9 + $0x768] sm:$0xff] %v1559_v45 }
  0x91   : > { %1562 = vst [vmem:[%s3268_s9 + $0x770] sm:$0xff] %v1561_v46  ;;  %1564 = vst [vmem:[%s3268_s9 + $0x778] sm:$0xff] %v1563_v47  ;;  %v1565_v48 = vld [vmem:[%s3263_s8 + $0xf00] sm:$0xff]  ;;  %v1567_v49 = vld [vmem:[%s3263_s8 + $0xf10] sm:$0xff] }
  0x92   : > { %v1569_v50 = vld [vmem:[%s3263_s8 + $0xf20] sm:$0xff]  ;;  %1566 = vst [vmem:[%s3268_s9 + $0x780] sm:$0xff] %v1565_v48  ;;  %1568 = vst [vmem:[%s3268_s9 + $0x788] sm:$0xff] %v1567_v49  ;;  %v1571_v51 = vld [vmem:[%s3263_s8 + $0xf30] sm:$0xff] }
  0x93   : > { %1570 = vst [vmem:[%s3268_s9 + $0x790] sm:$0xff] %v1569_v50  ;;  %v1573_v52 = vld [vmem:[%s3263_s8 + $0xf40] sm:$0xff]  ;;  %v1575_v53 = vld [vmem:[%s3263_s8 + $0xf50] sm:$0xff]  ;;  %1572 = vst [vmem:[%s3268_s9 + $0x798] sm:$0xff] %v1571_v51 }
  0x94   : > { %1574 = vst [vmem:[%s3268_s9 + $0x7a0] sm:$0xff] %v1573_v52  ;;  %1576 = vst [vmem:[%s3268_s9 + $0x7a8] sm:$0xff] %v1575_v53  ;;  %v1577_v54 = vld [vmem:[%s3263_s8 + $0xf60] sm:$0xff]  ;;  %v1579_v55 = vld [vmem:[%s3263_s8 + $0xf70] sm:$0xff] }
  0x95   : > { %v1581_v56 = vld [vmem:[%s3263_s8 + $0xf80] sm:$0xff]  ;;  %1578 = vst [vmem:[%s3268_s9 + $0x7b0] sm:$0xff] %v1577_v54  ;;  %1580 = vst [vmem:[%s3268_s9 + $0x7b8] sm:$0xff] %v1579_v55  ;;  %v1583_v57 = vld [vmem:[%s3263_s8 + $0xf90] sm:$0xff] }
  0x96   : > { %1582 = vst [vmem:[%s3268_s9 + $0x7c0] sm:$0xff] %v1581_v56  ;;  %v1585_v58 = vld [vmem:[%s3263_s8 + $0xfa0] sm:$0xff]  ;;  %v1587_v59 = vld [vmem:[%s3263_s8 + $0xfb0] sm:$0xff]  ;;  %1584 = vst [vmem:[%s3268_s9 + $0x7c8] sm:$0xff] %v1583_v57 }
  0x97   : > { %1586 = vst [vmem:[%s3268_s9 + $0x7d0] sm:$0xff] %v1585_v58  ;;  %1588 = vst [vmem:[%s3268_s9 + $0x7d8] sm:$0xff] %v1587_v59  ;;  %v1589_v60 = vld [vmem:[%s3263_s8 + $0xfc0] sm:$0xff]  ;;  %v1591_v61 = vld [vmem:[%s3263_s8 + $0xfd0] sm:$0xff] }
  0x98   : > { %v1593_v62 = vld [vmem:[%s3263_s8 + $0xfe0] sm:$0xff]  ;;  %1590 = vst [vmem:[%s3268_s9 + $0x7e0] sm:$0xff] %v1589_v60  ;;  %1592 = vst [vmem:[%s3268_s9 + $0x7e8] sm:$0xff] %v1591_v61  ;;  %v1595_v63 = vld [vmem:[%s3263_s8 + $0xff0] sm:$0xff] }
  0x99   : > { %1594 = vst [vmem:[%s3268_s9 + $0x7f0] sm:$0xff] %v1593_v62  ;;  %v1597_v0 = vld [vmem:[%s3263_s8 + $0x1000] sm:$0xff]  ;;  %v1599_v1 = vld [vmem:[%s3263_s8 + $0x1010] sm:$0xff]  ;;  %1596 = vst [vmem:[%s3268_s9 + $0x7f8] sm:$0xff] %v1595_v63 }
  0x9a   : > { %1598 = vst [vmem:[%s3268_s9 + $0x800] sm:$0xff] %v1597_v0  ;;  %1600 = vst [vmem:[%s3268_s9 + $0x808] sm:$0xff] %v1599_v1  ;;  %v1601_v2 = vld [vmem:[%s3263_s8 + $0x1020] sm:$0xff]  ;;  %v1603_v3 = vld [vmem:[%s3263_s8 + $0x1030] sm:$0xff] }
  0x9b   : > { %v1605_v4 = vld [vmem:[%s3263_s8 + $0x1040] sm:$0xff]  ;;  %1602 = vst [vmem:[%s3268_s9 + $0x810] sm:$0xff] %v1601_v2  ;;  %1604 = vst [vmem:[%s3268_s9 + $0x818] sm:$0xff] %v1603_v3  ;;  %v1607_v5 = vld [vmem:[%s3263_s8 + $0x1050] sm:$0xff] }
  0x9c   : > { %1606 = vst [vmem:[%s3268_s9 + $0x820] sm:$0xff] %v1605_v4  ;;  %v1609_v6 = vld [vmem:[%s3263_s8 + $0x1060] sm:$0xff]  ;;  %v1611_v7 = vld [vmem:[%s3263_s8 + $0x1070] sm:$0xff]  ;;  %1608 = vst [vmem:[%s3268_s9 + $0x828] sm:$0xff] %v1607_v5 }
  0x9d   : > { %1610 = vst [vmem:[%s3268_s9 + $0x830] sm:$0xff] %v1609_v6  ;;  %1612 = vst [vmem:[%s3268_s9 + $0x838] sm:$0xff] %v1611_v7  ;;  %v1613_v8 = vld [vmem:[%s3263_s8 + $0x1080] sm:$0xff]  ;;  %v1615_v9 = vld [vmem:[%s3263_s8 + $0x1090] sm:$0xff] }
  0x9e   : > { %v1617_v10 = vld [vmem:[%s3263_s8 + $0x10a0] sm:$0xff]  ;;  %1614 = vst [vmem:[%s3268_s9 + $0x840] sm:$0xff] %v1613_v8  ;;  %1616 = vst [vmem:[%s3268_s9 + $0x848] sm:$0xff] %v1615_v9  ;;  %v1619_v11 = vld [vmem:[%s3263_s8 + $0x10b0] sm:$0xff] }
  0x9f   : > { %1618 = vst [vmem:[%s3268_s9 + $0x850] sm:$0xff] %v1617_v10  ;;  %v1621_v12 = vld [vmem:[%s3263_s8 + $0x10c0] sm:$0xff]  ;;  %v1623_v13 = vld [vmem:[%s3263_s8 + $0x10d0] sm:$0xff]  ;;  %1620 = vst [vmem:[%s3268_s9 + $0x858] sm:$0xff] %v1619_v11 }
  0xa0   : > { %1622 = vst [vmem:[%s3268_s9 + $0x860] sm:$0xff] %v1621_v12  ;;  %1624 = vst [vmem:[%s3268_s9 + $0x868] sm:$0xff] %v1623_v13  ;;  %v1625_v14 = vld [vmem:[%s3263_s8 + $0x10e0] sm:$0xff]  ;;  %v1627_v15 = vld [vmem:[%s3263_s8 + $0x10f0] sm:$0xff] }
  0xa1   : > { %v1629_v16 = vld [vmem:[%s3263_s8 + $0x1100] sm:$0xff]  ;;  %1626 = vst [vmem:[%s3268_s9 + $0x870] sm:$0xff] %v1625_v14  ;;  %1628 = vst [vmem:[%s3268_s9 + $0x878] sm:$0xff] %v1627_v15  ;;  %v1631_v17 = vld [vmem:[%s3263_s8 + $0x1110] sm:$0xff] }
  0xa2   : > { %1630 = vst [vmem:[%s3268_s9 + $0x880] sm:$0xff] %v1629_v16  ;;  %v1633_v18 = vld [vmem:[%s3263_s8 + $0x1120] sm:$0xff]  ;;  %v1635_v19 = vld [vmem:[%s3263_s8 + $0x1130] sm:$0xff]  ;;  %1632 = vst [vmem:[%s3268_s9 + $0x888] sm:$0xff] %v1631_v17 }
  0xa3   : > { %1634 = vst [vmem:[%s3268_s9 + $0x890] sm:$0xff] %v1633_v18  ;;  %1636 = vst [vmem:[%s3268_s9 + $0x898] sm:$0xff] %v1635_v19  ;;  %v1637_v20 = vld [vmem:[%s3263_s8 + $0x1140] sm:$0xff]  ;;  %v1639_v21 = vld [vmem:[%s3263_s8 + $0x1150] sm:$0xff] }
  0xa4   : > { %v1641_v22 = vld [vmem:[%s3263_s8 + $0x1160] sm:$0xff]  ;;  %1638 = vst [vmem:[%s3268_s9 + $0x8a0] sm:$0xff] %v1637_v20  ;;  %1640 = vst [vmem:[%s3268_s9 + $0x8a8] sm:$0xff] %v1639_v21  ;;  %v1643_v23 = vld [vmem:[%s3263_s8 + $0x1170] sm:$0xff] }
  0xa5   : > { %1642 = vst [vmem:[%s3268_s9 + $0x8b0] sm:$0xff] %v1641_v22  ;;  %v1645_v24 = vld [vmem:[%s3263_s8 + $0x1180] sm:$0xff]  ;;  %v1647_v25 = vld [vmem:[%s3263_s8 + $0x1190] sm:$0xff]  ;;  %1644 = vst [vmem:[%s3268_s9 + $0x8b8] sm:$0xff] %v1643_v23 }
  0xa6   : > { %1646 = vst [vmem:[%s3268_s9 + $0x8c0] sm:$0xff] %v1645_v24  ;;  %1648 = vst [vmem:[%s3268_s9 + $0x8c8] sm:$0xff] %v1647_v25  ;;  %v1649_v26 = vld [vmem:[%s3263_s8 + $0x11a0] sm:$0xff]  ;;  %v1651_v27 = vld [vmem:[%s3263_s8 + $0x11b0] sm:$0xff] }
  0xa7   : > { %v1653_v28 = vld [vmem:[%s3263_s8 + $0x11c0] sm:$0xff]  ;;  %1650 = vst [vmem:[%s3268_s9 + $0x8d0] sm:$0xff] %v1649_v26  ;;  %1652 = vst [vmem:[%s3268_s9 + $0x8d8] sm:$0xff] %v1651_v27  ;;  %v1655_v29 = vld [vmem:[%s3263_s8 + $0x11d0] sm:$0xff] }
  0xa8   : > { %1654 = vst [vmem:[%s3268_s9 + $0x8e0] sm:$0xff] %v1653_v28  ;;  %v1657_v30 = vld [vmem:[%s3263_s8 + $0x11e0] sm:$0xff]  ;;  %v1659_v31 = vld [vmem:[%s3263_s8 + $0x11f0] sm:$0xff]  ;;  %1656 = vst [vmem:[%s3268_s9 + $0x8e8] sm:$0xff] %v1655_v29 }
  0xa9   : > { %1658 = vst [vmem:[%s3268_s9 + $0x8f0] sm:$0xff] %v1657_v30  ;;  %1660 = vst [vmem:[%s3268_s9 + $0x8f8] sm:$0xff] %v1659_v31  ;;  %v1661_v32 = vld [vmem:[%s3263_s8 + $0x1200] sm:$0xff]  ;;  %v1663_v33 = vld [vmem:[%s3263_s8 + $0x1210] sm:$0xff] }
  0xaa   : > { %v1665_v34 = vld [vmem:[%s3263_s8 + $0x1220] sm:$0xff]  ;;  %1662 = vst [vmem:[%s3268_s9 + $0x900] sm:$0xff] %v1661_v32  ;;  %1664 = vst [vmem:[%s3268_s9 + $0x908] sm:$0xff] %v1663_v33  ;;  %v1667_v35 = vld [vmem:[%s3263_s8 + $0x1230] sm:$0xff] }
  0xab   : > { %1666 = vst [vmem:[%s3268_s9 + $0x910] sm:$0xff] %v1665_v34  ;;  %v1669_v36 = vld [vmem:[%s3263_s8 + $0x1240] sm:$0xff]  ;;  %v1671_v37 = vld [vmem:[%s3263_s8 + $0x1250] sm:$0xff]  ;;  %1668 = vst [vmem:[%s3268_s9 + $0x918] sm:$0xff] %v1667_v35 }
  0xac   : > { %1670 = vst [vmem:[%s3268_s9 + $0x920] sm:$0xff] %v1669_v36  ;;  %1672 = vst [vmem:[%s3268_s9 + $0x928] sm:$0xff] %v1671_v37  ;;  %v1673_v38 = vld [vmem:[%s3263_s8 + $0x1260] sm:$0xff]  ;;  %v1675_v39 = vld [vmem:[%s3263_s8 + $0x1270] sm:$0xff] }
  0xad   : > { %v1677_v40 = vld [vmem:[%s3263_s8 + $0x1280] sm:$0xff]  ;;  %1674 = vst [vmem:[%s3268_s9 + $0x930] sm:$0xff] %v1673_v38  ;;  %1676 = vst [vmem:[%s3268_s9 + $0x938] sm:$0xff] %v1675_v39  ;;  %v1679_v41 = vld [vmem:[%s3263_s8 + $0x1290] sm:$0xff] }
  0xae   : > { %1678 = vst [vmem:[%s3268_s9 + $0x940] sm:$0xff] %v1677_v40  ;;  %v1681_v42 = vld [vmem:[%s3263_s8 + $0x12a0] sm:$0xff]  ;;  %v1683_v43 = vld [vmem:[%s3263_s8 + $0x12b0] sm:$0xff]  ;;  %1680 = vst [vmem:[%s3268_s9 + $0x948] sm:$0xff] %v1679_v41 }
  0xaf   : > { %1682 = vst [vmem:[%s3268_s9 + $0x950] sm:$0xff] %v1681_v42  ;;  %1684 = vst [vmem:[%s3268_s9 + $0x958] sm:$0xff] %v1683_v43  ;;  %v1685_v44 = vld [vmem:[%s3263_s8 + $0x12c0] sm:$0xff]  ;;  %v1687_v45 = vld [vmem:[%s3263_s8 + $0x12d0] sm:$0xff] }
  0xb0   : > { %v1689_v46 = vld [vmem:[%s3263_s8 + $0x12e0] sm:$0xff]  ;;  %1686 = vst [vmem:[%s3268_s9 + $0x960] sm:$0xff] %v1685_v44  ;;  %1688 = vst [vmem:[%s3268_s9 + $0x968] sm:$0xff] %v1687_v45  ;;  %v1691_v47 = vld [vmem:[%s3263_s8 + $0x12f0] sm:$0xff] }
  0xb1   : > { %1690 = vst [vmem:[%s3268_s9 + $0x970] sm:$0xff] %v1689_v46  ;;  %v1693_v48 = vld [vmem:[%s3263_s8 + $0x1300] sm:$0xff]  ;;  %v1695_v49 = vld [vmem:[%s3263_s8 + $0x1310] sm:$0xff]  ;;  %1692 = vst [vmem:[%s3268_s9 + $0x978] sm:$0xff] %v1691_v47 }
  0xb2   : > { %1694 = vst [vmem:[%s3268_s9 + $0x980] sm:$0xff] %v1693_v48  ;;  %1696 = vst [vmem:[%s3268_s9 + $0x988] sm:$0xff] %v1695_v49  ;;  %v1697_v50 = vld [vmem:[%s3263_s8 + $0x1320] sm:$0xff]  ;;  %v1699_v51 = vld [vmem:[%s3263_s8 + $0x1330] sm:$0xff] }
  0xb3   : > { %v1701_v52 = vld [vmem:[%s3263_s8 + $0x1340] sm:$0xff]  ;;  %1698 = vst [vmem:[%s3268_s9 + $0x990] sm:$0xff] %v1697_v50  ;;  %1700 = vst [vmem:[%s3268_s9 + $0x998] sm:$0xff] %v1699_v51  ;;  %v1703_v53 = vld [vmem:[%s3263_s8 + $0x1350] sm:$0xff] }
  0xb4   : > { %1702 = vst [vmem:[%s3268_s9 + $0x9a0] sm:$0xff] %v1701_v52  ;;  %v1705_v54 = vld [vmem:[%s3263_s8 + $0x1360] sm:$0xff]  ;;  %v1707_v55 = vld [vmem:[%s3263_s8 + $0x1370] sm:$0xff]  ;;  %1704 = vst [vmem:[%s3268_s9 + $0x9a8] sm:$0xff] %v1703_v53 }
  0xb5   : > { %1706 = vst [vmem:[%s3268_s9 + $0x9b0] sm:$0xff] %v1705_v54  ;;  %1708 = vst [vmem:[%s3268_s9 + $0x9b8] sm:$0xff] %v1707_v55  ;;  %v1709_v56 = vld [vmem:[%s3263_s8 + $0x1380] sm:$0xff]  ;;  %v1711_v57 = vld [vmem:[%s3263_s8 + $0x1390] sm:$0xff] }
  0xb6   : > { %v1713_v58 = vld [vmem:[%s3263_s8 + $0x13a0] sm:$0xff]  ;;  %1710 = vst [vmem:[%s3268_s9 + $0x9c0] sm:$0xff] %v1709_v56  ;;  %1712 = vst [vmem:[%s3268_s9 + $0x9c8] sm:$0xff] %v1711_v57  ;;  %v1715_v59 = vld [vmem:[%s3263_s8 + $0x13b0] sm:$0xff] }
  0xb7   : > { %1714 = vst [vmem:[%s3268_s9 + $0x9d0] sm:$0xff] %v1713_v58  ;;  %v1717_v60 = vld [vmem:[%s3263_s8 + $0x13c0] sm:$0xff]  ;;  %v1719_v61 = vld [vmem:[%s3263_s8 + $0x13d0] sm:$0xff]  ;;  %1716 = vst [vmem:[%s3268_s9 + $0x9d8] sm:$0xff] %v1715_v59 }
  0xb8   : > { %1718 = vst [vmem:[%s3268_s9 + $0x9e0] sm:$0xff] %v1717_v60  ;;  %1720 = vst [vmem:[%s3268_s9 + $0x9e8] sm:$0xff] %v1719_v61  ;;  %v1721_v62 = vld [vmem:[%s3263_s8 + $0x13e0] sm:$0xff]  ;;  %v1723_v63 = vld [vmem:[%s3263_s8 + $0x13f0] sm:$0xff] }
  0xb9   : > { %v1725_v0 = vld [vmem:[%s3263_s8 + $0x1400] sm:$0xff]  ;;  %1722 = vst [vmem:[%s3268_s9 + $0x9f0] sm:$0xff] %v1721_v62  ;;  %1724 = vst [vmem:[%s3268_s9 + $0x9f8] sm:$0xff] %v1723_v63  ;;  %v1727_v1 = vld [vmem:[%s3263_s8 + $0x1410] sm:$0xff] }
  0xba   : > { %1726 = vst [vmem:[%s3268_s9 + $0xa00] sm:$0xff] %v1725_v0  ;;  %v1729_v2 = vld [vmem:[%s3263_s8 + $0x1420] sm:$0xff]  ;;  %v1731_v3 = vld [vmem:[%s3263_s8 + $0x1430] sm:$0xff]  ;;  %1728 = vst [vmem:[%s3268_s9 + $0xa08] sm:$0xff] %v1727_v1 }
  0xbb   : > { %1730 = vst [vmem:[%s3268_s9 + $0xa10] sm:$0xff] %v1729_v2  ;;  %1732 = vst [vmem:[%s3268_s9 + $0xa18] sm:$0xff] %v1731_v3  ;;  %v1733_v4 = vld [vmem:[%s3263_s8 + $0x1440] sm:$0xff]  ;;  %v1735_v5 = vld [vmem:[%s3263_s8 + $0x1450] sm:$0xff] }
  0xbc   : > { %v1737_v6 = vld [vmem:[%s3263_s8 + $0x1460] sm:$0xff]  ;;  %1734 = vst [vmem:[%s3268_s9 + $0xa20] sm:$0xff] %v1733_v4  ;;  %1736 = vst [vmem:[%s3268_s9 + $0xa28] sm:$0xff] %v1735_v5  ;;  %v1739_v7 = vld [vmem:[%s3263_s8 + $0x1470] sm:$0xff] }
  0xbd   : > { %1738 = vst [vmem:[%s3268_s9 + $0xa30] sm:$0xff] %v1737_v6  ;;  %v1741_v8 = vld [vmem:[%s3263_s8 + $0x1480] sm:$0xff]  ;;  %v1743_v9 = vld [vmem:[%s3263_s8 + $0x1490] sm:$0xff]  ;;  %1740 = vst [vmem:[%s3268_s9 + $0xa38] sm:$0xff] %v1739_v7 }
  0xbe   : > { %1742 = vst [vmem:[%s3268_s9 + $0xa40] sm:$0xff] %v1741_v8  ;;  %1744 = vst [vmem:[%s3268_s9 + $0xa48] sm:$0xff] %v1743_v9  ;;  %v1745_v10 = vld [vmem:[%s3263_s8 + $0x14a0] sm:$0xff]  ;;  %v1747_v11 = vld [vmem:[%s3263_s8 + $0x14b0] sm:$0xff] }
  0xbf   : > { %v1749_v12 = vld [vmem:[%s3263_s8 + $0x14c0] sm:$0xff]  ;;  %1746 = vst [vmem:[%s3268_s9 + $0xa50] sm:$0xff] %v1745_v10  ;;  %1748 = vst [vmem:[%s3268_s9 + $0xa58] sm:$0xff] %v1747_v11  ;;  %v1751_v13 = vld [vmem:[%s3263_s8 + $0x14d0] sm:$0xff] }
  0xc0   : > { %1750 = vst [vmem:[%s3268_s9 + $0xa60] sm:$0xff] %v1749_v12  ;;  %v1753_v14 = vld [vmem:[%s3263_s8 + $0x14e0] sm:$0xff]  ;;  %v1755_v15 = vld [vmem:[%s3263_s8 + $0x14f0] sm:$0xff]  ;;  %1752 = vst [vmem:[%s3268_s9 + $0xa68] sm:$0xff] %v1751_v13 }
  0xc1   : > { %1754 = vst [vmem:[%s3268_s9 + $0xa70] sm:$0xff] %v1753_v14  ;;  %1756 = vst [vmem:[%s3268_s9 + $0xa78] sm:$0xff] %v1755_v15  ;;  %v1757_v16 = vld [vmem:[%s3263_s8 + $0x1500] sm:$0xff]  ;;  %v1759_v17 = vld [vmem:[%s3263_s8 + $0x1510] sm:$0xff] }
  0xc2   : > { %v1761_v18 = vld [vmem:[%s3263_s8 + $0x1520] sm:$0xff]  ;;  %1758 = vst [vmem:[%s3268_s9 + $0xa80] sm:$0xff] %v1757_v16  ;;  %1760 = vst [vmem:[%s3268_s9 + $0xa88] sm:$0xff] %v1759_v17  ;;  %v1763_v19 = vld [vmem:[%s3263_s8 + $0x1530] sm:$0xff] }
  0xc3   : > { %1762 = vst [vmem:[%s3268_s9 + $0xa90] sm:$0xff] %v1761_v18  ;;  %v1765_v20 = vld [vmem:[%s3263_s8 + $0x1540] sm:$0xff]  ;;  %v1767_v21 = vld [vmem:[%s3263_s8 + $0x1550] sm:$0xff]  ;;  %1764 = vst [vmem:[%s3268_s9 + $0xa98] sm:$0xff] %v1763_v19 }
  0xc4   : > { %1766 = vst [vmem:[%s3268_s9 + $0xaa0] sm:$0xff] %v1765_v20  ;;  %1768 = vst [vmem:[%s3268_s9 + $0xaa8] sm:$0xff] %v1767_v21  ;;  %v1769_v22 = vld [vmem:[%s3263_s8 + $0x1560] sm:$0xff]  ;;  %v1771_v23 = vld [vmem:[%s3263_s8 + $0x1570] sm:$0xff] }
  0xc5   : > { %v1773_v24 = vld [vmem:[%s3263_s8 + $0x1580] sm:$0xff]  ;;  %1770 = vst [vmem:[%s3268_s9 + $0xab0] sm:$0xff] %v1769_v22  ;;  %1772 = vst [vmem:[%s3268_s9 + $0xab8] sm:$0xff] %v1771_v23  ;;  %v1775_v25 = vld [vmem:[%s3263_s8 + $0x1590] sm:$0xff] }
  0xc6   : > { %1774 = vst [vmem:[%s3268_s9 + $0xac0] sm:$0xff] %v1773_v24  ;;  %v1777_v26 = vld [vmem:[%s3263_s8 + $0x15a0] sm:$0xff]  ;;  %v1779_v27 = vld [vmem:[%s3263_s8 + $0x15b0] sm:$0xff]  ;;  %1776 = vst [vmem:[%s3268_s9 + $0xac8] sm:$0xff] %v1775_v25 }
  0xc7   : > { %1778 = vst [vmem:[%s3268_s9 + $0xad0] sm:$0xff] %v1777_v26  ;;  %1780 = vst [vmem:[%s3268_s9 + $0xad8] sm:$0xff] %v1779_v27  ;;  %v1781_v28 = vld [vmem:[%s3263_s8 + $0x15c0] sm:$0xff]  ;;  %v1783_v29 = vld [vmem:[%s3263_s8 + $0x15d0] sm:$0xff] }
  0xc8   : > { %v1785_v30 = vld [vmem:[%s3263_s8 + $0x15e0] sm:$0xff]  ;;  %1782 = vst [vmem:[%s3268_s9 + $0xae0] sm:$0xff] %v1781_v28  ;;  %1784 = vst [vmem:[%s3268_s9 + $0xae8] sm:$0xff] %v1783_v29  ;;  %v1787_v31 = vld [vmem:[%s3263_s8 + $0x15f0] sm:$0xff] }
  0xc9   : > { %1786 = vst [vmem:[%s3268_s9 + $0xaf0] sm:$0xff] %v1785_v30  ;;  %v1789_v32 = vld [vmem:[%s3263_s8 + $0x1600] sm:$0xff]  ;;  %v1791_v33 = vld [vmem:[%s3263_s8 + $0x1610] sm:$0xff]  ;;  %1788 = vst [vmem:[%s3268_s9 + $0xaf8] sm:$0xff] %v1787_v31 }
  0xca   : > { %1790 = vst [vmem:[%s3268_s9 + $0xb00] sm:$0xff] %v1789_v32  ;;  %1792 = vst [vmem:[%s3268_s9 + $0xb08] sm:$0xff] %v1791_v33  ;;  %v1793_v34 = vld [vmem:[%s3263_s8 + $0x1620] sm:$0xff]  ;;  %v1795_v35 = vld [vmem:[%s3263_s8 + $0x1630] sm:$0xff] }
  0xcb   : > { %v1797_v36 = vld [vmem:[%s3263_s8 + $0x1640] sm:$0xff]  ;;  %1794 = vst [vmem:[%s3268_s9 + $0xb10] sm:$0xff] %v1793_v34  ;;  %1796 = vst [vmem:[%s3268_s9 + $0xb18] sm:$0xff] %v1795_v35  ;;  %v1799_v37 = vld [vmem:[%s3263_s8 + $0x1650] sm:$0xff] }
  0xcc   : > { %1798 = vst [vmem:[%s3268_s9 + $0xb20] sm:$0xff] %v1797_v36  ;;  %v1801_v38 = vld [vmem:[%s3263_s8 + $0x1660] sm:$0xff]  ;;  %v1803_v39 = vld [vmem:[%s3263_s8 + $0x1670] sm:$0xff]  ;;  %1800 = vst [vmem:[%s3268_s9 + $0xb28] sm:$0xff] %v1799_v37 }
  0xcd   : > { %1802 = vst [vmem:[%s3268_s9 + $0xb30] sm:$0xff] %v1801_v38  ;;  %1804 = vst [vmem:[%s3268_s9 + $0xb38] sm:$0xff] %v1803_v39  ;;  %v1805_v40 = vld [vmem:[%s3263_s8 + $0x1680] sm:$0xff]  ;;  %v1807_v41 = vld [vmem:[%s3263_s8 + $0x1690] sm:$0xff] }
  0xce   : > { %v1809_v42 = vld [vmem:[%s3263_s8 + $0x16a0] sm:$0xff]  ;;  %1806 = vst [vmem:[%s3268_s9 + $0xb40] sm:$0xff] %v1805_v40  ;;  %1808 = vst [vmem:[%s3268_s9 + $0xb48] sm:$0xff] %v1807_v41  ;;  %v1811_v43 = vld [vmem:[%s3263_s8 + $0x16b0] sm:$0xff] }
  0xcf   : > { %1810 = vst [vmem:[%s3268_s9 + $0xb50] sm:$0xff] %v1809_v42  ;;  %v1813_v44 = vld [vmem:[%s3263_s8 + $0x16c0] sm:$0xff]  ;;  %v1815_v45 = vld [vmem:[%s3263_s8 + $0x16d0] sm:$0xff]  ;;  %1812 = vst [vmem:[%s3268_s9 + $0xb58] sm:$0xff] %v1811_v43 }
  0xd0   : > { %1814 = vst [vmem:[%s3268_s9 + $0xb60] sm:$0xff] %v1813_v44  ;;  %1816 = vst [vmem:[%s3268_s9 + $0xb68] sm:$0xff] %v1815_v45  ;;  %v1817_v46 = vld [vmem:[%s3263_s8 + $0x16e0] sm:$0xff]  ;;  %v1819_v47 = vld [vmem:[%s3263_s8 + $0x16f0] sm:$0xff] }
  0xd1   : > { %v1821_v48 = vld [vmem:[%s3263_s8 + $0x1700] sm:$0xff]  ;;  %1818 = vst [vmem:[%s3268_s9 + $0xb70] sm:$0xff] %v1817_v46  ;;  %1820 = vst [vmem:[%s3268_s9 + $0xb78] sm:$0xff] %v1819_v47  ;;  %v1823_v49 = vld [vmem:[%s3263_s8 + $0x1710] sm:$0xff] }
  0xd2   : > { %1822 = vst [vmem:[%s3268_s9 + $0xb80] sm:$0xff] %v1821_v48  ;;  %v1825_v50 = vld [vmem:[%s3263_s8 + $0x1720] sm:$0xff]  ;;  %v1827_v51 = vld [vmem:[%s3263_s8 + $0x1730] sm:$0xff]  ;;  %1824 = vst [vmem:[%s3268_s9 + $0xb88] sm:$0xff] %v1823_v49 }
  0xd3   : > { %1826 = vst [vmem:[%s3268_s9 + $0xb90] sm:$0xff] %v1825_v50  ;;  %1828 = vst [vmem:[%s3268_s9 + $0xb98] sm:$0xff] %v1827_v51  ;;  %v1829_v52 = vld [vmem:[%s3263_s8 + $0x1740] sm:$0xff]  ;;  %v1831_v53 = vld [vmem:[%s3263_s8 + $0x1750] sm:$0xff] }
  0xd4   : > { %v1833_v54 = vld [vmem:[%s3263_s8 + $0x1760] sm:$0xff]  ;;  %1830 = vst [vmem:[%s3268_s9 + $0xba0] sm:$0xff] %v1829_v52  ;;  %1832 = vst [vmem:[%s3268_s9 + $0xba8] sm:$0xff] %v1831_v53  ;;  %v1835_v55 = vld [vmem:[%s3263_s8 + $0x1770] sm:$0xff] }
  0xd5   : > { %1834 = vst [vmem:[%s3268_s9 + $0xbb0] sm:$0xff] %v1833_v54  ;;  %v1837_v56 = vld [vmem:[%s3263_s8 + $0x1780] sm:$0xff]  ;;  %v1839_v57 = vld [vmem:[%s3263_s8 + $0x1790] sm:$0xff]  ;;  %1836 = vst [vmem:[%s3268_s9 + $0xbb8] sm:$0xff] %v1835_v55 }
  0xd6   : > { %1838 = vst [vmem:[%s3268_s9 + $0xbc0] sm:$0xff] %v1837_v56  ;;  %1840 = vst [vmem:[%s3268_s9 + $0xbc8] sm:$0xff] %v1839_v57  ;;  %v1841_v58 = vld [vmem:[%s3263_s8 + $0x17a0] sm:$0xff]  ;;  %v1843_v59 = vld [vmem:[%s3263_s8 + $0x17b0] sm:$0xff] }
  0xd7   : > { %v1845_v60 = vld [vmem:[%s3263_s8 + $0x17c0] sm:$0xff]  ;;  %1842 = vst [vmem:[%s3268_s9 + $0xbd0] sm:$0xff] %v1841_v58  ;;  %1844 = vst [vmem:[%s3268_s9 + $0xbd8] sm:$0xff] %v1843_v59  ;;  %v1847_v61 = vld [vmem:[%s3263_s8 + $0x17d0] sm:$0xff] }
  0xd8   : > { %1846 = vst [vmem:[%s3268_s9 + $0xbe0] sm:$0xff] %v1845_v60  ;;  %v1849_v62 = vld [vmem:[%s3263_s8 + $0x17e0] sm:$0xff]  ;;  %v1851_v63 = vld [vmem:[%s3263_s8 + $0x17f0] sm:$0xff]  ;;  %1848 = vst [vmem:[%s3268_s9 + $0xbe8] sm:$0xff] %v1847_v61 }
  0xd9   : > { %1850 = vst [vmem:[%s3268_s9 + $0xbf0] sm:$0xff] %v1849_v62  ;;  %1852 = vst [vmem:[%s3268_s9 + $0xbf8] sm:$0xff] %v1851_v63  ;;  %v1853_v0 = vld [vmem:[%s3263_s8 + $0x1800] sm:$0xff]  ;;  %v1855_v1 = vld [vmem:[%s3263_s8 + $0x1810] sm:$0xff] }
  0xda   : > { %v1857_v2 = vld [vmem:[%s3263_s8 + $0x1820] sm:$0xff]  ;;  %1854 = vst [vmem:[%s3268_s9 + $0xc00] sm:$0xff] %v1853_v0  ;;  %1856 = vst [vmem:[%s3268_s9 + $0xc08] sm:$0xff] %v1855_v1  ;;  %v1859_v3 = vld [vmem:[%s3263_s8 + $0x1830] sm:$0xff] }
  0xdb   : > { %1858 = vst [vmem:[%s3268_s9 + $0xc10] sm:$0xff] %v1857_v2  ;;  %v1861_v4 = vld [vmem:[%s3263_s8 + $0x1840] sm:$0xff]  ;;  %v1863_v5 = vld [vmem:[%s3263_s8 + $0x1850] sm:$0xff]  ;;  %1860 = vst [vmem:[%s3268_s9 + $0xc18] sm:$0xff] %v1859_v3 }
  0xdc   : > { %1862 = vst [vmem:[%s3268_s9 + $0xc20] sm:$0xff] %v1861_v4  ;;  %1864 = vst [vmem:[%s3268_s9 + $0xc28] sm:$0xff] %v1863_v5  ;;  %v1865_v6 = vld [vmem:[%s3263_s8 + $0x1860] sm:$0xff]  ;;  %v1867_v7 = vld [vmem:[%s3263_s8 + $0x1870] sm:$0xff] }
  0xdd   : > { %v1869_v8 = vld [vmem:[%s3263_s8 + $0x1880] sm:$0xff]  ;;  %1866 = vst [vmem:[%s3268_s9 + $0xc30] sm:$0xff] %v1865_v6  ;;  %1868 = vst [vmem:[%s3268_s9 + $0xc38] sm:$0xff] %v1867_v7  ;;  %v1871_v9 = vld [vmem:[%s3263_s8 + $0x1890] sm:$0xff] }
  0xde   : > { %1870 = vst [vmem:[%s3268_s9 + $0xc40] sm:$0xff] %v1869_v8  ;;  %v1873_v10 = vld [vmem:[%s3263_s8 + $0x18a0] sm:$0xff]  ;;  %v1875_v11 = vld [vmem:[%s3263_s8 + $0x18b0] sm:$0xff]  ;;  %1872 = vst [vmem:[%s3268_s9 + $0xc48] sm:$0xff] %v1871_v9 }
  0xdf   : > { %1874 = vst [vmem:[%s3268_s9 + $0xc50] sm:$0xff] %v1873_v10  ;;  %1876 = vst [vmem:[%s3268_s9 + $0xc58] sm:$0xff] %v1875_v11  ;;  %v1877_v12 = vld [vmem:[%s3263_s8 + $0x18c0] sm:$0xff]  ;;  %v1879_v13 = vld [vmem:[%s3263_s8 + $0x18d0] sm:$0xff] }
  0xe0   : > { %v1881_v14 = vld [vmem:[%s3263_s8 + $0x18e0] sm:$0xff]  ;;  %1878 = vst [vmem:[%s3268_s9 + $0xc60] sm:$0xff] %v1877_v12  ;;  %1880 = vst [vmem:[%s3268_s9 + $0xc68] sm:$0xff] %v1879_v13  ;;  %v1883_v15 = vld [vmem:[%s3263_s8 + $0x18f0] sm:$0xff] }
  0xe1   : > { %1882 = vst [vmem:[%s3268_s9 + $0xc70] sm:$0xff] %v1881_v14  ;;  %v1885_v16 = vld [vmem:[%s3263_s8 + $0x1900] sm:$0xff]  ;;  %v1887_v17 = vld [vmem:[%s3263_s8 + $0x1910] sm:$0xff]  ;;  %1884 = vst [vmem:[%s3268_s9 + $0xc78] sm:$0xff] %v1883_v15 }
  0xe2   : > { %1886 = vst [vmem:[%s3268_s9 + $0xc80] sm:$0xff] %v1885_v16  ;;  %1888 = vst [vmem:[%s3268_s9 + $0xc88] sm:$0xff] %v1887_v17  ;;  %v1889_v18 = vld [vmem:[%s3263_s8 + $0x1920] sm:$0xff]  ;;  %v1891_v19 = vld [vmem:[%s3263_s8 + $0x1930] sm:$0xff] }
  0xe3   : > { %v1893_v20 = vld [vmem:[%s3263_s8 + $0x1940] sm:$0xff]  ;;  %1890 = vst [vmem:[%s3268_s9 + $0xc90] sm:$0xff] %v1889_v18  ;;  %1892 = vst [vmem:[%s3268_s9 + $0xc98] sm:$0xff] %v1891_v19  ;;  %v1895_v21 = vld [vmem:[%s3263_s8 + $0x1950] sm:$0xff] }
  0xe4   : > { %1894 = vst [vmem:[%s3268_s9 + $0xca0] sm:$0xff] %v1893_v20  ;;  %v1897_v22 = vld [vmem:[%s3263_s8 + $0x1960] sm:$0xff]  ;;  %v1899_v23 = vld [vmem:[%s3263_s8 + $0x1970] sm:$0xff]  ;;  %1896 = vst [vmem:[%s3268_s9 + $0xca8] sm:$0xff] %v1895_v21 }
  0xe5   : > { %1898 = vst [vmem:[%s3268_s9 + $0xcb0] sm:$0xff] %v1897_v22  ;;  %1900 = vst [vmem:[%s3268_s9 + $0xcb8] sm:$0xff] %v1899_v23  ;;  %v1901_v24 = vld [vmem:[%s3263_s8 + $0x1980] sm:$0xff]  ;;  %v1903_v25 = vld [vmem:[%s3263_s8 + $0x1990] sm:$0xff] }
  0xe6   : > { %v1905_v26 = vld [vmem:[%s3263_s8 + $0x19a0] sm:$0xff]  ;;  %1902 = vst [vmem:[%s3268_s9 + $0xcc0] sm:$0xff] %v1901_v24  ;;  %1904 = vst [vmem:[%s3268_s9 + $0xcc8] sm:$0xff] %v1903_v25  ;;  %v1907_v27 = vld [vmem:[%s3263_s8 + $0x19b0] sm:$0xff] }
  0xe7   : > { %1906 = vst [vmem:[%s3268_s9 + $0xcd0] sm:$0xff] %v1905_v26  ;;  %v1909_v28 = vld [vmem:[%s3263_s8 + $0x19c0] sm:$0xff]  ;;  %v1911_v29 = vld [vmem:[%s3263_s8 + $0x19d0] sm:$0xff]  ;;  %1908 = vst [vmem:[%s3268_s9 + $0xcd8] sm:$0xff] %v1907_v27 }
  0xe8   : > { %1910 = vst [vmem:[%s3268_s9 + $0xce0] sm:$0xff] %v1909_v28  ;;  %1912 = vst [vmem:[%s3268_s9 + $0xce8] sm:$0xff] %v1911_v29  ;;  %v1913_v30 = vld [vmem:[%s3263_s8 + $0x19e0] sm:$0xff]  ;;  %v1915_v31 = vld [vmem:[%s3263_s8 + $0x19f0] sm:$0xff] }
  0xe9   : > { %v1917_v32 = vld [vmem:[%s3263_s8 + $0x1a00] sm:$0xff]  ;;  %1914 = vst [vmem:[%s3268_s9 + $0xcf0] sm:$0xff] %v1913_v30  ;;  %1916 = vst [vmem:[%s3268_s9 + $0xcf8] sm:$0xff] %v1915_v31  ;;  %v1919_v33 = vld [vmem:[%s3263_s8 + $0x1a10] sm:$0xff] }
  0xea   : > { %1918 = vst [vmem:[%s3268_s9 + $0xd00] sm:$0xff] %v1917_v32  ;;  %v1921_v34 = vld [vmem:[%s3263_s8 + $0x1a20] sm:$0xff]  ;;  %v1923_v35 = vld [vmem:[%s3263_s8 + $0x1a30] sm:$0xff]  ;;  %1920 = vst [vmem:[%s3268_s9 + $0xd08] sm:$0xff] %v1919_v33 }
  0xeb   : > { %1922 = vst [vmem:[%s3268_s9 + $0xd10] sm:$0xff] %v1921_v34  ;;  %1924 = vst [vmem:[%s3268_s9 + $0xd18] sm:$0xff] %v1923_v35  ;;  %v1925_v36 = vld [vmem:[%s3263_s8 + $0x1a40] sm:$0xff]  ;;  %v1927_v37 = vld [vmem:[%s3263_s8 + $0x1a50] sm:$0xff] }
  0xec   : > { %v1929_v38 = vld [vmem:[%s3263_s8 + $0x1a60] sm:$0xff]  ;;  %1926 = vst [vmem:[%s3268_s9 + $0xd20] sm:$0xff] %v1925_v36  ;;  %1928 = vst [vmem:[%s3268_s9 + $0xd28] sm:$0xff] %v1927_v37  ;;  %v1931_v39 = vld [vmem:[%s3263_s8 + $0x1a70] sm:$0xff] }
  0xed   : > { %1930 = vst [vmem:[%s3268_s9 + $0xd30] sm:$0xff] %v1929_v38  ;;  %v1933_v40 = vld [vmem:[%s3263_s8 + $0x1a80] sm:$0xff]  ;;  %v1935_v41 = vld [vmem:[%s3263_s8 + $0x1a90] sm:$0xff]  ;;  %1932 = vst [vmem:[%s3268_s9 + $0xd38] sm:$0xff] %v1931_v39 }
  0xee   : > { %1934 = vst [vmem:[%s3268_s9 + $0xd40] sm:$0xff] %v1933_v40  ;;  %1936 = vst [vmem:[%s3268_s9 + $0xd48] sm:$0xff] %v1935_v41  ;;  %v1937_v42 = vld [vmem:[%s3263_s8 + $0x1aa0] sm:$0xff]  ;;  %v1939_v43 = vld [vmem:[%s3263_s8 + $0x1ab0] sm:$0xff] }
  0xef   : > { %v1941_v44 = vld [vmem:[%s3263_s8 + $0x1ac0] sm:$0xff]  ;;  %1938 = vst [vmem:[%s3268_s9 + $0xd50] sm:$0xff] %v1937_v42  ;;  %1940 = vst [vmem:[%s3268_s9 + $0xd58] sm:$0xff] %v1939_v43  ;;  %v1943_v45 = vld [vmem:[%s3263_s8 + $0x1ad0] sm:$0xff] }
  0xf0   : > { %1942 = vst [vmem:[%s3268_s9 + $0xd60] sm:$0xff] %v1941_v44  ;;  %v1945_v46 = vld [vmem:[%s3263_s8 + $0x1ae0] sm:$0xff]  ;;  %v1947_v47 = vld [vmem:[%s3263_s8 + $0x1af0] sm:$0xff]  ;;  %1944 = vst [vmem:[%s3268_s9 + $0xd68] sm:$0xff] %v1943_v45 }
  0xf1   : > { %1946 = vst [vmem:[%s3268_s9 + $0xd70] sm:$0xff] %v1945_v46  ;;  %1948 = vst [vmem:[%s3268_s9 + $0xd78] sm:$0xff] %v1947_v47  ;;  %v1949_v48 = vld [vmem:[%s3263_s8 + $0x1b00] sm:$0xff]  ;;  %v1951_v49 = vld [vmem:[%s3263_s8 + $0x1b10] sm:$0xff] }
  0xf2   : > { %v1953_v50 = vld [vmem:[%s3263_s8 + $0x1b20] sm:$0xff]  ;;  %1950 = vst [vmem:[%s3268_s9 + $0xd80] sm:$0xff] %v1949_v48  ;;  %1952 = vst [vmem:[%s3268_s9 + $0xd88] sm:$0xff] %v1951_v49  ;;  %v1955_v51 = vld [vmem:[%s3263_s8 + $0x1b30] sm:$0xff] }
  0xf3   : > { %1954 = vst [vmem:[%s3268_s9 + $0xd90] sm:$0xff] %v1953_v50  ;;  %v1957_v52 = vld [vmem:[%s3263_s8 + $0x1b40] sm:$0xff]  ;;  %v1959_v53 = vld [vmem:[%s3263_s8 + $0x1b50] sm:$0xff]  ;;  %1956 = vst [vmem:[%s3268_s9 + $0xd98] sm:$0xff] %v1955_v51 }
  0xf4   : > { %1958 = vst [vmem:[%s3268_s9 + $0xda0] sm:$0xff] %v1957_v52  ;;  %1960 = vst [vmem:[%s3268_s9 + $0xda8] sm:$0xff] %v1959_v53  ;;  %v1961_v54 = vld [vmem:[%s3263_s8 + $0x1b60] sm:$0xff]  ;;  %v1963_v55 = vld [vmem:[%s3263_s8 + $0x1b70] sm:$0xff] }
  0xf5   : > { %v1965_v56 = vld [vmem:[%s3263_s8 + $0x1b80] sm:$0xff]  ;;  %1962 = vst [vmem:[%s3268_s9 + $0xdb0] sm:$0xff] %v1961_v54  ;;  %1964 = vst [vmem:[%s3268_s9 + $0xdb8] sm:$0xff] %v1963_v55 }
  0xf6   : > { %1966 = vst [vmem:[%s3268_s9 + $0xdc0] sm:$0xff] %v1965_v56 }
  0xf7 PF: > { %p2847_p9 = scmp.ge.s32.totalorder %s3136_s18, 1  ;;  %p1997_p10 = scmp.lt.s32.totalorder %s3136_s18, 5 }
  0xf9   : > { %p1998_p11 = pnand %p2847_p9, %p1997_p10 }
  0xfa   : > { %s2004_s10 = sand.u32 (!%p1998_p11), 1, %s3112_s12   ;;  %p2046_p12 = scmp.lt.s32.totalorder (!%p1998_p11), %s3124_s15, 1 }
  0xfb   : > { %2001 = sbr.rel (%p1998_p11) target bundleno = 512 (0x200), region = 66  ;;  %p2048_p13 = scmp.lt.s32.totalorder (!%p1998_p11), %s3120_s14, 1 }
  0xfc   : > { %s4153_s11 = smul.u32 (!%p1998_p11), 3528, %s2004_s10  ;;  %s2851_s22 = sshll.u32 (!%p1998_p11), %s3120_s14, 3 }
  0xfd   : > { %s2899_s21 = smul.u32 (!%p1998_p11), 24, %s2004_s10 }
  0xfe   : > { %s2006_s9 = scalar_lea.vmem (!%p1998_p11), [#allocation2], %s4153_s11 }
  0xff   : > { %s4170_s10 = scalar_lea.vmem (!%p1998_p11), [#allocation3], %s2899_s21 }
 0x100   : > { %s2047_s24 = scalar_select %p2046_p12, %s3124_s15, 1  ;;  %v4172_v58 = vmov 0.0   ;;  %v4174_v59 = vmov 0.0   ;;  %v4176_v60 = vmov 0.0   ;;  %v4178_v61 = vmov 0.0  }
 0x101   : > { %s2049_s25 = scalar_select %p2048_p13, %s3120_s14, 1 }
 0x102   : > { %s2848_s26 = sshll.u32 %s2047_s24, 1  ;;  %s2900_s28 = smul.u32 120, %s2047_s24 }
 0x103   : > { %s2054_s29 = sadd.s32 %s2848_s26, %s2049_s25  ;;  %s4180_s24 = smov 0  }
 0x104   : > { %s2849_s30 = sshll.u32 %s2054_s29, 3  ;;  %s4162_s6 = scalar_lea.vmem %s4495_s2, %s2900_s28 }
 0x105   : > { %s2056_s8 = scalar_lea.vmem %s4494_s1, %s2849_s30 }
 0x106   : > { %v4167_v57 = vld [vmem:[%s2056_s8] sm:$0xff] }
 0x107 LB: >> { %s2085_s21 = sadd.s32 %s3156_s24, %s2851_s22  ;;  %s2852_s25 = smul.u32 168, %s3156_s24  ;;  %s3156_s24 = sphi %s4180_s24, %s2073_s24   ;;  %v3152_v61 = vphi %v4178_v61, %v4502_v61   ;;  %v3148_v60 = vphi %v4176_v60, %v4501_v60   ;;  %v3144_v59 = vphi %v4174_v59, %v4500_v59   ;;  %v3140_v58 = vphi %v4172_v58, %v4499_v58  }
 0x108   : >> { %s2086_s26 = scalar_lea.vmem %s4162_s6, %s2085_s21  ;;  %s3158_s29 = smov 127  }
 0x109   : >> { %v4200_v62 = vld [vmem:[%s2086_s26 + $0x50] sm:$0xff]  ;;  %s4204_s28 = scalar_lea.vmem %s2006_s9, %s2852_s25 [#allocation2]  ;;  %v4206_v63 = vld [vmem:[%s2086_s26] sm:$0xff]  ;;  %v4212_v2 = vld [vmem:[%s2086_s26 + $0x28] sm:$0xff]  ;;  %s3159_s30 = smov 126  }
 0x10a   : >> { %2111 = vrot.lane.b32.xlu1 %v4200_v62, %s3158_s29  ;;  %2107 = vrot.lane.b32.xlu0 %v4206_v63, %s3158_s29  ;;  %v2081_v0 = vld [vmem:[%s4204_s28] sm:$0xff]  ;;  %v2854_v1 = vld [vmem:[%s4204_s28 + $0x8] sm:$0xff]  ;;  %s3160_s4 = smov 125   ;;  %s3161_s5 = smov 124  }
 0x10b   : >> { %v2082_v3 = vsub.f32 %v2081_v0, %v4167_v57  ;;  %v2101_v5 = vsub.f32 %v2854_v1, %v4167_v57  ;;  %v2856_v6 = vld [vmem:[%s4204_s28 + $0x10] sm:$0xff]  ;;  %v2858_v9 = vld [vmem:[%s4204_s28 + $0x18] sm:$0xff]  ;;  %v2860_v12 = vld [vmem:[%s4204_s28 + $0x20] sm:$0xff]  ;;  %s3162_s7 = smov 123   ;;  %s3163_s12 = smov 122  }
 0x10c   : >> { %v2127_v8 = vsub.f32 %v2856_v6, %v4167_v57  ;;  %v2150_v11 = vsub.f32 %v2858_v9, %v4167_v57  ;;  %v2173_v14 = vsub.f32 %v2860_v12, %v4167_v57  ;;  %v2862_v15 = vld [vmem:[%s4204_s28 + $0x28] sm:$0xff]  ;;  %v2864_v19 = vld [vmem:[%s4204_s28 + $0x30] sm:$0xff]  ;;  %v2866_v24 = vld [vmem:[%s4204_s28 + $0x38] sm:$0xff]  ;;  %s3164_s8 = smov 121   ;;  %s3165_s21 = smov 120  }
 0x10d   : >> { %v2083_v4 = vmul.f32 1.442695, %v2082_v3  ;;  %v2102_v7 = vmul.f32 1.442695, %v2101_v5  ;;  %v2196_v17 = vsub.f32 %v2862_v15, %v4167_v57  ;;  %v2219_v22 = vsub.f32 %v2864_v19, %v4167_v57  ;;  %v2868_v29 = vld [vmem:[%s4204_s28 + $0x40] sm:$0xff]  ;;  %v2870_v34 = vld [vmem:[%s4204_s28 + $0x48] sm:$0xff] }
 0x10e   : >> { %2130 = vrot.lane.b32.xlu1 %v4206_v63, %s3159_s30  ;;  %2109 = vrot.lane.b32.xlu0 %v4212_v2, %s3158_s29  ;;  %v2128_v10 = vmul.f32 1.442695, %v2127_v8  ;;  %v2151_v13 = vmul.f32 1.442695, %v2150_v11  ;;  %v2174_v16 = vmul.f32 1.442695, %v2173_v14  ;;  %v2242_v27 = vsub.f32 %v2866_v24, %v4167_v57 }
 0x10f   : >> { %3018 = vpow2.f32 %v2083_v4  ;;  %v2197_v21 = vmul.f32 1.442695, %v2196_v17  ;;  %v2220_v26 = vmul.f32 1.442695, %v2219_v22  ;;  %v2265_v32 = vsub.f32 %v2868_v29, %v4167_v57  ;;  %v2872_v39 = vld [vmem:[%s4204_s28 + $0x50] sm:$0xff]  ;;  %v2874_v44 = vld [vmem:[%s4204_s28 + $0x58] sm:$0xff] }
 0x110   : >> { %3020 = vpow2.f32 %v2102_v7  ;;  %v2243_v31 = vmul.f32 1.442695, %v2242_v27  ;;  %v2288_v37 = vsub.f32 %v2870_v34, %v4167_v57  ;;  %v2311_v42 = vsub.f32 %v2872_v39, %v4167_v57  ;;  %v2876_v49 = vld [vmem:[%s4204_s28 + $0x60] sm:$0xff]  ;;  %s3166_s25 = smov 119   ;;  %v2878_v54 = vld [vmem:[%s4204_s28 + $0x68] sm:$0xff]  ;;  %s3167_s26 = smov 118  }
 0x111   : >> { %3022 = vpow2.f32 %v2128_v10  ;;  %v2266_v36 = vmul.f32 1.442695, %v2265_v32  ;;  %v2334_v47 = vsub.f32 %v2874_v44, %v4167_v57  ;;  %v2357_v52 = vsub.f32 %v2876_v49, %v4167_v57  ;;  %v2880_v1 = vld [vmem:[%s4204_s28 + $0x70] sm:$0xff]  ;;  %v2882_v7 = vld [vmem:[%s4204_s28 + $0x78] sm:$0xff]  ;;  %s3168_s29 = smov 117   ;;  %v2884_v12 = vld [vmem:[%s4204_s28 + $0x80] sm:$0xff] }
 0x112   : >> { %2134 = vrot.lane.b32.xlu1 %v4200_v62, %s3159_s30  ;;  %2132 = vrot.lane.b32.xlu0 %v4212_v2, %s3159_s30  ;;  %3024 = vpow2.f32 %v2151_v13  ;;  %v2289_v41 = vmul.f32 1.442695, %v2288_v37  ;;  %v2312_v46 = vmul.f32 1.442695, %v2311_v42  ;;  %v2403_v5 = vsub.f32 %v2880_v1, %v4167_v57  ;;  %s3169_s30 = smov 116   ;;  %v2886_v17 = vld [vmem:[%s4204_s28 + $0x88] sm:$0xff] }
 0x113   : >> { %3026 = vpow2.f32 %v2174_v16  ;;  %v2335_v51 = vmul.f32 1.442695, %v2334_v47  ;;  %v2358_v56 = vmul.f32 1.442695, %v2357_v52  ;;  %v2426_v10 = vsub.f32 %v2882_v7, %v4167_v57  ;;  %v2888_v24 = vld [vmem:[%s4204_s28 + $0x90] sm:$0xff]  ;;  %v2890_v34 = vld [vmem:[%s4204_s28 + $0x98] sm:$0xff] }
 0x114   : >> { %3028 = vpow2.f32 %v2197_v21  ;;  %v2404_v9 = vmul.f32 1.442695, %v2403_v5  ;;  %v2449_v15 = vsub.f32 %v2884_v12, %v4167_v57  ;;  %v2472_v21 = vsub.f32 %v2886_v17, %v4167_v57  ;;  %s2073_s24 = sadd.s32 1, %s3156_s24  }
 0x115   : >> { %3030 = vpow2.f32 %v2220_v26  ;;  %v2427_v14 = vmul.f32 1.442695, %v2426_v10  ;;  %v2495_v27 = vsub.f32 %v2888_v24, %v4167_v57  ;;  %p2070_p0 = scmp.ge.s32.totalorder %s2073_s24, 21  }
 0x116   : >> { %2155 = vrot.lane.b32.xlu1 %v4212_v2, %s3160_s4  ;;  %2153 = vrot.lane.b32.xlu0 %v4206_v63, %s3160_s4  ;;  %3032 = vpow2.f32 %v2243_v31  ;;  %v2473_v26 = vmul.f32 1.442695, %v2472_v21  ;;  %vm2564_vm0 = vcmask (%p2070_p0), 97280  }
 0x117   : >> { %3034 = vpow2.f32 %v2266_v36  ;;  %v2496_v31 = vmul.f32 1.442695, %v2495_v27  ;;  %v2518_v36 = vsub.f32 %v2890_v34, %v4167_v57 }
 0x118   : >> { %3036 = vpow2.f32 %v2289_v41 }
 0x119   : >> { %3038 = vpow2.f32 %v2312_v46  ;;  %v2519_v37 = vmul.f32 1.442695, %v2518_v36 }
 0x11a   : >> { %2176 = vrot.lane.b32.xlu1 %v4206_v63, %s3161_s5  ;;  %2157 = vrot.lane.b32.xlu0 %v4200_v62, %s3160_s4  ;;  %3040 = vpow2.f32 %v2335_v51  ;;  %s3170_s4 = smov 115  }
 0x11b   : >> { %3042 = vpow2.f32 %v2358_v56 }
 0x11c   : >> { %v4232_v18 = vpop.eup %3018 }
 0x11d   : >> { %v2096_v20 = vadd.f32 %v3140_v58, %v4232_v18  ;;  %v4239_v23 = vpop.eup %3020  ;;  %v2380_v58 = vsub.f32 %v2878_v54, %v4167_v57  ;;  %v2092_v1 = vmul.f32 %v4232_v18, %v4200_v62  ;;  %v2091_v5 = vmul.f32 %v4232_v18, %v4212_v2 }
 0x11e   : >> { %2180 = vrot.lane.b32.xlu1 %v4200_v62, %s3161_s5  ;;  %2178 = vrot.lane.b32.xlu0 %v4212_v2, %s3161_s5  ;;  %v4246_v28 = vpop.eup %3022  ;;  %s3171_s5 = smov 114  }
 0x11f   : >> { %v2122_v25 = vadd.f32 %v4239_v23, %v2096_v20  ;;  %v4253_v33 = vpop.eup %3024  ;;  %v2381_v4 = vmul.f32 1.442695, %v2380_v58  ;;  %v2450_v20 = vmul.f32 1.442695, %v2449_v15 }
 0x120   : >> { %v4260_v38 = vpop.eup %3026 }
 0x121   : >> { %v2145_v30 = vadd.f32 %v4246_v28, %v2122_v25  ;;  %v4267_v43 = vpop.eup %3028  ;;  %3044 = vpow2.f32 %v2381_v4 }
 0x122   : >> { %2201 = vrot.lane.b32.xlu1 %v4212_v2, %s3162_s7  ;;  %2199 = vrot.lane.b32.xlu0 %v4206_v63, %s3162_s7  ;;  %v4274_v48 = vpop.eup %3030  ;;  %3046 = vpow2.f32 %v2404_v9 }
 0x123   : >> { %v2168_v35 = vadd.f32 %v4253_v33, %v2145_v30  ;;  %v4281_v53 = vpop.eup %3032  ;;  %3048 = vpow2.f32 %v2427_v14 }
 0x124   : >> { %v4288_v0 = vpop.eup %3034  ;;  %3050 = vpow2.f32 %v2450_v20 }
 0x125   : >> { %v2191_v40 = vadd.f32 %v4260_v38, %v2168_v35  ;;  %v4295_v6 = vpop.eup %3036  ;;  %3052 = vpow2.f32 %v2473_v26 }
 0x126   : >> { %2222 = vrot.lane.b32.xlu1 %v4206_v63, %s3163_s12  ;;  %2203 = vrot.lane.b32.xlu0 %v4200_v62, %s3162_s7  ;;  %v4302_v11 = vpop.eup %3038  ;;  %3054 = vpow2.f32 %v2496_v31  ;;  %s3172_s7 = smov 113  }
 0x127   : >> { %v2214_v45 = vadd.f32 %v4267_v43, %v2191_v40  ;;  %v4309_v16 = vpop.eup %3040  ;;  %v2892_v40 = vld [vmem:[%s4204_s28 + $0xa0] sm:$0xff]  ;;  %3056 = vpow2.f32 %v2519_v37  ;;  %s3174_s28 = smov 111  }
 0x128   : >> { %v4316_v22 = vpop.eup %3042  ;;  %v2541_v42 = vsub.f32 %v2892_v40, %v4167_v57 }
 0x129   : >> { %v2237_v50 = vadd.f32 %v4274_v48, %v2214_v45 }
 0x12a   : >> { %2226 = vrot.lane.b32.xlu1 %v4200_v62, %s3163_s12  ;;  %2224 = vrot.lane.b32.xlu0 %v4212_v2, %s3163_s12  ;;  %v2542_v44 = vmul.f32 1.442695, %v2541_v42  ;;  %s3173_s12 = smov 112  }
 0x12b   : >> { %v2260_v55 = vadd.f32 %v4281_v53, %v2237_v50 }
 0x12c   : >> { %3058 = vpow2.f32 %v2542_v44 }
 0x12d   : >> { %v2283_v3 = vadd.f32 %v4288_v0, %v2260_v55 }
 0x12e   : >> { %2247 = vrot.lane.b32.xlu1 %v4212_v2, %s3164_s8  ;;  %2245 = vrot.lane.b32.xlu0 %v4206_v63, %s3164_s8  ;;  %v4323_v29 = vpop.eup %3044 }
 0x12f   : >> { %v2306_v8 = vadd.f32 %v4295_v6, %v2283_v3  ;;  %v4328_v32 = vpop.eup %3046  ;;  %v2090_v3 = vmul.f32 %v4232_v18, %v4206_v63 }
 0x130   : >> { %v4335_v39 = vpop.eup %3048 }
 0x131   : >> { %v2329_v13 = vadd.f32 %v4302_v11, %v2306_v8  ;;  %v4342_v45 = vpop.eup %3050  ;;  %v2093_v4 = vadd.f32 %v3152_v61, %v2090_v3 }
 0x132   : >> { %2268 = vrot.lane.b32.xlu1 %v4206_v63, %s3165_s21  ;;  %2249 = vrot.lane.b32.xlu0 %v4200_v62, %s3164_s8  ;;  %v4347_v47 = vpop.eup %3052  ;;  %s3175_s8 = smov 110  }
 0x133   : >> { %v2352_v19 = vadd.f32 %v4309_v16, %v2329_v13  ;;  %v4352_v50 = vpop.eup %3054  ;;  %v2094_v13 = vadd.f32 %v3148_v60, %v2091_v5 }
 0x134   : >> { %v4357_v52 = vpop.eup %3056 }
 0x135   : >> { %v2375_v25 = vadd.f32 %v4316_v22, %v2352_v19 }
 0x136   : >> { %2272 = vrot.lane.b32.xlu1 %v4200_v62, %s3165_s21  ;;  %2270 = vrot.lane.b32.xlu0 %v4212_v2, %s3165_s21  ;;  %s3176_s21 = smov 109  }
 0x137   : >> { %v2398_v30 = vadd.f32 %v4323_v29, %v2375_v25 }
 0x139   : >> { %v2421_v35 = vadd.f32 %v4328_v32, %v2398_v30  ;;  %v4362_v55 = vpop.eup %3058 }
 0x13a   : >> { %2293 = vrot.lane.b32.xlu1 %v4212_v2, %s3166_s25  ;;  %2291 = vrot.lane.b32.xlu0 %v4206_v63, %s3166_s25 }
 0x13b   : >> { %v2444_v41 = vadd.f32 %v4335_v39, %v2421_v35 }
 0x13d   : >> { %v2467_v46 = vadd.f32 %v4342_v45, %v2444_v41 }
 0x13e   : >> { %2314 = vrot.lane.b32.xlu1 %v4206_v63, %s3167_s26  ;;  %2295 = vrot.lane.b32.xlu0 %v4200_v62, %s3166_s25  ;;  %s3177_s25 = smov 108  }
 0x13f   : >> { %v2490_v49 = vadd.f32 %v4347_v47, %v2467_v46 }
 0x141   : >> { %v2513_v51 = vadd.f32 %v4352_v50, %v2490_v49 }
 0x142   : >> { %2318 = vrot.lane.b32.xlu1 %v4200_v62, %s3167_s26  ;;  %2316 = vrot.lane.b32.xlu0 %v4212_v2, %s3167_s26 }
 0x143   : >> { %v2536_v54 = vadd.f32 %v4357_v52, %v2513_v51 }
 0x145   : >> { %v4367_v58 = vadd.f32 %v4362_v55, %v2536_v54  }
 0x146   : >> { %2339 = vrot.lane.b32.xlu1 %v4212_v2, %s3168_s29  ;;  %2337 = vrot.lane.b32.xlu0 %v4206_v63, %s3168_s29 }
 0x147   : >> { %v4498_v56 = vmov %v4367_v58  ;;  %v2095_v58 = vadd.f32 %v3144_v59, %v2092_v1 }
 0x148   : > { %3060 = vrcp.f32 (%p2070_p0), %v4498_v56 }
 0x14a   : >> { %2360 = vrot.lane.b32.xlu1 %v4206_v63, %s3169_s30  ;;  %2341 = vrot.lane.b32.xlu0 %v4200_v62, %s3168_s29 }
 0x14e   : >> { %2364 = vrot.lane.b32.xlu1 %v4200_v62, %s3169_s30  ;;  %2362 = vrot.lane.b32.xlu0 %v4212_v2, %s3169_s30 }
 0x152   : >> { %2385 = vrot.lane.b32.xlu1 %v4212_v2, %s3170_s4  ;;  %2383 = vrot.lane.b32.xlu0 %v4206_v63, %s3170_s4 }
 0x156   : >> { %2406 = vrot.lane.b32.xlu1 %v4206_v63, %s3171_s5  ;;  %2387 = vrot.lane.b32.xlu0 %v4200_v62, %s3170_s4 }
 0x15a   : >> { %2410 = vrot.lane.b32.xlu1 %v4200_v62, %s3171_s5  ;;  %2408 = vrot.lane.b32.xlu0 %v4212_v2, %s3171_s5 }
 0x15e   : >> { %2431 = vrot.lane.b32.xlu1 %v4212_v2, %s3172_s7  ;;  %2429 = vrot.lane.b32.xlu0 %v4206_v63, %s3172_s7 }
 0x162   : >> { %2452 = vrot.lane.b32.xlu1 %v4206_v63, %s3173_s12  ;;  %2433 = vrot.lane.b32.xlu0 %v4200_v62, %s3172_s7 }
 0x166   : >> { %2456 = vrot.lane.b32.xlu1 %v4200_v62, %s3173_s12  ;;  %2454 = vrot.lane.b32.xlu0 %v4212_v2, %s3173_s12 }
 0x16a   : >> { %2477 = vrot.lane.b32.xlu1 %v4212_v2, %s3174_s28  ;;  %2475 = vrot.lane.b32.xlu0 %v4206_v63, %s3174_s28 }
 0x16e   : >> { %2498 = vrot.lane.b32.xlu1 %v4206_v63, %s3175_s8  ;;  %2479 = vrot.lane.b32.xlu0 %v4200_v62, %s3174_s28 }
 0x172   : >> { %2502 = vrot.lane.b32.xlu1 %v4200_v62, %s3175_s8  ;;  %2500 = vrot.lane.b32.xlu0 %v4212_v2, %s3175_s8 }
 0x176   : >> { %2523 = vrot.lane.b32.xlu1 %v4212_v2, %s3176_s21  ;;  %2521 = vrot.lane.b32.xlu0 %v4206_v63, %s3176_s21 }
 0x17a   : >> { %2544 = vrot.lane.b32.xlu1 %v4206_v63, %s3177_s25  ;;  %2525 = vrot.lane.b32.xlu0 %v4200_v62, %s3176_s21 }
 0x17c   : >> { %v2112_v7 = vpop.permute.xlu1 %2111  ;;  %v2108_v8 = vpop.permute.xlu0 %2107 }
 0x17d   : >> { %v2118_v9 = vmul.f32 %v4239_v23, %v2112_v7  ;;  %v2116_v10 = vmul.f32 %v4239_v23, %v2108_v8 }
 0x17e   : >> { %2548 = vrot.lane.b32.xlu1 %v4200_v62, %s3177_s25  ;;  %2546 = vrot.lane.b32.xlu0 %v4212_v2, %s3177_s25 }
 0x17f   : >> { %v2121_v63 = vadd.f32 %v2118_v9, %v2095_v58  ;;  %v2119_v12 = vadd.f32 %v2116_v10, %v2093_v4 }
 0x180   : >> { %v2131_v59 = vpop.permute.xlu1 %2130  ;;  %v2110_v14 = vpop.permute.xlu0 %2109 }
 0x181   : >> { %v2139_v61 = vmul.f32 %v4246_v28, %v2131_v59  ;;  %v2117_v18 = vmul.f32 %v4239_v23, %v2110_v14 }
 0x183   : >> { %v2142_v15 = vadd.f32 %v2139_v61, %v2119_v12  ;;  %v2120_v17 = vadd.f32 %v2117_v18, %v2094_v13 }
 0x184   : >> { %v2135_v19 = vpop.permute.xlu1 %2134  ;;  %v2133_v20 = vpop.permute.xlu0 %2132 }
 0x185   : >> { %v2141_v21 = vmul.f32 %v4246_v28, %v2135_v19  ;;  %v2140_v62 = vmul.f32 %v4246_v28, %v2133_v20 }
 0x187   : >> { %v2144_v24 = vadd.f32 %v2141_v21, %v2121_v63  ;;  %v2143_v2 = vadd.f32 %v2140_v62, %v2120_v17 }
 0x188   : >> { %v2156_v25 = vpop.permute.xlu1 %2155  ;;  %v2154_v26 = vpop.permute.xlu0 %2153 }
 0x189   : >> { %v2163_v60 = vmul.f32 %v4253_v33, %v2156_v25  ;;  %v2162_v27 = vmul.f32 %v4253_v33, %v2154_v26 }
 0x18b   : >> { %v2166_v30 = vadd.f32 %v2163_v60, %v2143_v2  ;;  %v2165_v31 = vadd.f32 %v2162_v27, %v2142_v15 }
 0x18c   : >> { %v2177_v34 = vpop.permute.xlu1 %2176  ;;  %v2158_v23 = vpop.permute.xlu0 %2157 }
 0x18d   : >> { %v2185_v35 = vmul.f32 %v4260_v38, %v2177_v34  ;;  %v2164_v36 = vmul.f32 %v4253_v33, %v2158_v23 }
 0x18f   : >> { %v2188_v37 = vadd.f32 %v2185_v35, %v2165_v31  ;;  %v2167_v40 = vadd.f32 %v2164_v36, %v2144_v24 }
 0x190   : >> { %v2181_v41 = vpop.permute.xlu1 %2180  ;;  %v2179_v28 = vpop.permute.xlu0 %2178 }
 0x191   : >> { %v2187_v42 = vmul.f32 %v4260_v38, %v2181_v41  ;;  %v2186_v44 = vmul.f32 %v4260_v38, %v2179_v28 }
 0x193   : >> { %v2190_v46 = vadd.f32 %v2187_v42, %v2167_v40  ;;  %v2189_v49 = vadd.f32 %v2186_v44, %v2166_v30 }
 0x194   : >> { %v2202_v51 = vpop.permute.xlu1 %2201  ;;  %v2200_v54 = vpop.permute.xlu0 %2199 }
 0x195   : >> { %v2209_v1 = vmul.f32 %v4267_v43, %v2202_v51  ;;  %v2208_v3 = vmul.f32 %v4267_v43, %v2200_v54 }
 0x197   : >> { %v2212_v58 = vadd.f32 %v2209_v1, %v2189_v49  ;;  %v2211_v4 = vadd.f32 %v2208_v3, %v2188_v37 }
 0x198   : >> { %v2223_v5 = vpop.permute.xlu1 %2222  ;;  %v2204_v33 = vpop.permute.xlu0 %2203 }
 0x199   : >> { %v2231_v7 = vmul.f32 %v4274_v48, %v2223_v5  ;;  %v2210_v8 = vmul.f32 %v4267_v43, %v2204_v33 }
 0x19b   : >> { %v2234_v9 = vadd.f32 %v2231_v7, %v2211_v4  ;;  %v2213_v10 = vadd.f32 %v2210_v8, %v2190_v46 }
 0x19c   : >> { %v2227_v63 = vpop.permute.xlu1 %2226  ;;  %v2225_v38 = vpop.permute.xlu0 %2224 }
 0x19d   : >> { %v2233_v12 = vmul.f32 %v4274_v48, %v2227_v63  ;;  %v2232_v13 = vmul.f32 %v4274_v48, %v2225_v38 }
 0x19f   : >> { %v2236_v59 = vadd.f32 %v2233_v12, %v2213_v10  ;;  %v2235_v14 = vadd.f32 %v2232_v13, %v2212_v58 }
 0x1a0   : >> { %v2248_v61 = vpop.permute.xlu1 %2247  ;;  %v2246_v18 = vpop.permute.xlu0 %2245 }
 0x1a1   : >> { %v2255_v15 = vmul.f32 %v4281_v53, %v2248_v61  ;;  %v2254_v17 = vmul.f32 %v4281_v53, %v2246_v18 }
 0x1a3   : >> { %v2258_v19 = vadd.f32 %v2255_v15, %v2235_v14  ;;  %v2257_v20 = vadd.f32 %v2254_v17, %v2234_v9 }
 0x1a4   : >> { %v2269_v21 = vpop.permute.xlu1 %2268  ;;  %v2250_v43 = vpop.permute.xlu0 %2249 }
 0x1a5   : >> { %v2277_v62 = vmul.f32 %v4288_v0, %v2269_v21  ;;  %v2256_v24 = vmul.f32 %v4281_v53, %v2250_v43 }
 0x1a7   : >> { %v2280_v2 = vadd.f32 %v2277_v62, %v2257_v20  ;;  %v2259_v25 = vadd.f32 %v2256_v24, %v2236_v59 }
 0x1a8   : >> { %v2273_v26 = vpop.permute.xlu1 %2272  ;;  %v2271_v48 = vpop.permute.xlu0 %2270 }
 0x1a9   : >> { %v2279_v60 = vmul.f32 %v4288_v0, %v2273_v26  ;;  %v2278_v27 = vmul.f32 %v4288_v0, %v2271_v48 }
 0x1ab   : >> { %v2282_v30 = vadd.f32 %v2279_v60, %v2259_v25  ;;  %v2281_v31 = vadd.f32 %v2278_v27, %v2258_v19 }
 0x1ac   : >> { %v2294_v34 = vpop.permute.xlu1 %2293  ;;  %v2292_v23 = vpop.permute.xlu0 %2291 }
 0x1ad   : >> { %v2301_v35 = vmul.f32 %v4295_v6, %v2294_v34  ;;  %v2300_v36 = vmul.f32 %v4295_v6, %v2292_v23 }
 0x1af   : >> { %v2304_v37 = vadd.f32 %v2301_v35, %v2281_v31  ;;  %v2303_v40 = vadd.f32 %v2300_v36, %v2280_v2 }
 0x1b0   : >> { %v2315_v41 = vpop.permute.xlu1 %2314  ;;  %v2296_v53 = vpop.permute.xlu0 %2295 }
 0x1b1   : >> { %v2323_v28 = vmul.f32 %v4302_v11, %v2315_v41  ;;  %v2302_v42 = vmul.f32 %v4295_v6, %v2296_v53 }
 0x1b3   : >> { %v2326_v44 = vadd.f32 %v2323_v28, %v2303_v40  ;;  %v2305_v46 = vadd.f32 %v2302_v42, %v2282_v30 }
 0x1b4   : >> { %v2319_v49 = vpop.permute.xlu1 %2318  ;;  %v2317_v0 = vpop.permute.xlu0 %2316 }
 0x1b5   : >> { %v2325_v51 = vmul.f32 %v4302_v11, %v2319_v49  ;;  %v2324_v54 = vmul.f32 %v4302_v11, %v2317_v0 }
 0x1b7   : >> { %v2328_v1 = vadd.f32 %v2325_v51, %v2305_v46  ;;  %v2327_v3 = vadd.f32 %v2324_v54, %v2304_v37 }
 0x1b8   : >> { %v2340_v58 = vpop.permute.xlu1 %2339  ;;  %v2338_v4 = vpop.permute.xlu0 %2337 }
 0x1b9   : >> { %v2347_v5 = vmul.f32 %v4309_v16, %v2340_v58  ;;  %v2346_v33 = vmul.f32 %v4309_v16, %v2338_v4 }
 0x1bb   : >> { %v2350_v7 = vadd.f32 %v2347_v5, %v2327_v3  ;;  %v2349_v8 = vadd.f32 %v2346_v33, %v2326_v44 }
 0x1bc   : >> { %v2361_v9 = vpop.permute.xlu1 %2360  ;;  %v2342_v6 = vpop.permute.xlu0 %2341 }
 0x1bd   : >> { %v2369_v10 = vmul.f32 %v4316_v22, %v2361_v9  ;;  %v2348_v63 = vmul.f32 %v4309_v16, %v2342_v6 }
 0x1bf   : >> { %v2372_v38 = vadd.f32 %v2369_v10, %v2349_v8  ;;  %v2351_v12 = vadd.f32 %v2348_v63, %v2328_v1 }
 0x1c0   : >> { %v2365_v13 = vpop.permute.xlu1 %2364  ;;  %v2363_v11 = vpop.permute.xlu0 %2362 }
 0x1c1   : >> { %v2371_v59 = vmul.f32 %v4316_v22, %v2365_v13  ;;  %v2370_v14 = vmul.f32 %v4316_v22, %v2363_v11 }
 0x1c3   : >> { %v2374_v61 = vadd.f32 %v2371_v59, %v2351_v12  ;;  %v2373_v18 = vadd.f32 %v2370_v14, %v2350_v7 }
 0x1c4   : >> { %v2386_v15 = vpop.permute.xlu1 %2385  ;;  %v2384_v17 = vpop.permute.xlu0 %2383 }
 0x1c5   : >> { %v2393_v19 = vmul.f32 %v4323_v29, %v2386_v15  ;;  %v2392_v20 = vmul.f32 %v4323_v29, %v2384_v17 }
 0x1c7   : >> { %v2396_v21 = vadd.f32 %v2393_v19, %v2373_v18  ;;  %v2395_v43 = vadd.f32 %v2392_v20, %v2372_v38 }
 0x1c8   : >> { %v2407_v62 = vpop.permute.xlu1 %2406  ;;  %v2388_v16 = vpop.permute.xlu0 %2387 }
 0x1c9   : >> { %v2415_v24 = vmul.f32 %v4328_v32, %v2407_v62  ;;  %v2394_v2 = vmul.f32 %v4323_v29, %v2388_v16 }
 0x1cb   : >> { %v2418_v25 = vadd.f32 %v2415_v24, %v2395_v43  ;;  %v2397_v26 = vadd.f32 %v2394_v2, %v2374_v61 }
 0x1cc   : >> { %v2411_v48 = vpop.permute.xlu1 %2410  ;;  %v2409_v22 = vpop.permute.xlu0 %2408 }
 0x1cd   : >> { %v2417_v60 = vmul.f32 %v4328_v32, %v2411_v48  ;;  %v2416_v27 = vmul.f32 %v4328_v32, %v2409_v22 }
 0x1cf   : >> { %v2420_v30 = vadd.f32 %v2417_v60, %v2397_v26  ;;  %v2419_v31 = vadd.f32 %v2416_v27, %v2396_v21 }
 0x1d0   : >> { %v2432_v34 = vpop.permute.xlu1 %2431  ;;  %v2430_v23 = vpop.permute.xlu0 %2429 }
 0x1d1   : >> { %v2439_v35 = vmul.f32 %v4335_v39, %v2432_v34  ;;  %v2438_v36 = vmul.f32 %v4335_v39, %v2430_v23 }
 0x1d3   : >> { %v2442_v37 = vadd.f32 %v2439_v35, %v2419_v31  ;;  %v2441_v40 = vadd.f32 %v2438_v36, %v2418_v25 }
 0x1d4   : >> { %v2453_v41 = vpop.permute.xlu1 %2452  ;;  %v2434_v29 = vpop.permute.xlu0 %2433 }
 0x1d5   : >> { %v2461_v53 = vmul.f32 %v4342_v45, %v2453_v41  ;;  %v2440_v28 = vmul.f32 %v4335_v39, %v2434_v29 }
 0x1d7   : >> { %v2464_v42 = vadd.f32 %v2461_v53, %v2441_v40  ;;  %v2443_v44 = vadd.f32 %v2440_v28, %v2420_v30 }
 0x1d8   : >> { %v2457_v46 = vpop.permute.xlu1 %2456  ;;  %v2455_v32 = vpop.permute.xlu0 %2454 }
 0x1d9   : >> { %v2463_v49 = vmul.f32 %v4342_v45, %v2457_v46  ;;  %v2462_v0 = vmul.f32 %v4342_v45, %v2455_v32 }
 0x1db   : >> { %v2466_v51 = vadd.f32 %v2463_v49, %v2443_v44  ;;  %v2465_v54 = vadd.f32 %v2462_v0, %v2442_v37 }
 0x1dc   : >> { %v2478_v1 = vpop.permute.xlu1 %2477  ;;  %v2476_v3 = vpop.permute.xlu0 %2475 }
 0x1dd   : >> { %v2485_v58 = vmul.f32 %v4347_v47, %v2478_v1  ;;  %v2484_v4 = vmul.f32 %v4347_v47, %v2476_v3 }
 0x1df   : >> { %v2488_v5 = vadd.f32 %v2485_v58, %v2465_v54  ;;  %v2487_v33 = vadd.f32 %v2484_v4, %v2464_v42  ;;  %v4499_v58 = vmov %v4498_v56 }
 0x1e0   : >> { %v2499_v7 = vpop.permute.xlu1 %2498  ;;  %v2480_v39 = vpop.permute.xlu0 %2479 }
 0x1e1   : >> { %v2507_v8 = vmul.f32 %v4352_v50, %v2499_v7  ;;  %v2486_v9 = vmul.f32 %v4347_v47, %v2480_v39 }
 0x1e3   : >> { %v2510_v6 = vadd.f32 %v2507_v8, %v2487_v33  ;;  %v2489_v10 = vadd.f32 %v2486_v9, %v2466_v51 }
 0x1e4   : >> { %v2503_v63 = vpop.permute.xlu1 %2502  ;;  %v2501_v45 = vpop.permute.xlu0 %2500 }
 0x1e5   : >> { %v2509_v38 = vmul.f32 %v4352_v50, %v2503_v63  ;;  %v2508_v12 = vmul.f32 %v4352_v50, %v2501_v45 }
 0x1e7   : >> { %v2512_v13 = vadd.f32 %v2509_v38, %v2489_v10  ;;  %v2511_v11 = vadd.f32 %v2508_v12, %v2488_v5 }
 0x1e8   : >> { %v2524_v59 = vpop.permute.xlu1 %2523  ;;  %v2522_v14 = vpop.permute.xlu0 %2521 }
 0x1e9   : >> { %v2531_v61 = vmul.f32 %v4357_v52, %v2524_v59  ;;  %v2530_v18 = vmul.f32 %v4357_v52, %v2522_v14 }
 0x1eb   : >> { %v2534_v15 = vadd.f32 %v2531_v61, %v2511_v11  ;;  %v2533_v17 = vadd.f32 %v2530_v18, %v2510_v6 }
 0x1ec   : >> { %v2545_v19 = vpop.permute.xlu1 %2544  ;;  %v2526_v47 = vpop.permute.xlu0 %2525 }
 0x1ed   : >> { %v2553_v20 = vmul.f32 %v4362_v55, %v2545_v19  ;;  %v2532_v21 = vmul.f32 %v4357_v52, %v2526_v47  ;;  %v3061_v52 = vpop.eup (%p2070_p0), %3060 }
 0x1ef   : >> { %v2556_v43 = vadd.f32 %v2553_v20, %v2533_v17   ;;  %v2535_v62 = vadd.f32 %v2532_v21, %v2512_v13 }
 0x1f0   : >> { %v2549_v16 = vpop.permute.xlu1 %2548  ;;  %v2547_v50 = vpop.permute.xlu0 %2546 }
 0x1f1   : >> { %v2555_v24 = vmul.f32 %v4362_v55, %v2549_v16  ;;  %v2554_v2 = vmul.f32 %v4362_v55, %v2547_v50  ;;  %v4502_v61 = vmov %v2556_v43  ;;  %2072 = sbr.rel (!%p2070_p0) target bundleno = 263 (0x107), region = 178  ;;  %v2561_v55 = vmul.f32 (%p2070_p0), %v3061_v52, %v2556_v43 }
 0x1f3   : >> { %v2558_v25 = vadd.f32 %v2555_v24, %v2535_v62   ;;  %v2557_v26 = vadd.f32 %v2554_v2, %v2534_v15   ;;  %2565 = vst.msk [vmem:[%s4170_s10] sm:$0xff] (%p2070_p0), %vm2564_vm0, %v2561_v55 }
 0x1f5   : >> { %v4500_v59 = vmov %v2558_v25  ;;  %v4501_v60 = vmov %v2557_v26  ;;  %v2562_v48 = vmul.f32 (%p2070_p0), %v3061_v52, %v2557_v26  ;;  %v2563_v22 = vmul.f32 (%p2070_p0), %v3061_v52, %v2558_v25 }
 0x1f6   : > { %2574 = sbr.rel (!%p3246_p6) target bundleno = 512 (0x200), region = 81 }
 0x1f7   : > { %2566 = vst.msk [vmem:[%s4170_s10 + $0x8] sm:$0xff] %vm2564_vm0, %v2562_v48  ;;  %2567 = vst.msk [vmem:[%s4170_s10 + $0x10] sm:$0xff] %vm2564_vm0, %v2563_v22  ;;  %s2901_s11 = smul.u32 (%p3246_p6), 6, %s3124_s15 }
 0x1f9   : > { %s2577_s22 = sadd.s32 (%p3246_p6), %s3120_s14, %s2901_s11 }
 0x1fa   : > { %v2612_v57 = vld [vmem:[%s4170_s10] sm:$0xff] (%p3246_p6)  ;;  %s2893_s6 = sshll.u32 (%p3246_p6), %s2577_s22, 3 }
 0x1fb   : > { %s2579_s26 = scalar_lea.vmem %s4496_s3, %s2893_s6 }
 0x1fc   : > { %2613 = vst [vmem:[%s2579_s26] sm:$0xff] %v2612_v57 }
 0x1fe   : > { %v2614_v56 = vld [vmem:[%s4170_s10 + $0x8] sm:$0xff]  ;;  %v2616_v60 = vld [vmem:[%s4170_s10 + $0x10] sm:$0xff] }
 0x1ff   : > { %2615 = vst [vmem:[%s2579_s26 + $0x10] sm:$0xff] %v2614_v56  ;;  %2617 = vst [vmem:[%s2579_s26 + $0x20] sm:$0xff] %v2616_v60 }
 0x200 PF: > { %s13_s18 = sadd.s32 1, %s3136_s18   ;;  %s4503_s12 = smov %s3116_s13 }
 0x201   : > { %p10_p1 = scmp.ge.s32.totalorder %s13_s18, 6   ;;  %s4504_s13 = smov %s3254_s27 }
 0x202   : > { %s4505_s14 = smov %s3128_s16  ;;  %s4506_s15 = smov %s3132_s17 }
 0x203   : > { %s4507_s16 = smov %s4510_s19  ;;  %s4508_s17 = smov %s4514_s20 }
 0x204   :  { %12 = sbr.rel (!%p10_p1) target bundleno = 4 (0x4), region = 189 }

</bundles_post_ra>
